<compile_context>
chip_gen: v7x
topology: tpu7x:2x2x1
jax: 0.10.0
libtpu: 0.0.40
codegen_flags: <defaults>
</compile_context>

<pallas_src>
import functools

import numpy as np
import jax
import jax.numpy as jnp
from jax import lax
from jax.experimental import pallas as pl
from jax.experimental.pallas import tpu as pltpu

_BN_EPS = 1e-5
_LANES = 128


def _round_up(n, m=_LANES):
    return ((n + m - 1) // m) * m


# ----------------------------------------------------------------------------
# In-kernel helpers
# ----------------------------------------------------------------------------
def _conv3x3_from_padded(xp_ref, w_ref, H, W):
    """3x3 stride-1 conv as 9 shifted-slice matmuls (no materialized im2col).

    xp_ref: (H+2, W+2, Cin) f32 VMEM scratch (zero spatial border).
    w_ref : (9, Cin, Cout) bf16.
    Returns (H*W, Cout) f32 accumulator.
    """
    cin = xp_ref.shape[-1]
    cout = w_ref.shape[-1]
    acc = jnp.zeros((H * W, cout), jnp.float32)
    for dy in range(3):
        for dx in range(3):
            t = dy * 3 + dx
            patch = xp_ref[dy:dy + H, dx:dx + W, :].reshape(H * W, cin)
            acc = acc + jnp.dot(patch.astype(jnp.bfloat16), w_ref[t],
                                preferred_element_type=jnp.float32)
    return acc


def _spatial_mix(y, rh_ref, rw_ref, Ho, Wo):
    """Separable spatial mix: out[o,p,c] = sum_{h,w} rh[o,h]*rw[p,w]*y[h,w,c].

    Used for bilinear upsampling (interp matrices) and stride-2 decimation
    (0/1 selection matrices).  Source spatial dims are small, so this is a
    cheap VPU weighted sum over source rows/cols.
    TODO(synk): for production-size feature maps this should become two MXU
    matmuls instead of the unrolled VPU accumulation.
    """
    Hs, Ws, C = y.shape
    yh = jnp.zeros((Ho, Ws, C), jnp.float32)
    for h in range(Hs):
        col = rh_ref[:, h:h + 1]                       # (Ho, 1)
        yh = yh + col[:, :, None] * y[h:h + 1, :, :]
    out = jnp.zeros((Ho, Wo, C), jnp.float32)
    for w in range(Ws):
        col = rw_ref[:, w:w + 1]                       # (Wo, 1)
        out = out + col[None, :, :] * yh[:, w:w + 1, :]
    return out


# ----------------------------------------------------------------------------
# Pallas kernels
# ----------------------------------------------------------------------------
def _basic_block_kernel(x_ref, w1_ref, s1_ref, b1_ref, w2_ref, s2_ref, b2_ref,
                        o_ref, xpad_ref, hpad_ref, *, H, W):
    """Fused HRNet BasicBlock: conv3x3+BN+ReLU, conv3x3+BN, +residual, ReLU."""
    cin = x_ref.shape[-1]
    cout = w1_ref.shape[-1]

    # Zero-padded copy of the input lives only in VMEM (no HBM padding copy).
    xpad_ref[...] = jnp.zeros(xpad_ref.shape, xpad_ref.dtype)
    xpad_ref[1:H + 1, 1:W + 1, :] = x_ref[0].astype(jnp.float32)

    # conv1 + BN + ReLU  -> padded VMEM scratch (never written to HBM)
    y1 = _conv3x3_from_padded(xpad_ref, w1_ref, H, W)
    y1 = jnp.maximum(y1 * s1_ref[...] + b1_ref[...], 0.0)
    hpad_ref[...] = jnp.zeros(hpad_ref.shape, hpad_ref.dtype)
    hpad_ref[1:H + 1, 1:W + 1, :] = y1.reshape(H, W, cout)

    # conv2 + BN + residual + ReLU
    y2 = _conv3x3_from_padded(hpad_ref, w2_ref, H, W)
    res = x_ref[0].reshape(H * W, cin).astype(jnp.float32)
    y2 = jnp.maximum(y2 * s2_ref[...] + b2_ref[...] + res, 0.0)
    o_ref[0] = y2.astype(o_ref.dtype).reshape(H, W, cout)


def _fuse_up_kernel(x_ref, w_ref, s_ref, b_ref, rh_ref, rw_ref, o_ref,
                    *, Hs, Ws, Ho, Wo):
    """1x1 conv + BN + bilinear (align_corners=True) upsample, fused."""
    cin = x_ref.shape[-1]
    cout = w_ref.shape[-1]
    y = jnp.dot(x_ref[0].reshape(Hs * Ws, cin), w_ref[...],
                preferred_element_type=jnp.float32)
    y = y * s_ref[...] + b_ref[...]
    y = _spatial_mix(y.reshape(Hs, Ws, cout), rh_ref, rw_ref, Ho, Wo)
    o_ref[0] = y.astype(o_ref.dtype)


def _fuse_down_kernel(x_ref, w_ref, s_ref, b_ref, dh_ref, dw_ref, o_ref,
                      xpad_ref, *, H, W, Ho, Wo, relu):
    """3x3 stride-2 conv + BN (+ReLU) for the downsample fuse path."""
    cout = w_ref.shape[-1]
    xpad_ref[...] = jnp.zeros(xpad_ref.shape, xpad_ref.dtype)
    xpad_ref[1:H + 1, 1:W + 1, :] = x_ref[0].astype(jnp.float32)
    y = _conv3x3_from_padded(xpad_ref, w_ref, H, W)
    y = y * s_ref[...] + b_ref[...]
    if relu:
        y = jnp.maximum(y, 0.0)
    # TODO(synk): stride-2 is realized as a stride-1 conv followed by a 0/1
    # decimation mix (avoids strided VMEM slices); ~4x extra MXU work on this
    # small fuse path only.
    y = _spatial_mix(y.reshape(H, W, cout), dh_ref, dw_ref, Ho, Wo)
    o_ref[0] = y.astype(o_ref.dtype)


def _make_sum_relu_kernel(n_in):
    def kernel(*refs):
        o_ref = refs[n_in]
        acc = refs[0][...].astype(jnp.float32)
        for r in refs[1:n_in]:
            acc = acc + r[...].astype(jnp.float32)
        o_ref[...] = jnp.maximum(acc, 0.0)
    return kernel


# ----------------------------------------------------------------------------
# Pallas wrappers
# ----------------------------------------------------------------------------
def _cost(flops, bytes_accessed):
    return pl.CostEstimate(flops=int(flops), transcendentals=0,
                           bytes_accessed=int(bytes_accessed))


def basic_block_pallas(x, blk):
    """x: (N, H, W, Cp) bf16, channel-padded.  Returns (N, H, W, Cp) bf16."""
    N, H, W, Cp = x.shape
    w1, s1, b1 = blk["conv1"]["w"], blk["conv1"]["scale"], blk["conv1"]["bias"]
    w2, s2, b2 = blk["conv2"]["w"], blk["conv2"]["scale"], blk["conv2"]["bias"]
    Co = w1.shape[-1]
    kernel = functools.partial(_basic_block_kernel, H=H, W=W)
    flops = 2 * 2 * 9 * N * H * W * Cp * Co
    byts = N * H * W * (Cp + Co) * 2 + (w1.size + w2.size) * 2
    return pl.pallas_call(
        kernel,
        out_shape=jax.ShapeDtypeStruct((N, H, W, Co), jnp.bfloat16),
        grid=(N,),
        in_specs=[
            pl.BlockSpec((1, H, W, Cp), lambda n: (n, 0, 0, 0)),
            pl.BlockSpec(w1.shape, lambda n: (0, 0, 0)),
            pl.BlockSpec(s1.shape, lambda n: (0, 0)),
            pl.BlockSpec(b1.shape, lambda n: (0, 0)),
            pl.BlockSpec(w2.shape, lambda n: (0, 0, 0)),
            pl.BlockSpec(s2.shape, lambda n: (0, 0)),
            pl.BlockSpec(b2.shape, lambda n: (0, 0)),
        ],
        out_specs=pl.BlockSpec((1, H, W, Co), lambda n: (n, 0, 0, 0)),
        scratch_shapes=[pltpu.VMEM((H + 2, W + 2, Cp), jnp.float32),
                        pltpu.VMEM((H + 2, W + 2, Co), jnp.float32)],
        compiler_params=pltpu.CompilerParams(
            dimension_semantics=("parallel",)),
        cost_estimate=_cost(flops, byts),
    )(x, w1, s1, b1, w2, s2, b2)


def _interp_matrix(n_src, n_dst):
    # bilinear, align_corners=True
    if n_dst == 1:
        pos = np.zeros((1,), dtype=np.float64)
    else:
        pos = np.arange(n_dst, dtype=np.float64) * (n_src - 1) / (n_dst - 1)
    i0 = np.clip(np.floor(pos).astype(np.int64), 0, n_src - 1)
    i1 = np.minimum(i0 + 1, n_src - 1)
    f = (pos - i0).astype(np.float32)
    m = np.zeros((n_dst, n_src), dtype=np.float32)
    m[np.arange(n_dst), i0] += (1.0 - f)
    m[np.arange(n_dst), i1] += f
    return jnp.asarray(m)


def _decimate_matrix(n_src):
    n_dst = (n_src - 1) // 2 + 1
    m = np.zeros((n_dst, n_src), dtype=np.float32)
    m[np.arange(n_dst), 2 * np.arange(n_dst)] = 1.0
    return jnp.asarray(m)


def fuse_up_pallas(x, p, Ho, Wo):
    N, Hs, Ws, Cp = x.shape
    w, s, b = p["w"], p["scale"], p["bias"]
    Co = w.shape[-1]
    rh = _interp_matrix(Hs, Ho)     # (Ho, Hs)
    rw = _interp_matrix(Ws, Wo)     # (Wo, Ws)
    kernel = functools.partial(_fuse_up_kernel, Hs=Hs, Ws=Ws, Ho=Ho, Wo=Wo)
    flops = 2 * N * Hs * Ws * Cp * Co
    byts = N * (Hs * Ws * Cp + Ho * Wo * Co) * 2 + w.size * 2
    return pl.pallas_call(
        kernel,
        out_shape=jax.ShapeDtypeStruct((N, Ho, Wo, Co), jnp.bfloat16),
        grid=(N,),
        in_specs=[
            pl.BlockSpec((1, Hs, Ws, Cp), lambda n: (n, 0, 0, 0)),
            pl.BlockSpec(w.shape, lambda n: (0, 0)),
            pl.BlockSpec(s.shape, lambda n: (0, 0)),
            pl.BlockSpec(b.shape, lambda n: (0, 0)),
            pl.BlockSpec(rh.shape, lambda n: (0, 0)),
            pl.BlockSpec(rw.shape, lambda n: (0, 0)),
        ],
        out_specs=pl.BlockSpec((1, Ho, Wo, Co), lambda n: (n, 0, 0, 0)),
        compiler_params=pltpu.CompilerParams(
            dimension_semantics=("parallel",)),
        cost_estimate=_cost(flops, byts),
    )(x, w, s, b, rh, rw)


def fuse_down_pallas(x, p, relu):
    N, H, W, Cp = x.shape
    w, s, b = p["w"], p["scale"], p["bias"]
    Co = w.shape[-1]
    Ho = (H - 1) // 2 + 1
    Wo = (W - 1) // 2 + 1
    dh = _decimate_matrix(H)
    dw = _decimate_matrix(W)
    kernel = functools.partial(_fuse_down_kernel, H=H, W=W, Ho=Ho, Wo=Wo,
                               relu=relu)
    flops = 2 * 9 * N * H * W * Cp * Co
    byts = N * (H * W * Cp + Ho * Wo * Co) * 2 + w.size * 2
    return pl.pallas_call(
        kernel,
        out_shape=jax.ShapeDtypeStruct((N, Ho, Wo, Co), jnp.bfloat16),
        grid=(N,),
        in_specs=[
            pl.BlockSpec((1, H, W, Cp), lambda n: (n, 0, 0, 0)),
            pl.BlockSpec(w.shape, lambda n: (0, 0, 0)),
            pl.BlockSpec(s.shape, lambda n: (0, 0)),
            pl.BlockSpec(b.shape, lambda n: (0, 0)),
            pl.BlockSpec(dh.shape, lambda n: (0, 0)),
            pl.BlockSpec(dw.shape, lambda n: (0, 0)),
        ],
        out_specs=pl.BlockSpec((1, Ho, Wo, Co), lambda n: (n, 0, 0, 0)),
        scratch_shapes=[pltpu.VMEM((H + 2, W + 2, Cp), jnp.float32)],
        compiler_params=pltpu.CompilerParams(
            dimension_semantics=("parallel",)),
        cost_estimate=_cost(flops, byts),
    )(x, w, s, b, dh, dw)


def _row_tile(rows, cap=256):
    for tm in (cap, 128, 64, 32, 16, 8):
        if tm <= rows and rows % tm == 0:
            return tm
    return rows


def fuse_sum_relu_pallas(terms):
    """Variadic sum + ReLU, row-tiled (lane-dense padded channels)."""
    N, H, W, Cp = terms[0].shape
    rows = N * H * W
    tm = _row_tile(rows)
    flats = [t.reshape(rows, Cp) for t in terms]
    n = len(flats)
    out = pl.pallas_call(
        _make_sum_relu_kernel(n),
        out_shape=jax.ShapeDtypeStruct((rows, Cp), jnp.float32),
        grid=(rows // tm,),
        in_specs=[pl.BlockSpec((tm, Cp), lambda i: (i, 0))] * n,
        out_specs=pl.BlockSpec((tm, Cp), lambda i: (i, 0)),
        compiler_params=pltpu.CompilerParams(
            dimension_semantics=("parallel",)),
        cost_estimate=_cost(n * rows * Cp, (2 * n + 4) * rows * Cp),
    )(*flats)
    return out.reshape(N, H, W, Cp)


# ----------------------------------------------------------------------------
# Parameter construction (deterministic, synthetic)
# ----------------------------------------------------------------------------
def _init_conv_bn(key, cin, cout, k):
    kw, kg, kb, km, kv = jax.random.split(key, 5)
    w = jax.random.normal(kw, (k, k, cin, cout), jnp.float32) * 0.1
    gamma = jax.random.uniform(kg, (cout,), jnp.float32, 0.5, 1.5)
    beta = jax.random.normal(kb, (cout,), jnp.float32) * 0.1
    mean = jax.random.normal(km, (cout,), jnp.float32) * 0.1
    var = jax.random.uniform(kv, (cout,), jnp.float32, 0.5, 1.5)
    # TODO(synk): BatchNorm is folded as inference-mode affine (running stats);
    # train-mode batch statistics are not reproduced.
    scale = gamma * lax.rsqrt(var + _BN_EPS)
    bias = beta - mean * scale
    return {"w": w, "scale": scale, "bias": bias}


def _prep_conv(raw, cinp, coutp):
    """Channel-pad to 128 lanes, fold into kernel-ready bf16 weights.

    Padded output lanes get zero weight / zero scale / zero bias so they stay
    exactly zero through BN, residual and ReLU.
    """
    w = raw["w"]
    k, _, cin, cout = w.shape
    wpad = jnp.zeros((k, k, cinp, coutp), jnp.float32)
    wpad = wpad.at[:, :, :cin, :cout].set(w)
    wk = wpad.reshape(cinp, coutp) if k == 1 else wpad.reshape(k * k, cinp, coutp)
    scale = jnp.zeros((1, coutp), jnp.float32).at[0, :cout].set(raw["scale"])
    bias = jnp.zeros((1, coutp), jnp.float32).at[0, :cout].set(raw["bias"])
    return {"w": wk.astype(jnp.bfloat16), "scale": scale, "bias": bias,
            "w_raw": w, "scale_raw": raw["scale"], "bias_raw": raw["bias"]}


def init_hr_module(key, num_branches, num_blocks, num_channels,
                   multi_scale_output=True):
    cps = [_round_up(c) for c in num_channels]
    cnt = [0]

    def nk():
        cnt[0] += 1
        return jax.random.fold_in(key, cnt[0])

    branches = []
    for i in range(num_branches):
        c, cp = num_channels[i], cps[i]
        blocks = []
        for _ in range(num_blocks[i]):
            blocks.append({
                "conv1": _prep_conv(_init_conv_bn(nk(), c, c, 3), cp, cp),
                "conv2": _prep_conv(_init_conv_bn(nk(), c, c, 3), cp, cp),
            })
        branches.append(blocks)

    fuse = []
    n_out = num_branches if multi_scale_output else 1
    for i in range(n_out):
        row = []
        for j in range(num_branches):
            if j > i:
                row.append(_prep_conv(
                    _init_conv_bn(nk(), num_channels[j], num_channels[i], 1),
                    cps[j], cps[i]))
            elif j == i:
                row.append(None)
            else:
                chain = []
                for k in range(i - j):
                    if k == i - j - 1:
                        chain.append(_prep_conv(
                            _init_conv_bn(nk(), num_channels[j],
                                          num_channels[i], 3),
                            cps[j], cps[i]))
                    else:
                        chain.append(_prep_conv(
                            _init_conv_bn(nk(), num_channels[j],
                                          num_channels[j], 3),
                            cps[j], cps[j]))
                row.append(chain)
        fuse.append(row)

    return {"branches": branches, "fuse": fuse, "num_branches": num_branches,
            "num_channels": list(num_channels), "padded_channels": cps,
            "multi_scale_output": multi_scale_output}


# ----------------------------------------------------------------------------
# HighResolutionModule forward (Pallas version)
# ----------------------------------------------------------------------------
def hr_module_forward_pallas(xs, params):
    """xs: list of (N, H, W, Cp) bf16 channel-padded NHWC inputs."""
    nb = params["num_branches"]
    ncs = params["num_channels"]

    outs = []
    for i in range(nb):
        h = xs[i]
        for blk in params["branches"][i]:
            h = basic_block_pallas(h, blk)
        outs.append(h)

    if nb == 1:
        return [outs[0][..., :ncs[0]].astype(jnp.float32)]

    x_fuse = []
    for i in range(len(params["fuse"])):
        Hi, Wi = outs[i].shape[1], outs[i].shape[2]
        terms = []
        for j in range(nb):
            if j == i:
                terms.append(outs[j])
            elif j > i:
                terms.append(fuse_up_pallas(outs[j], params["fuse"][i][j],
                                            Hi, Wi))
            else:
                t = outs[j]
                chain = params["fuse"][i][j]
                for k_idx, p in enumerate(chain):
                    t = fuse_down_pallas(t, p, relu=(k_idx != len(chain) - 1))
                terms.append(t)
        y = fuse_sum_relu_pallas(terms)
        x_fuse.append(y[..., :ncs[i]])
    return x_fuse


# ----------------------------------------------------------------------------
# Pure-JAX reference (lax.conv + gather bilinear) mirroring the kernel's
# bf16 rounding points (MXU operands bf16, accumulation/epilogue f32).
# ----------------------------------------------------------------------------
def _round_bf16(x):
    return x.astype(jnp.bfloat16).astype(jnp.float32)


def _ref_conv_bn(x, p, stride=1, relu=False, residual=None):
    w = _round_bf16(p["w_raw"])
    k = w.shape[0]
    pad = (k - 1) // 2
    y = lax.conv_general_dilated(
        x, w, window_strides=(stride, stride),
        padding=[(pad, pad), (pad, pad)],
        dimension_numbers=("NHWC", "HWIO", "NHWC"))
    y = y * p["scale_raw"].reshape(1, 1, 1, -1) + p["bias_raw"].reshape(1, 1, 1, -1)
    if residual is not None:
        y = y + residual
    if relu:
        y = jnp.maximum(y, 0.0)
    return y


def _ref_bilinear(x, Ho, Wo):
    N, Hi, Wi, C = x.shape
    if (Hi, Wi) == (Ho, Wo):
        return x
    hs = jnp.linspace(0.0, Hi - 1.0, Ho) if Ho > 1 else jnp.zeros((1,))
    ws = jnp.linspace(0.0, Wi - 1.0, Wo) if Wo > 1 else jnp.zeros((1,))
    h0 = jnp.clip(jnp.floor(hs).astype(jnp.int32), 0, Hi - 1)
    h1 = jnp.minimum(h0 + 1, Hi - 1)
    hf = (hs - h0.astype(hs.dtype))[None, :, None, None]
    w0 = jnp.clip(jnp.floor(ws).astype(jnp.int32), 0, Wi - 1)
    w1 = jnp.minimum(w0 + 1, Wi - 1)
    wf = (ws - w0.astype(ws.dtype))[None, None, :, None]

    def g(hi, wi):
        return x[:, hi][:, :, wi]

    top = g(h0, w0) * (1 - wf) + g(h0, w1) * wf
    bot = g(h1, w0) * (1 - wf) + g(h1, w1) * wf
    return top * (1 - hf) + bot * hf


def hr_module_forward_ref(xs, params):
    nb = params["num_branches"]
    outs = []
    for i in range(nb):
        h = xs[i]
        for blk in params["branches"][i]:
            h1 = _round_bf16(_ref_conv_bn(h, blk["conv1"], relu=True))
            h = _round_bf16(_ref_conv_bn(h1, blk["conv2"], relu=True,
                                         residual=h))
        outs.append(h)
    if nb == 1:
        return [outs[0]]
    x_fuse = []
    for i in range(len(params["fuse"])):
        Hi, Wi = outs[i].shape[1], outs[i].shape[2]
        acc = None
        for j in range(nb):
            if j == i:
                t = outs[j]
            elif j > i:
                t = _ref_conv_bn(outs[j], params["fuse"][i][j], stride=1)
                t = _round_bf16(_ref_bilinear(t, Hi, Wi))
            else:
                t = outs[j]
                chain = params["fuse"][i][j]
                for k_idx, p in enumerate(chain):
                    t = _round_bf16(_ref_conv_bn(
                        t, p, stride=2, relu=(k_idx != len(chain) - 1)))
            acc = t if acc is None else acc + t
        x_fuse.append(jnp.maximum(acc, 0.0))
    return x_fuse


# ----------------------------------------------------------------------------
def _pad_channels(x, cp):
    c = x.shape[-1]
    if c == cp:
        return x
    return jnp.pad(x, ((0, 0), (0, 0), (0, 0), (0, cp - c)))


if __name__ == "__main__":
    key = jax.random.PRNGKey(0)
    k_in0, k_in1, k_par = jax.random.split(key, 3)

    # Module config: 2 branches, BasicBlock x2 per branch, SUM fuse,
    # multi_scale_output=True.
    num_branches = 2
    num_blocks = [2, 2]
    num_channels = [4, 8]          # BasicBlock expansion = 1
    batch = 2
    spatial = [(16, 16), (8, 8)]   # branch 0 at 1/4 res, branch 1 at 1/8 res

    # Inputs follow the PyTorch NCHW convention, then converted to NHWC.
    x0_nchw = jax.random.normal(k_in0, (batch, num_channels[0], *spatial[0]),
                                jnp.float32)
    x1_nchw = jax.random.normal(k_in1, (batch, num_channels[1], *spatial[1]),
                                jnp.float32)
    xs_nhwc = [jnp.transpose(x0_nchw, (0, 2, 3, 1)),
               jnp.transpose(x1_nchw, (0, 2, 3, 1))]

    params = init_hr_module(k_par, num_branches, num_blocks, num_channels,
                            multi_scale_output=True)
    cps = params["padded_channels"]

    # Pallas path: channel-padded, bf16 activations at the kernel boundary.
    xs_kernel = [_pad_channels(x, cp).astype(jnp.bfloat16)
                 for x, cp in zip(xs_nhwc, cps)]
    outs = hr_module_forward_pallas(xs_kernel, params)
    outs = [jax.block_until_ready(o) for o in outs]

    # Reference path mirrors the bf16 rounding points.
    xs_ref = [_round_bf16(x) for x in xs_nhwc]
    refs = hr_module_forward_ref(xs_ref, params)
    refs = [jax.block_until_ready(r) for r in refs]

    for o, r in zip(outs, refs):
        assert o.shape == r.shape, (o.shape, r.shape)
        np.testing.assert_allclose(np.asarray(o, dtype=np.float32),
                                   np.asarray(r, dtype=np.float32),
                                   rtol=1e-2, atol=1e-2)

    print("KERNEL_OK")
</pallas_src>

<mosaic_0001>
module attributes {stable_mosaic.version = 11 : i64} {
  func.func @_basic_block_kernel(%arg0: i32, %arg1: memref<1x16x16x128xbf16, #tpu.memory_space<vmem>>, %arg2: memref<9x128x128xbf16, #tpu.memory_space<vmem>>, %arg3: memref<1x128xf32, #tpu.memory_space<vmem>>, %arg4: memref<1x128xf32, #tpu.memory_space<vmem>>, %arg5: memref<9x128x128xbf16, #tpu.memory_space<vmem>>, %arg6: memref<1x128xf32, #tpu.memory_space<vmem>>, %arg7: memref<1x128xf32, #tpu.memory_space<vmem>>, %arg8: memref<1x16x16x128xbf16, #tpu.memory_space<vmem>>, %arg9: memref<18x18x128xf32, #tpu.memory_space<vmem>>, %arg10: memref<18x18x128xf32, #tpu.memory_space<vmem>>) attributes {dimension_semantics = [#tpu.dimension_semantics<parallel>], iteration_bounds = array<i64: 2>, scalar_prefetch = 0 : i64, scratch_operands = 2 : i64, tpu.core_type = #tpu.core_type<tc>, window_params = [{transform_indices = @transform_0, window_bounds = array<i64: 1, 16, 16, 128>}, {pipeline_mode = #tpu.pipeline_mode<synchronous>, transform_indices = @transform_1, window_bounds = array<i64: 9, 128, 128>}, {pipeline_mode = #tpu.pipeline_mode<synchronous>, transform_indices = @transform_2, window_bounds = array<i64: 1, 128>}, {pipeline_mode = #tpu.pipeline_mode<synchronous>, transform_indices = @transform_3, window_bounds = array<i64: 1, 128>}, {pipeline_mode = #tpu.pipeline_mode<synchronous>, transform_indices = @transform_4, window_bounds = array<i64: 9, 128, 128>}, {pipeline_mode = #tpu.pipeline_mode<synchronous>, transform_indices = @transform_5, window_bounds = array<i64: 1, 128>}, {pipeline_mode = #tpu.pipeline_mode<synchronous>, transform_indices = @transform_6, window_bounds = array<i64: 1, 128>}, {transform_indices = @transform_7, window_bounds = array<i64: 1, 16, 16, 128>}]} {
    %cst = arith.constant 0.000000e+00 : f32
    %0 = vector.broadcast %cst : f32 to vector<18x18x128xf32>
    %c0 = arith.constant 0 : index
    %c0_0 = arith.constant 0 : index
    %c0_1 = arith.constant 0 : index
    %1 = vector.load %arg9[%c0, %c0_0, %c0_1] : memref<18x18x128xf32, #tpu.memory_space<vmem>>, vector<18x18x128xf32>
    tpu.vector_store %arg9[%c0, %c0_0, %c0_1], %0 {strides = array<i32>} : memref<18x18x128xf32, #tpu.memory_space<vmem>>, vector<18x18x128xf32>,
    %c0_2 = arith.constant 0 : index
    %c0_3 = arith.constant 0 : index
    %c0_4 = arith.constant 0 : index
    %c0_5 = arith.constant 0 : index
    %2 = vector.load %arg1[%c0_2, %c0_3, %c0_4, %c0_5] : memref<1x16x16x128xbf16, #tpu.memory_space<vmem>>, vector<1x16x16x128xbf16>
    %3 = vector.shape_cast %2 : vector<1x16x16x128xbf16> to vector<16x16x128xbf16>
    %4 = arith.extf %3 : vector<16x16x128xbf16> to vector<16x16x128xf32>
    %c1 = arith.constant 1 : index
    %c1_6 = arith.constant 1 : index
    %c0_7 = arith.constant 0 : index
    %5 = vector.load %arg9[%c1, %c1_6, %c0_7] : memref<18x18x128xf32, #tpu.memory_space<vmem>>, vector<16x16x128xf32>
    tpu.vector_store %arg9[%c1, %c1_6, %c0_7], %4 {strides = array<i32>} : memref<18x18x128xf32, #tpu.memory_space<vmem>>, vector<16x16x128xf32>,
    %cst_8 = arith.constant 0.000000e+00 : f32
    %6 = vector.broadcast %cst_8 : f32 to vector<256x128xf32>
    %c0_9 = arith.constant 0 : index
    %c0_10 = arith.constant 0 : index
    %c0_11 = arith.constant 0 : index
    %7 = vector.load %arg9[%c0_9, %c0_10, %c0_11] : memref<18x18x128xf32, #tpu.memory_space<vmem>>, vector<16x16x128xf32>
    %8 = vector.shape_cast %7 : vector<16x16x128xf32> to vector<256x128xf32>
    %9 = arith.truncf %8 : vector<256x128xf32> to vector<256x128xbf16>
    %c0_12 = arith.constant 0 : index
    %c0_13 = arith.constant 0 : index
    %c0_14 = arith.constant 0 : index
    %10 = vector.load %arg2[%c0_12, %c0_13, %c0_14] : memref<9x128x128xbf16, #tpu.memory_space<vmem>>, vector<1x128x128xbf16>
    %11 = vector.shape_cast %10 : vector<1x128x128xbf16> to vector<128x128xbf16>
    %cst_15 = arith.constant dense<0.000000e+00> : vector<256x128xf32>
    %12 = tpu.matmul %9, %11, %cst_15 {dimension_numbers = #tpu.dot_dimension_numbers<[1], [0], [0], [1], [0, 0, 1, 1], [], []>} : vector<256x128xbf16>, vector<128x128xbf16>, vector<256x128xf32> -> vector<256x128xf32>
    %13 = arith.addf %6, %12 : vector<256x128xf32>
    %c0_16 = arith.constant 0 : index
    %c1_17 = arith.constant 1 : index
    %c0_18 = arith.constant 0 : index
    %14 = vector.load %arg9[%c0_16, %c1_17, %c0_18] : memref<18x18x128xf32, #tpu.memory_space<vmem>>, vector<16x16x128xf32>
    %15 = vector.shape_cast %14 : vector<16x16x128xf32> to vector<256x128xf32>
    %16 = arith.truncf %15 : vector<256x128xf32> to vector<256x128xbf16>
    %c1_19 = arith.constant 1 : index
    %c0_20 = arith.constant 0 : index
    %c0_21 = arith.constant 0 : index
    %17 = vector.load %arg2[%c1_19, %c0_20, %c0_21] : memref<9x128x128xbf16, #tpu.memory_space<vmem>>, vector<1x128x128xbf16>
    %18 = vector.shape_cast %17 : vector<1x128x128xbf16> to vector<128x128xbf16>
    %cst_22 = arith.constant dense<0.000000e+00> : vector<256x128xf32>
    %19 = tpu.matmul %16, %18, %cst_22 {dimension_numbers = #tpu.dot_dimension_numbers<[1], [0], [0], [1], [0, 0, 1, 1], [], []>} : vector<256x128xbf16>, vector<128x128xbf16>, vector<256x128xf32> -> vector<256x128xf32>
    %20 = arith.addf %13, %19 : vector<256x128xf32>
    %c0_23 = arith.constant 0 : index
    %c2 = arith.constant 2 : index
    %c0_24 = arith.constant 0 : index
    %21 = vector.load %arg9[%c0_23, %c2, %c0_24] : memref<18x18x128xf32, #tpu.memory_space<vmem>>, vector<16x16x128xf32>
    %22 = vector.shape_cast %21 : vector<16x16x128xf32> to vector<256x128xf32>
    %23 = arith.truncf %22 : vector<256x128xf32> to vector<256x128xbf16>
    %c2_25 = arith.constant 2 : index
    %c0_26 = arith.constant 0 : index
    %c0_27 = arith.constant 0 : index
    %24 = vector.load %arg2[%c2_25, %c0_26, %c0_27] : memref<9x128x128xbf16, #tpu.memory_space<vmem>>, vector<1x128x128xbf16>
    %25 = vector.shape_cast %24 : vector<1x128x128xbf16> to vector<128x128xbf16>
    %cst_28 = arith.constant dense<0.000000e+00> : vector<256x128xf32>
    %26 = tpu.matmul %23, %25, %cst_28 {dimension_numbers = #tpu.dot_dimension_numbers<[1], [0], [0], [1], [0, 0, 1, 1], [], []>} : vector<256x128xbf16>, vector<128x128xbf16>, vector<256x128xf32> -> vector<256x128xf32>
    %27 = arith.addf %20, %26 : vector<256x128xf32>
    %c1_29 = arith.constant 1 : index
    %c0_30 = arith.constant 0 : index
    %c0_31 = arith.constant 0 : index
    %28 = vector.load %arg9[%c1_29, %c0_30, %c0_31] : memref<18x18x128xf32, #tpu.memory_space<vmem>>, vector<16x16x128xf32>
    %29 = vector.shape_cast %28 : vector<16x16x128xf32> to vector<256x128xf32>
    %30 = arith.truncf %29 : vector<256x128xf32> to vector<256x128xbf16>
    %c3 = arith.constant 3 : index
    %c0_32 = arith.constant 0 : index
    %c0_33 = arith.constant 0 : index
    %31 = vector.load %arg2[%c3, %c0_32, %c0_33] : memref<9x128x128xbf16, #tpu.memory_space<vmem>>, vector<1x128x128xbf16>
    %32 = vector.shape_cast %31 : vector<1x128x128xbf16> to vector<128x128xbf16>
    %cst_34 = arith.constant dense<0.000000e+00> : vector<256x128xf32>
    %33 = tpu.matmul %30, %32, %cst_34 {dimension_numbers = #tpu.dot_dimension_numbers<[1], [0], [0], [1], [0, 0, 1, 1], [], []>} : vector<256x128xbf16>, vector<128x128xbf16>, vector<256x128xf32> -> vector<256x128xf32>
    %34 = arith.addf %27, %33 : vector<256x128xf32>
    %c1_35 = arith.constant 1 : index
    %c1_36 = arith.constant 1 : index
    %c0_37 = arith.constant 0 : index
    %35 = vector.load %arg9[%c1_35, %c1_36, %c0_37] : memref<18x18x128xf32, #tpu.memory_space<vmem>>, vector<16x16x128xf32>
    %36 = vector.shape_cast %35 : vector<16x16x128xf32> to vector<256x128xf32>
    %37 = arith.truncf %36 : vector<256x128xf32> to vector<256x128xbf16>
    %c4 = arith.constant 4 : index
    %c0_38 = arith.constant 0 : index
    %c0_39 = arith.constant 0 : index
    %38 = vector.load %arg2[%c4, %c0_38, %c0_39] : memref<9x128x128xbf16, #tpu.memory_space<vmem>>, vector<1x128x128xbf16>
    %39 = vector.shape_cast %38 : vector<1x128x128xbf16> to vector<128x128xbf16>
    %cst_40 = arith.constant dense<0.000000e+00> : vector<256x128xf32>
    %40 = tpu.matmul %37, %39, %cst_40 {dimension_numbers = #tpu.dot_dimension_numbers<[1], [0], [0], [1], [0, 0, 1, 1], [], []>} : vector<256x128xbf16>, vector<128x128xbf16>, vector<256x128xf32> -> vector<256x128xf32>
    %41 = arith.addf %34, %40 : vector<256x128xf32>
    %c1_41 = arith.constant 1 : index
    %c2_42 = arith.constant 2 : index
    %c0_43 = arith.constant 0 : index
    %42 = vector.load %arg9[%c1_41, %c2_42, %c0_43] : memref<18x18x128xf32, #tpu.memory_space<vmem>>, vector<16x16x128xf32>
    %43 = vector.shape_cast %42 : vector<16x16x128xf32> to vector<256x128xf32>
    %44 = arith.truncf %43 : vector<256x128xf32> to vector<256x128xbf16>
    %c5 = arith.constant 5 : index
    %c0_44 = arith.constant 0 : index
    %c0_45 = arith.constant 0 : index
    %45 = vector.load %arg2[%c5, %c0_44, %c0_45] : memref<9x128x128xbf16, #tpu.memory_space<vmem>>, vector<1x128x128xbf16>
    %46 = vector.shape_cast %45 : vector<1x128x128xbf16> to vector<128x128xbf16>
    %cst_46 = arith.constant dense<0.000000e+00> : vector<256x128xf32>
    %47 = tpu.matmul %44, %46, %cst_46 {dimension_numbers = #tpu.dot_dimension_numbers<[1], [0], [0], [1], [0, 0, 1, 1], [], []>} : vector<256x128xbf16>, vector<128x128xbf16>, vector<256x128xf32> -> vector<256x128xf32>
    %48 = arith.addf %41, %47 : vector<256x128xf32>
    %c2_47 = arith.constant 2 : index
    %c0_48 = arith.constant 0 : index
    %c0_49 = arith.constant 0 : index
    %49 = vector.load %arg9[%c2_47, %c0_48, %c0_49] : memref<18x18x128xf32, #tpu.memory_space<vmem>>, vector<16x16x128xf32>
    %50 = vector.shape_cast %49 : vector<16x16x128xf32> to vector<256x128xf32>
    %51 = arith.truncf %50 : vector<256x128xf32> to vector<256x128xbf16>
    %c6 = arith.constant 6 : index
    %c0_50 = arith.constant 0 : index
    %c0_51 = arith.constant 0 : index
    %52 = vector.load %arg2[%c6, %c0_50, %c0_51] : memref<9x128x128xbf16, #tpu.memory_space<vmem>>, vector<1x128x128xbf16>
    %53 = vector.shape_cast %52 : vector<1x128x128xbf16> to vector<128x128xbf16>
    %cst_52 = arith.constant dense<0.000000e+00> : vector<256x128xf32>
    %54 = tpu.matmul %51, %53, %cst_52 {dimension_numbers = #tpu.dot_dimension_numbers<[1], [0], [0], [1], [0, 0, 1, 1], [], []>} : vector<256x128xbf16>, vector<128x128xbf16>, vector<256x128xf32> -> vector<256x128xf32>
    %55 = arith.addf %48, %54 : vector<256x128xf32>
    %c2_53 = arith.constant 2 : index
    %c1_54 = arith.constant 1 : index
    %c0_55 = arith.constant 0 : index
    %56 = vector.load %arg9[%c2_53, %c1_54, %c0_55] : memref<18x18x128xf32, #tpu.memory_space<vmem>>, vector<16x16x128xf32>
    %57 = vector.shape_cast %56 : vector<16x16x128xf32> to vector<256x128xf32>
    %58 = arith.truncf %57 : vector<256x128xf32> to vector<256x128xbf16>
    %c7 = arith.constant 7 : index
    %c0_56 = arith.constant 0 : index
    %c0_57 = arith.constant 0 : index
    %59 = vector.load %arg2[%c7, %c0_56, %c0_57] : memref<9x128x128xbf16, #tpu.memory_space<vmem>>, vector<1x128x128xbf16>
    %60 = vector.shape_cast %59 : vector<1x128x128xbf16> to vector<128x128xbf16>
    %cst_58 = arith.constant dense<0.000000e+00> : vector<256x128xf32>
    %61 = tpu.matmul %58, %60, %cst_58 {dimension_numbers = #tpu.dot_dimension_numbers<[1], [0], [0], [1], [0, 0, 1, 1], [], []>} : vector<256x128xbf16>, vector<128x128xbf16>, vector<256x128xf32> -> vector<256x128xf32>
    %62 = arith.addf %55, %61 : vector<256x128xf32>
    %c2_59 = arith.constant 2 : index
    %c2_60 = arith.constant 2 : index
    %c0_61 = arith.constant 0 : index
    %63 = vector.load %arg9[%c2_59, %c2_60, %c0_61] : memref<18x18x128xf32, #tpu.memory_space<vmem>>, vector<16x16x128xf32>
    %64 = vector.shape_cast %63 : vector<16x16x128xf32> to vector<256x128xf32>
    %65 = arith.truncf %64 : vector<256x128xf32> to vector<256x128xbf16>
    %c8 = arith.constant 8 : index
    %c0_62 = arith.constant 0 : index
    %c0_63 = arith.constant 0 : index
    %66 = vector.load %arg2[%c8, %c0_62, %c0_63] : memref<9x128x128xbf16, #tpu.memory_space<vmem>>, vector<1x128x128xbf16>
    %67 = vector.shape_cast %66 : vector<1x128x128xbf16> to vector<128x128xbf16>
    %cst_64 = arith.constant dense<0.000000e+00> : vector<256x128xf32>
    %68 = tpu.matmul %65, %67, %cst_64 {dimension_numbers = #tpu.dot_dimension_numbers<[1], [0], [0], [1], [0, 0, 1, 1], [], []>} : vector<256x128xbf16>, vector<128x128xbf16>, vector<256x128xf32> -> vector<256x128xf32>
    %69 = arith.addf %62, %68 : vector<256x128xf32>
    %c0_65 = arith.constant 0 : index
    %c0_66 = arith.constant 0 : index
    %70 = vector.load %arg3[%c0_65, %c0_66] : memref<1x128xf32, #tpu.memory_space<vmem>>, vector<1x128xf32>
    %71 = vector.broadcast %70 : vector<1x128xf32> to vector<256x128xf32>
    %72 = arith.mulf %69, %71 : vector<256x128xf32>
    %c0_67 = arith.constant 0 : index
    %c0_68 = arith.constant 0 : index
    %73 = vector.load %arg4[%c0_67, %c0_68] : memref<1x128xf32, #tpu.memory_space<vmem>>, vector<1x128xf32>
    %74 = vector.broadcast %73 : vector<1x128xf32> to vector<256x128xf32>
    %75 = arith.addf %72, %74 : vector<256x128xf32>
    %cst_69 = arith.constant 0.000000e+00 : f32
    %76 = vector.broadcast %cst_69 : f32 to vector<256x128xf32>
    %77 = arith.maximumf %75, %76 : vector<256x128xf32>
    %cst_70 = arith.constant 0.000000e+00 : f32
    %78 = vector.broadcast %cst_70 : f32 to vector<18x18x128xf32>
    %c0_71 = arith.constant 0 : index
    %c0_72 = arith.constant 0 : index
    %c0_73 = arith.constant 0 : index
    %79 = vector.load %arg10[%c0_71, %c0_72, %c0_73] : memref<18x18x128xf32, #tpu.memory_space<vmem>>, vector<18x18x128xf32>
    tpu.vector_store %arg10[%c0_71, %c0_72, %c0_73], %78 {strides = array<i32>} : memref<18x18x128xf32, #tpu.memory_space<vmem>>, vector<18x18x128xf32>,
    %80 = vector.shape_cast %77 : vector<256x128xf32> to vector<16x16x128xf32>
    %c1_74 = arith.constant 1 : index
    %c1_75 = arith.constant 1 : index
    %c0_76 = arith.constant 0 : index
    %81 = vector.load %arg10[%c1_74, %c1_75, %c0_76] : memref<18x18x128xf32, #tpu.memory_space<vmem>>, vector<16x16x128xf32>
    tpu.vector_store %arg10[%c1_74, %c1_75, %c0_76], %80 {strides = array<i32>} : memref<18x18x128xf32, #tpu.memory_space<vmem>>, vector<16x16x128xf32>,
    %cst_77 = arith.constant 0.000000e+00 : f32
    %82 = vector.broadcast %cst_77 : f32 to vector<256x128xf32>
    %c0_78 = arith.constant 0 : index
    %c0_79 = arith.constant 0 : index
    %c0_80 = arith.constant 0 : index
    %83 = vector.load %arg10[%c0_78, %c0_79, %c0_80] : memref<18x18x128xf32, #tpu.memory_space<vmem>>, vector<16x16x128xf32>
    %84 = vector.shape_cast %83 : vector<16x16x128xf32> to vector<256x128xf32>
    %85 = arith.truncf %84 : vector<256x128xf32> to vector<256x128xbf16>
    %c0_81 = arith.constant 0 : index
    %c0_82 = arith.constant 0 : index
    %c0_83 = arith.constant 0 : index
    %86 = vector.load %arg5[%c0_81, %c0_82, %c0_83] : memref<9x128x128xbf16, #tpu.memory_space<vmem>>, vector<1x128x128xbf16>
    %87 = vector.shape_cast %86 : vector<1x128x128xbf16> to vector<128x128xbf16>
    %cst_84 = arith.constant dense<0.000000e+00> : vector<256x128xf32>
    %88 = tpu.matmul %85, %87, %cst_84 {dimension_numbers = #tpu.dot_dimension_numbers<[1], [0], [0], [1], [0, 0, 1, 1], [], []>} : vector<256x128xbf16>, vector<128x128xbf16>, vector<256x128xf32> -> vector<256x128xf32>
    %89 = arith.addf %82, %88 : vector<256x128xf32>
    %c0_85 = arith.constant 0 : index
    %c1_86 = arith.constant 1 : index
    %c0_87 = arith.constant 0 : index
    %90 = vector.load %arg10[%c0_85, %c1_86, %c0_87] : memref<18x18x128xf32, #tpu.memory_space<vmem>>, vector<16x16x128xf32>
    %91 = vector.shape_cast %90 : vector<16x16x128xf32> to vector<256x128xf32>
    %92 = arith.truncf %91 : vector<256x128xf32> to vector<256x128xbf16>
    %c1_88 = arith.constant 1 : index
    %c0_89 = arith.constant 0 : index
    %c0_90 = arith.constant 0 : index
    %93 = vector.load %arg5[%c1_88, %c0_89, %c0_90] : memref<9x128x128xbf16, #tpu.memory_space<vmem>>, vector<1x128x128xbf16>
    %94 = vector.shape_cast %93 : vector<1x128x128xbf16> to vector<128x128xbf16>
    %cst_91 = arith.constant dense<0.000000e+00> : vector<256x128xf32>
    %95 = tpu.matmul %92, %94, %cst_91 {dimension_numbers = #tpu.dot_dimension_numbers<[1], [0], [0], [1], [0, 0, 1, 1], [], []>} : vector<256x128xbf16>, vector<128x128xbf16>, vector<256x128xf32> -> vector<256x128xf32>
    %96 = arith.addf %89, %95 : vector<256x128xf32>
    %c0_92 = arith.constant 0 : index
    %c2_93 = arith.constant 2 : index
    %c0_94 = arith.constant 0 : index
    %97 = vector.load %arg10[%c0_92, %c2_93, %c0_94] : memref<18x18x128xf32, #tpu.memory_space<vmem>>, vector<16x16x128xf32>
    %98 = vector.shape_cast %97 : vector<16x16x128xf32> to vector<256x128xf32>
    %99 = arith.truncf %98 : vector<256x128xf32> to vector<256x128xbf16>
    %c2_95 = arith.constant 2 : index
    %c0_96 = arith.constant 0 : index
    %c0_97 = arith.constant 0 : index
    %100 = vector.load %arg5[%c2_95, %c0_96, %c0_97] : memref<9x128x128xbf16, #tpu.memory_space<vmem>>, vector<1x128x128xbf16>
    %101 = vector.shape_cast %100 : vector<1x128x128xbf16> to vector<128x128xbf16>
    %cst_98 = arith.constant dense<0.000000e+00> : vector<256x128xf32>
    %102 = tpu.matmul %99, %101, %cst_98 {dimension_numbers = #tpu.dot_dimension_numbers<[1], [0], [0], [1], [0, 0, 1, 1], [], []>} : vector<256x128xbf16>, vector<128x128xbf16>, vector<256x128xf32> -> vector<256x128xf32>
    %103 = arith.addf %96, %102 : vector<256x128xf32>
    %c1_99 = arith.constant 1 : index
    %c0_100 = arith.constant 0 : index
    %c0_101 = arith.constant 0 : index
    %104 = vector.load %arg10[%c1_99, %c0_100, %c0_101] : memref<18x18x128xf32, #tpu.memory_space<vmem>>, vector<16x16x128xf32>
    %105 = vector.shape_cast %104 : vector<16x16x128xf32> to vector<256x128xf32>
    %106 = arith.truncf %105 : vector<256x128xf32> to vector<256x128xbf16>
    %c3_102 = arith.constant 3 : index
    %c0_103 = arith.constant 0 : index
    %c0_104 = arith.constant 0 : index
    %107 = vector.load %arg5[%c3_102, %c0_103, %c0_104] : memref<9x128x128xbf16, #tpu.memory_space<vmem>>, vector<1x128x128xbf16>
    %108 = vector.shape_cast %107 : vector<1x128x128xbf16> to vector<128x128xbf16>
    %cst_105 = arith.constant dense<0.000000e+00> : vector<256x128xf32>
    %109 = tpu.matmul %106, %108, %cst_105 {dimension_numbers = #tpu.dot_dimension_numbers<[1], [0], [0], [1], [0, 0, 1, 1], [], []>} : vector<256x128xbf16>, vector<128x128xbf16>, vector<256x128xf32> -> vector<256x128xf32>
    %110 = arith.addf %103, %109 : vector<256x128xf32>
    %c1_106 = arith.constant 1 : index
    %c1_107 = arith.constant 1 : index
    %c0_108 = arith.constant 0 : index
    %111 = vector.load %arg10[%c1_106, %c1_107, %c0_108] : memref<18x18x128xf32, #tpu.memory_space<vmem>>, vector<16x16x128xf32>
    %112 = vector.shape_cast %111 : vector<16x16x128xf32> to vector<256x128xf32>
    %113 = arith.truncf %112 : vector<256x128xf32> to vector<256x128xbf16>
    %c4_109 = arith.constant 4 : index
    %c0_110 = arith.constant 0 : index
    %c0_111 = arith.constant 0 : index
    %114 = vector.load %arg5[%c4_109, %c0_110, %c0_111] : memref<9x128x128xbf16, #tpu.memory_space<vmem>>, vector<1x128x128xbf16>
    %115 = vector.shape_cast %114 : vector<1x128x128xbf16> to vector<128x128xbf16>
    %cst_112 = arith.constant dense<0.000000e+00> : vector<256x128xf32>
    %116 = tpu.matmul %113, %115, %cst_112 {dimension_numbers = #tpu.dot_dimension_numbers<[1], [0], [0], [1], [0, 0, 1, 1], [], []>} : vector<256x128xbf16>, vector<128x128xbf16>, vector<256x128xf32> -> vector<256x128xf32>
    %117 = arith.addf %110, %116 : vector<256x128xf32>
    %c1_113 = arith.constant 1 : index
    %c2_114 = arith.constant 2 : index
    %c0_115 = arith.constant 0 : index
    %118 = vector.load %arg10[%c1_113, %c2_114, %c0_115] : memref<18x18x128xf32, #tpu.memory_space<vmem>>, vector<16x16x128xf32>
    %119 = vector.shape_cast %118 : vector<16x16x128xf32> to vector<256x128xf32>
    %120 = arith.truncf %119 : vector<256x128xf32> to vector<256x128xbf16>
    %c5_116 = arith.constant 5 : index
    %c0_117 = arith.constant 0 : index
    %c0_118 = arith.constant 0 : index
    %121 = vector.load %arg5[%c5_116, %c0_117, %c0_118] : memref<9x128x128xbf16, #tpu.memory_space<vmem>>, vector<1x128x128xbf16>
    %122 = vector.shape_cast %121 : vector<1x128x128xbf16> to vector<128x128xbf16>
    %cst_119 = arith.constant dense<0.000000e+00> : vector<256x128xf32>
    %123 = tpu.matmul %120, %122, %cst_119 {dimension_numbers = #tpu.dot_dimension_numbers<[1], [0], [0], [1], [0, 0, 1, 1], [], []>} : vector<256x128xbf16>, vector<128x128xbf16>, vector<256x128xf32> -> vector<256x128xf32>
    %124 = arith.addf %117, %123 : vector<256x128xf32>
    %c2_120 = arith.constant 2 : index
    %c0_121 = arith.constant 0 : index
    %c0_122 = arith.constant 0 : index
    %125 = vector.load %arg10[%c2_120, %c0_121, %c0_122] : memref<18x18x128xf32, #tpu.memory_space<vmem>>, vector<16x16x128xf32>
    %126 = vector.shape_cast %125 : vector<16x16x128xf32> to vector<256x128xf32>
    %127 = arith.truncf %126 : vector<256x128xf32> to vector<256x128xbf16>
    %c6_123 = arith.constant 6 : index
    %c0_124 = arith.constant 0 : index
    %c0_125 = arith.constant 0 : index
    %128 = vector.load %arg5[%c6_123, %c0_124, %c0_125] : memref<9x128x128xbf16, #tpu.memory_space<vmem>>, vector<1x128x128xbf16>
    %129 = vector.shape_cast %128 : vector<1x128x128xbf16> to vector<128x128xbf16>
    %cst_126 = arith.constant dense<0.000000e+00> : vector<256x128xf32>
    %130 = tpu.matmul %127, %129, %cst_126 {dimension_numbers = #tpu.dot_dimension_numbers<[1], [0], [0], [1], [0, 0, 1, 1], [], []>} : vector<256x128xbf16>, vector<128x128xbf16>, vector<256x128xf32> -> vector<256x128xf32>
    %131 = arith.addf %124, %130 : vector<256x128xf32>
    %c2_127 = arith.constant 2 : index
    %c1_128 = arith.constant 1 : index
    %c0_129 = arith.constant 0 : index
    %132 = vector.load %arg10[%c2_127, %c1_128, %c0_129] : memref<18x18x128xf32, #tpu.memory_space<vmem>>, vector<16x16x128xf32>
    %133 = vector.shape_cast %132 : vector<16x16x128xf32> to vector<256x128xf32>
    %134 = arith.truncf %133 : vector<256x128xf32> to vector<256x128xbf16>
    %c7_130 = arith.constant 7 : index
    %c0_131 = arith.constant 0 : index
    %c0_132 = arith.constant 0 : index
    %135 = vector.load %arg5[%c7_130, %c0_131, %c0_132] : memref<9x128x128xbf16, #tpu.memory_space<vmem>>, vector<1x128x128xbf16>
    %136 = vector.shape_cast %135 : vector<1x128x128xbf16> to vector<128x128xbf16>
    %cst_133 = arith.constant dense<0.000000e+00> : vector<256x128xf32>
    %137 = tpu.matmul %134, %136, %cst_133 {dimension_numbers = #tpu.dot_dimension_numbers<[1], [0], [0], [1], [0, 0, 1, 1], [], []>} : vector<256x128xbf16>, vector<128x128xbf16>, vector<256x128xf32> -> vector<256x128xf32>
    %138 = arith.addf %131, %137 : vector<256x128xf32>
    %c2_134 = arith.constant 2 : index
    %c2_135 = arith.constant 2 : index
    %c0_136 = arith.constant 0 : index
    %139 = vector.load %arg10[%c2_134, %c2_135, %c0_136] : memref<18x18x128xf32, #tpu.memory_space<vmem>>, vector<16x16x128xf32>
    %140 = vector.shape_cast %139 : vector<16x16x128xf32> to vector<256x128xf32>
    %141 = arith.truncf %140 : vector<256x128xf32> to vector<256x128xbf16>
    %c8_137 = arith.constant 8 : index
    %c0_138 = arith.constant 0 : index
    %c0_139 = arith.constant 0 : index
    %142 = vector.load %arg5[%c8_137, %c0_138, %c0_139] : memref<9x128x128xbf16, #tpu.memory_space<vmem>>, vector<1x128x128xbf16>
    %143 = vector.shape_cast %142 : vector<1x128x128xbf16> to vector<128x128xbf16>
    %cst_140 = arith.constant dense<0.000000e+00> : vector<256x128xf32>
    %144 = tpu.matmul %141, %143, %cst_140 {dimension_numbers = #tpu.dot_dimension_numbers<[1], [0], [0], [1], [0, 0, 1, 1], [], []>} : vector<256x128xbf16>, vector<128x128xbf16>, vector<256x128xf32> -> vector<256x128xf32>
    %145 = arith.addf %138, %144 : vector<256x128xf32>
    %c0_141 = arith.constant 0 : index
    %c0_142 = arith.constant 0 : index
    %c0_143 = arith.constant 0 : index
    %c0_144 = arith.constant 0 : index
    %146 = vector.load %arg1[%c0_141, %c0_142, %c0_143, %c0_144] : memref<1x16x16x128xbf16, #tpu.memory_space<vmem>>, vector<1x16x16x128xbf16>
    %147 = vector.shape_cast %146 : vector<1x16x16x128xbf16> to vector<16x16x128xbf16>
    %148 = vector.shape_cast %147 : vector<16x16x128xbf16> to vector<256x128xbf16>
    %149 = arith.extf %148 : vector<256x128xbf16> to vector<256x128xf32>
    %c0_145 = arith.constant 0 : index
    %c0_146 = arith.constant 0 : index
    %150 = vector.load %arg6[%c0_145, %c0_146] : memref<1x128xf32, #tpu.memory_space<vmem>>, vector<1x128xf32>
    %151 = vector.broadcast %150 : vector<1x128xf32> to vector<256x128xf32>
    %152 = arith.mulf %145, %151 : vector<256x128xf32>
    %c0_147 = arith.constant 0 : index
    %c0_148 = arith.constant 0 : index
    %153 = vector.load %arg7[%c0_147, %c0_148] : memref<1x128xf32, #tpu.memory_space<vmem>>, vector<1x128xf32>
    %154 = vector.broadcast %153 : vector<1x128xf32> to vector<256x128xf32>
    %155 = arith.addf %152, %154 : vector<256x128xf32>
    %156 = arith.addf %155, %149 : vector<256x128xf32>
    %cst_149 = arith.constant 0.000000e+00 : f32
    %157 = vector.broadcast %cst_149 : f32 to vector<256x128xf32>
    %158 = arith.maximumf %156, %157 : vector<256x128xf32>
    %159 = arith.truncf %158 : vector<256x128xf32> to vector<256x128xbf16>
    %160 = vector.shape_cast %159 : vector<256x128xbf16> to vector<16x16x128xbf16>
    %c0_150 = arith.constant 0 : index
    %c0_151 = arith.constant 0 : index
    %c0_152 = arith.constant 0 : index
    %c0_153 = arith.constant 0 : index
    %161 = vector.load %arg8[%c0_150, %c0_151, %c0_152, %c0_153] : memref<1x16x16x128xbf16, #tpu.memory_space<vmem>>, vector<1x16x16x128xbf16>
    %162 = vector.shape_cast %161 : vector<1x16x16x128xbf16> to vector<16x16x128xbf16>
    %163 = vector.shape_cast %160 : vector<16x16x128xbf16> to vector<1x16x16x128xbf16>
    tpu.vector_store %arg8[%c0_150, %c0_151, %c0_152, %c0_153], %163 {strides = array<i32>} : memref<1x16x16x128xbf16, #tpu.memory_space<vmem>>, vector<1x16x16x128xbf16>,
    return
  }
  func.func @transform_0(%arg0: i32) -> (i32, i32, i32, i32) {
    %c0_i32 = arith.constant 0 : i32
    %c0_i32_0 = arith.constant 0 : i32
    %c0_i32_1 = arith.constant 0 : i32
    %c0_i32_2 = arith.constant 0 : i32
    return %arg0, %c0_i32, %c0_i32_0, %c0_i32_1 : i32, i32, i32, i32
  }
  func.func @transform_1(%arg0: i32) -> (i32, i32, i32) {
    %c0_i32 = arith.constant 0 : i32
    %c0_i32_0 = arith.constant 0 : i32
    %c0_i32_1 = arith.constant 0 : i32
    %c0_i32_2 = arith.constant 0 : i32
    return %c0_i32, %c0_i32_0, %c0_i32_1 : i32, i32, i32
  }
  func.func @transform_2(%arg0: i32) -> (i32, i32) {
    %c0_i32 = arith.constant 0 : i32
    %c0_i32_0 = arith.constant 0 : i32
    %c0_i32_1 = arith.constant 0 : i32
    return %c0_i32, %c0_i32_0 : i32, i32
  }
  func.func @transform_3(%arg0: i32) -> (i32, i32) {
    %c0_i32 = arith.constant 0 : i32
    %c0_i32_0 = arith.constant 0 : i32
    %c0_i32_1 = arith.constant 0 : i32
    return %c0_i32, %c0_i32_0 : i32, i32
  }
  func.func @transform_4(%arg0: i32) -> (i32, i32, i32) {
    %c0_i32 = arith.constant 0 : i32
    %c0_i32_0 = arith.constant 0 : i32
    %c0_i32_1 = arith.constant 0 : i32
    %c0_i32_2 = arith.constant 0 : i32
    return %c0_i32, %c0_i32_0, %c0_i32_1 : i32, i32, i32
  }
  func.func @transform_5(%arg0: i32) -> (i32, i32) {
    %c0_i32 = arith.constant 0 : i32
    %c0_i32_0 = arith.constant 0 : i32
    %c0_i32_1 = arith.constant 0 : i32
    return %c0_i32, %c0_i32_0 : i32, i32
  }
  func.func @transform_6(%arg0: i32) -> (i32, i32) {
    %c0_i32 = arith.constant 0 : i32
    %c0_i32_0 = arith.constant 0 : i32
    %c0_i32_1 = arith.constant 0 : i32
    return %c0_i32, %c0_i32_0 : i32, i32
  }
  func.func @transform_7(%arg0: i32) -> (i32, i32, i32, i32) {
    %c0_i32 = arith.constant 0 : i32
    %c0_i32_0 = arith.constant 0 : i32
    %c0_i32_1 = arith.constant 0 : i32
    %c0_i32_2 = arith.constant 0 : i32
    return %arg0, %c0_i32, %c0_i32_0, %c0_i32_1 : i32, i32, i32, i32
  }
}

</mosaic_0001>

<bundles_post_ra>
// kernel: tpu_custom_call.1
= control target key start
LH: loop header
LB: loop body
LE: loop exit
PB: predicated region body
PF: predicated region fallthrough
CT: control target
= control target key end

     0   :  { %12 = vsyncpa [#allocation5], 0  ;;  %s10244_s0 = inlined_call_operand.hbm [shape: bf16[2,16,16,128], index: 0, kind: input, shape index: {}]   ;;  %s10245_s1 = inlined_call_operand.hbm [shape: bf16[9,128,128], index: 1, kind: input, shape index: {}]   ;;  %s10246_s2 = inlined_call_operand.vmem [shape: f32[1,128], index: 2, kind: input, shape index: {}]   ;;  %s10247_s3 = inlined_call_operand.vmem [shape: f32[1,128], index: 3, kind: input, shape index: {}]   ;;  %s10248_s4 = inlined_call_operand.hbm [shape: bf16[9,128,128], index: 4, kind: input, shape index: {}]   ;;  %s10249_s5 = inlined_call_operand.vmem [shape: f32[1,128], index: 5, kind: input, shape index: {}]   ;;  %s10250_s6 = inlined_call_operand.vmem [shape: f32[1,128], index: 6, kind: input, shape index: {}]   ;;  %s10251_s7 = inlined_call_operand.hbm [shape: bf16[2,16,16,128], index: 7, kind: output, shape index: {}]  }
   0x1   :  { %14 = vsyncpa [#allocation5 + $0x1], 0 }
   0x2   :  { %15 = vsyncpa [#allocation8], 0 }
   0x3   :  { %16 = vsyncpa [#allocation6], 0 }
   0x4   :  { %18 = vsyncpa [#allocation6 + $0x1], 0  ;;  %s9267_s24 = smov 0   ;;  %s9269_s25 = smov 0  }
   0x5   :  { %s9271_s26 = smov 0   ;;  %s9273_s27 = smov 0  }
   0x6 LB: > { %s9288_s28 = sadd.s32 4294967295, %s9215_s27   ;;  %s6527_s29 = sadd.s32 4294967294, %s9215_s27   ;;  %s9215_s27 = sphi %s9273_s27, %s10273_s27   ;;  %s9211_s26 = sphi %s9271_s26, %s10272_s26   ;;  %s9207_s25 = sphi %s9269_s25, %s10271_s25   ;;  %s9203_s24 = sphi %s9267_s24, %s10270_s24  }
   0x7   : > { %p44_p0 = scmp.ne.s32.totalorder %s9207_s25, %s9203_s24  ;;  %p10252_p1 = scmp.eq.s32.totalorder %s9288_s28, 0 }
   0x8   : > { %p200_p3 = scmp.eq.s32.totalorder %s6527_s29, 1  ;;  %p6528_p5 = scmp.ge.s32.totalorder %s9215_s27, 1 }
   0x9   : > { %p9297_p4 = por %p10252_p1, %p44_p0  ;;  %p207_p7 = scmp.lt.s32.totalorder %s9215_s27, 3 }
   0xa   : > { %p9302_p6 = por %p200_p3, %p44_p0  ;;  %s9217_s10 = smov [#allocation7]  }
   0xb   : > { %s10256_s30 = scalar_select %p9297_p4, 1, 0 }
   0xc   : > { %s10257_s8 = scalar_select %p9302_p6, 1, 0 }
   0xd   : > { %p9307_p8 = pnand %p6528_p5, %p207_p7  ;;  %s219_s11 = sshll.u32 %s9217_s10, 4  ;;  %s9311_s11 = int_to_ptr.vmem [resolvable:$true] %s219_s11 }
   0xe   : > { %s9218_s13 = smov [#allocation9]   ;;  %s9059_s17 = scalar_lea.hbm %s10245_s1, 9216 }
   0xf   : > { %p8832_p9 = pneg %p9307_p8  ;;  %s238_s14 = sshll.u32 %s9218_s13, 4  ;;  %s9322_s14 = int_to_ptr.vmem [resolvable:$true] %s238_s14 }
  0x10   : > { %p9060_p12 = scmp.ne.s32.totalorder %s10245_s1, %s9059_s17  ;;  %p9066_p5 = scmp.lt.u32.totalorder %s9059_s17, %s10245_s1 }
  0x11   : > { %p9318_p11 = pnand %p8832_p9, %p10252_p1 }
  0x13   : > { %p9061_p13 = pneg %p9318_p11 }
  0x15   : > { %p9062_p0 = pnand %p9061_p13, %p9060_p12 }
  0x17   : > { %p9063_p3 = pneg %p9062_p0 }
  0x19   : > { %p9068_p7 = pnand %p9066_p5, %p9063_p3 }
  0x1b   : > { %9071 = shalt.err (!%p9068_p7)
}
  0x1c   : > { %s9072_s22 = scalar_lea.vmem %s9311_s11, 9216  ;;  %p9080_p2 = scmp.lt.s32.totalorder %s9311_s11, %s9311_s11 }
  0x1d   : > { %p9073_p9 = scmp.ne.s32.totalorder %s9311_s11, %s9072_s22  ;;  %p9081_p12 = scmp.lt.s32.totalorder %s9072_s22, %s9072_s22 }
  0x1f   : > { %p9075_p10 = pnand %p9073_p9, %p9061_p13  ;;  %p9082_p0 = por %p9081_p12, %p9080_p2 }
  0x21   : > { %p9076_p1 = pneg %p9075_p10 }
  0x23   : > { %p9083_p6 = pnand %p9082_p0, %p9076_p1 }
  0x25   : > { %9086 = shalt.err (!%p9083_p6)
}
  0x26   : > { %s10253_s23 = smov 64   ;;  %s9220_s29 = smov 4  }
  0x27   : > { %8835 = dma.hbm_to_vmem [thread:$0]  (!%p9318_p11), %s10245_s1, 9216, %s9311_s11, [#allocation8], %s10253_s23, %s10253_s23, %s9220_s29  }
  0x28   : > { %s9087_s17 = scalar_lea.hbm %s10248_s4, 9216 }
  0x29   : > { %p9088_p1 = scmp.ne.s32.totalorder %s10248_s4, %s9087_s17  ;;  %p9094_p10 = scmp.lt.u32.totalorder %s9087_s17, %s10248_s4 }
  0x2b   : > { %p9090_p2 = pnand %p9088_p1, %p9061_p13 }
  0x2d   : > { %p9091_p6 = pneg %p9090_p2 }
  0x2f   : > { %p9096_p3 = pnand %p9094_p10, %p9091_p6 }
  0x31   : > { %9099 = shalt.err (!%p9096_p3)
}
  0x32   : > { %s9100_s11 = scalar_lea.vmem %s9322_s14, 9216  ;;  %p9108_p12 = scmp.lt.s32.totalorder %s9322_s14, %s9322_s14 }
  0x33   : > { %p9101_p5 = scmp.ne.s32.totalorder %s9322_s14, %s9100_s11  ;;  %p9109_p0 = scmp.lt.s32.totalorder %s9100_s11, %s9100_s11 }
  0x35   : > { %p9103_p7 = pnand %p9101_p5, %p9061_p13  ;;  %p9110_p1 = por %p9109_p0, %p9108_p12 }
  0x37   : > { %p9104_p9 = pneg %p9103_p7 }
  0x39   : > { %p9111_p2 = pnand %p9110_p1, %p9104_p9 }
  0x3b   : > { %9114 = shalt.err (!%p9111_p2)
}
  0x3c   : > { %8838 = dma.hbm_to_vmem [thread:$0]  (!%p9318_p11), %s10248_s4, 9216, %s9322_s14, [#allocation8], %s10253_s23, %s10253_s23, %s9220_s29  }
  0x3d   : > { %s9383_s12 = sadd.s32 1, %s9215_s27   ;;  %s31_s13 = sadd.s32 1, %s9211_s26 }
  0x3e   : > { %s28_s15 = ssub.s32 %s9215_s27, %s9383_s12  ;;  %p38_p13 = scmp.ne.s32.totalorder %s9211_s26, %s9207_s25 }
  0x3f   : > { %p29_p6 = scmp.eq.s32.totalorder %s28_s15, 0  ;;  %p39_p10 = scmp.eq.s32.totalorder %s9215_s27, 0 }
  0x40   : > { %p10260_p3 = scmp.eq.s32.totalorder %s9288_s28, 1  ;;  %p8849_p7 = scmp.lt.s32.totalorder %s9215_s27, 2 }
  0x41   : > { %s9399_s17 = scalar_select %p29_p6, %s9211_s26, %s31_s13  }
  0x42   : > { %p9393_p5 = por %p10260_p3, %p38_p13  ;;  %p40_p9 = por %p39_p10, %p38_p13 }
  0x43   : > { %s258_s18 = sand.u32 1, %s9211_s26   ;;  %s6725_s14 = sshll.u32 %s9215_s27, 11 }
  0x44   : > { %s10261_s16 = scalar_select %p9393_p5, 1, 0 }
  0x45   : > { %s6532_s19 = sshll.u32 %s258_s18, 7  ;;  %s9406_s11 = scalar_lea.hbm %s10244_s0, %s6725_s14 }
  0x46   : > { %s262_s22 = scalar_lea.vmem [#allocation4], %s6532_s19  ;;  %p9410_p11 = pnand %p8849_p7, %p40_p9 }
  0x47   : > { %s269_s10 = sshll.u32 %s262_s22, 4  ;;  %s9414_s15 = scalar_lea.sflag [#allocation5], %s258_s18  ;;  %s9408_s10 = int_to_ptr.vmem [resolvable:$true] %s269_s10 }
  0x48   : > { %s9115_s23 = scalar_lea.hbm %s9406_s11, 2048  ;;  %p9117_p0 = pneg %p9410_p11 }
  0x49   : > { %p9116_p12 = scmp.ne.s32.totalorder %s9406_s11, %s9115_s23  ;;  %s9120_s20 = scalar_lea.hbm %s10244_s0, 4096 }
  0x4a   : > { %p9121_p13 = scmp.lt.u32.totalorder %s9406_s11, %s10244_s0  ;;  %p9122_p6 = scmp.lt.u32.totalorder %s9120_s20, %s9115_s23 }
  0x4b   : > { %p9118_p1 = pnand %p9117_p0, %p9116_p12  ;;  %p9124_p3 = scmp.lt.u32.totalorder %s9115_s23, %s9406_s11 }
  0x4c   : > { %p9123_p10 = por %p9122_p6, %p9121_p13 }
  0x4d   : > { %p9119_p2 = pneg %p9118_p1 }
  0x4e   : > { %p9125_p7 = por %p9124_p3, %p9123_p10 }
  0x50   : > { %p9126_p9 = pnand %p9125_p7, %p9119_p2 }
  0x52   : > { %9129 = shalt.err (!%p9126_p9)
}
  0x53   : > { %s9130_s18 = scalar_lea.vmem %s9408_s10, 2048  ;;  %s9221_s19 = smov [#allocation4]  }
  0x54   : > { %p9131_p12 = scmp.ne.s32.totalorder %s9408_s10, %s9130_s18  ;;  %s9135_s14 = sshll.u32 %s9221_s19, 4  ;;  %s9136_s14 = int_to_ptr.vmem [resolvable:$false] %s9135_s14 }
  0x55   : > { %s9137_s21 = scalar_lea.vmem %s9136_s14, 4096  ;;  %p9138_p4 = scmp.lt.s32.totalorder %s9408_s10, %s9136_s14 }
  0x56   : > { %p9133_p1 = pnand %p9131_p12, %p9117_p0  ;;  %p9139_p13 = scmp.lt.s32.totalorder %s9137_s21, %s9130_s18 }
  0x58   : > { %p9134_p5 = pneg %p9133_p1  ;;  %p9140_p6 = por %p9139_p13, %p9138_p4 }
  0x5a   : > { %p9141_p10 = pnand %p9140_p6, %p9134_p5 }
  0x5c   : > { %9144 = shalt.err (!%p9141_p10)
}
  0x5d   : > { %s10263_s23 = smov 64   ;;  %281 = sbr.rel (%p9307_p8) target bundleno = 1681 (0x691), region = 48 }
  0x5e   : > { %8842 = dma.hbm_to_vmem [thread:$0]  (!%p9410_p11), %s9406_s11, 2048, %s9408_s10, %s9414_s15, %s10263_s23, %s10263_s23, %s9220_s29  }
  0x5f   : > { %s9448_s20 = sand.u32 (!%p9307_p8), 1, %s9207_s25   ;;  %p10264_p4 = scmp.ne.s32.totalorder (!%p9307_p8), %s10256_s30, 0 }
  0x60   : > { %s6536_s22 = sshll.u32 (!%p9307_p8), %s9448_s20, 7  ;;  %s284_s18 = scalar_lea.sflag (!%p9307_p8), [#allocation5], %s9448_s20 }
  0x61   : > { %s9454_s13 = scalar_lea.vmem (!%p9307_p8), [#allocation4], %s6536_s22 }
  0x64   : > { %9190 = dma.done.wait (%p10264_p4), %s284_s18, 2048  }
  0x65   : > { %9192 = vsyncadd (%p10264_p4), %s284_s18, 4294965248  ;;  %p10265_p5 = scmp.eq.s32.totalorder %s9288_s28, 0 }
  0x67   : > { %9194 = dma.done.wait (%p10265_p5), [#allocation8], 18432   ;;  %p10266_p8 = pmov %p10265_p5 }
  0x68   : > { %v9222_v0 = vmov 0.0   ;;  %v8892_v1 = vld [vmem:[#allocation7 + $0x40] sm:$0xff]   ;;  %v8893_v2 = vld [vmem:[#allocation7 + $0x48] sm:$0xff]   ;;  %v8894_v3 = vld [vmem:[#allocation7 + $0x50] sm:$0xff]   ;;  %s10113_s21 = scalar_lea.vmem [#allocation10], %s6536_s22  ;;  %s6758_s23 = sshll.u32 %s9288_s28, 11 }
  0x69   : > { %9196 = vsyncadd (%p10266_p8), [#allocation8], 4294948864  ;;  %327 = vst [vmem:[#allocation2] sm:$0xff] %v9222_v0  ;;  %7444 = vmatprep.subr.bf16.mxu0 %v8892_v1  ;;  %v8895_v4 = vld [vmem:[#allocation7 + $0x58] sm:$0xff]   ;;  %v6760_v7 = vld [vmem:[%s9454_s13] sm:$0xff]   ;;  %s6435_s22 = sshll.u32 %s10113_s21, 4  ;;  %s10196_s30 = scalar_lea.hbm %s10251_s7, %s6758_s23  ;;  %s10198_s22 = int_to_ptr.vmem [resolvable:$true] %s6435_s22 }
  0x6a   : > { %328 = vst [vmem:[#allocation2 + $0x8] sm:$0xff] %v9222_v0  ;;  %329 = vst [vmem:[#allocation2 + $0x10] sm:$0x3] %v9222_v0  ;;  %7445 = vmatpush3.bf16.msra.mxu0 %v8892_v1  ;;  %v6761_v9 = vunpack.c.l.bf16 %v6760_v7  ;;  %v6762_v10 = vunpack.c.h.bf16 %v6760_v7  ;;  %v6967_v11 = vld [vmem:[%s9454_s13 + $0x8] sm:$0xff]   ;;  %v6968_v14 = vld [vmem:[%s9454_s13 + $0x10] sm:$0xff]   ;;  %s6422_s28 = scalar_lea.sflag [#allocation6], %s9448_s20 }
  0x6b   : > { %330 = vst [vmem:[#allocation2 + $0x18] sm:$0xff] %v9222_v0  ;;  %331 = vst [vmem:[#allocation2 + $0x20] sm:$0xff] %v9222_v0  ;;  %7446 = vmatprep.subr.bf16.mxu0 %v8893_v2  ;;  %v6765_v12 = vunpack.c.l.bf16 %v6967_v11  ;;  %v6766_v13 = vunpack.c.h.bf16 %v6967_v11  ;;  %v8896_v15 = vld [vmem:[#allocation7 + $0x60] sm:$0xff]   ;;  %v6769_v16 = vunpack.c.l.bf16 %v6968_v14  ;;  %v6770_v17 = vunpack.c.h.bf16 %v6968_v14  ;;  %v6969_v18 = vld [vmem:[%s9454_s13 + $0x18] sm:$0xff]   ;;  %s9145_s9 = scalar_lea.vmem %s10198_s22, 2048  ;;  %p10267_p0 = scmp.ne.s32.totalorder %s10261_s16, 0 }
  0x6c   : > { %332 = vst [vmem:[#allocation2 + $0x28] sm:$0x3] %v9222_v0  ;;  %333 = vst [vmem:[#allocation2 + $0x30] sm:$0xff] %v9222_v0  ;;  %v6773_v19 = vunpack.c.l.bf16 %v6969_v18  ;;  %v6774_v20 = vunpack.c.h.bf16 %v6969_v18  ;;  %v6970_v21 = vld [vmem:[%s9454_s13 + $0x20] sm:$0xff]   ;;  %v6971_v24 = vld [vmem:[%s9454_s13 + $0x28] sm:$0xff]   ;;  %p9146_p11 = scmp.ne.s32.totalorder %s10198_s22, %s9145_s9  ;;  %s9224_s29 = smov [#allocation10]  }
  0x6d   : > { %334 = vst [vmem:[#allocation2 + $0x38] sm:$0xff] %v9222_v0  ;;  %335 = vst [vmem:[#allocation2 + $0x40] sm:$0x3] %v9222_v0  ;;  %v6777_v22 = vunpack.c.l.bf16 %v6970_v21  ;;  %v6778_v23 = vunpack.c.h.bf16 %v6970_v21  ;;  %v6972_v25 = vld [vmem:[%s9454_s13 + $0x30] sm:$0xff]   ;;  %v8897_v26 = vld [vmem:[#allocation7 + $0x68] sm:$0xff]   ;;  %v6781_v27 = vunpack.c.l.bf16 %v6971_v24  ;;  %v6782_v28 = vunpack.c.h.bf16 %v6971_v24  ;;  %s9149_s11 = sshll.u32 %s9224_s29, 4  ;;  %s9150_s11 = int_to_ptr.vmem [resolvable:$false] %s9149_s11 }
  0x6e   : > { %336 = vst [vmem:[#allocation2 + $0x48] sm:$0xff] %v9222_v0  ;;  %337 = vst [vmem:[#allocation2 + $0x50] sm:$0xff] %v9222_v0  ;;  %7447 = vmatpush3.bf16.msra.mxu0 %v8893_v2  ;;  %v6785_v29 = vunpack.c.l.bf16 %v6972_v25  ;;  %v6786_v30 = vunpack.c.h.bf16 %v6972_v25  ;;  %v6973_v31 = vld [vmem:[%s9454_s13 + $0x38] sm:$0xff]   ;;  %v6974_v34 = vld [vmem:[%s9454_s13 + $0x40] sm:$0xff]   ;;  %v9223_v21 = vmov 0.0|0.0   ;;  %p9147_p2 = pnand %p9146_p11, %p10267_p0  ;;  %s9151_s10 = scalar_lea.vmem %s9150_s11, 4096 }
  0x6f   : > { %338 = vst [vmem:[#allocation2 + $0x58] sm:$0x3] %v9222_v0  ;;  %339 = vst [vmem:[#allocation2 + $0x60] sm:$0xff] %v9222_v0  ;;  %7448 = vmatprep.subr.bf16.mxu0 %v8894_v3  ;;  %v6789_v32 = vunpack.c.l.bf16 %v6973_v31  ;;  %v6790_v33 = vunpack.c.h.bf16 %v6973_v31  ;;  %v6793_v35 = vunpack.c.l.bf16 %v6974_v34  ;;  %v6794_v36 = vunpack.c.h.bf16 %v6974_v34  ;;  %v6975_v37 = vld [vmem:[%s9454_s13 + $0x48] sm:$0xff]   ;;  %v8898_v38 = vld [vmem:[#allocation7 + $0x70] sm:$0xff]   ;;  %p9152_p7 = scmp.lt.s32.totalorder %s10198_s22, %s9150_s11  ;;  %p9153_p9 = scmp.lt.s32.totalorder %s9151_s10, %s9145_s9 }
  0x70   : > { %340 = vst [vmem:[#allocation2 + $0x68] sm:$0xff] %v9222_v0  ;;  %341 = vst [vmem:[#allocation2 + $0x70] sm:$0x3] %v9222_v0  ;;  %v6797_v39 = vunpack.c.l.bf16 %v6975_v37  ;;  %v6798_v40 = vunpack.c.h.bf16 %v6975_v37  ;;  %v6976_v41 = vld [vmem:[%s9454_s13 + $0x50] sm:$0xff]   ;;  %v6977_v44 = vld [vmem:[%s9454_s13 + $0x58] sm:$0xff]   ;;  %p9148_p3 = pneg %p9147_p2 }
  0x71   : > { %342 = vst [vmem:[#allocation2 + $0x78] sm:$0xff] %v9222_v0  ;;  %343 = vst [vmem:[#allocation2 + $0x80] sm:$0xff] %v9222_v0  ;;  %v542_v5 = vld [vmem:[#allocation2 + $0x1] sm:$0xff]  ;;  %v543_v6 = vld [vmem:[#allocation2 + $0x9] sm:$0xff]  ;;  %v6801_v42 = vunpack.c.l.bf16 %v6976_v41  ;;  %v6802_v43 = vunpack.c.h.bf16 %v6976_v41  ;;  %v6805_v46 = vunpack.c.l.bf16 %v6977_v44  ;;  %v6806_v47 = vunpack.c.h.bf16 %v6977_v44  ;;  %p9154_p12 = por %p9153_p9, %p9152_p7 }
  0x72   : > { %344 = vst [vmem:[#allocation2 + $0x88] sm:$0x3] %v9222_v0  ;;  %345 = vst [vmem:[#allocation2 + $0x90] sm:$0xff] %v9222_v0  ;;  %v574_v8 = vpack.c.bf16 %v543_v6, %v542_v5  ;;  %7449 = vmatpush3.bf16.msra.mxu0 %v8894_v3  ;;  %v6978_v45 = vld [vmem:[%s9454_s13 + $0x60] sm:$0xff]   ;;  %v8899_v50 = vld [vmem:[#allocation7 + $0x78] sm:$0xff]  }
  0x73   : > { %346 = vst [vmem:[#allocation2 + $0x98] sm:$0xff] %v9222_v0  ;;  %347 = vst [vmem:[#allocation2 + $0xa0] sm:$0x3] %v9222_v0  ;;  %7450 = vmatprep.subr.bf16.mxu0 %v8895_v4  ;;  %v6809_v48 = vunpack.c.l.bf16 %v6978_v45  ;;  %v6810_v49 = vunpack.c.h.bf16 %v6978_v45  ;;  %v6979_v51 = vld [vmem:[%s9454_s13 + $0x68] sm:$0xff]   ;;  %v6980_v54 = vld [vmem:[%s9454_s13 + $0x70] sm:$0xff]   ;;  %p9155_p1 = pnand %p9154_p12, %p9148_p3 }
  0x74   : > { %348 = vst [vmem:[#allocation2 + $0xa8] sm:$0xff] %v9222_v0  ;;  %349 = vst [vmem:[#allocation2 + $0xb0] sm:$0xff] %v9222_v0  ;;  %7460 = vmatprep.mubr.bf16.mxu0 %v574_v8  ;;  %v6813_v52 = vunpack.c.l.bf16 %v6979_v51  ;;  %v6814_v53 = vunpack.c.h.bf16 %v6979_v51  ;;  %v6817_v55 = vunpack.c.l.bf16 %v6980_v54  ;;  %v6818_v56 = vunpack.c.h.bf16 %v6980_v54  ;;  %v8901_v57 = vld [vmem:[#allocation7] sm:$0xff]   ;;  %v8902_v59 = vld [vmem:[%s9454_s13 + $0x8] sm:$0xff] }
  0x75   : > { %350 = vst [vmem:[#allocation2 + $0xb8] sm:$0x3] %v9222_v0  ;;  %351 = vst [vmem:[#allocation2 + $0xc0] sm:$0xff] %v9222_v0  ;;  %v8900_v58 = vld [vmem:[%s9454_s13] sm:$0xff]  ;;  %v8904_v60 = vld [vmem:[#allocation7 + $0x8] sm:$0xff]  }
  0x76   : > { %352 = vst [vmem:[#allocation2 + $0xc8] sm:$0xff] %v9222_v0  ;;  %353 = vst [vmem:[#allocation2 + $0xd0] sm:$0x3] %v9222_v0  ;;  %7451 = vmatpush3.bf16.msra.mxu0 %v8895_v4  ;;  %v8907_v61 = vld [vmem:[#allocation7 + $0x10] sm:$0xff]   ;;  %v8905_v63 = vld [vmem:[%s9454_s13 + $0x18] sm:$0xff] }
  0x77   : > { %354 = vst [vmem:[#allocation2 + $0xd8] sm:$0xff] %v9222_v0  ;;  %355 = vst [vmem:[#allocation2 + $0xe0] sm:$0xff] %v9222_v0  ;;  %7452 = vmatprep.subr.bf16.mxu0 %v8896_v15  ;;  %v8903_v62 = vld [vmem:[%s9454_s13 + $0x10] sm:$0xff]  ;;  %v8913_v1 = vld [vmem:[#allocation7 + $0x20] sm:$0xff]  }
  0x78   : > { %356 = vst [vmem:[#allocation2 + $0xe8] sm:$0x3] %v9222_v0  ;;  %357 = vst [vmem:[#allocation2 + $0xf0] sm:$0xff] %v9222_v0  ;;  %v9592_v2 = vld [vmem:[%s9454_s13 + $0x20] sm:$0xff]  ;;  %v8908_v3 = vld [vmem:[%s9454_s13 + $0x28] sm:$0xff] }
  0x79   : > { %358 = vst [vmem:[#allocation2 + $0xf8] sm:$0xff] %v9222_v0  ;;  %359 = vst [vmem:[#allocation2 + $0x100] sm:$0x3] %v9222_v0  ;;  %v8916_v4 = vld [vmem:[#allocation7 + $0x28] sm:$0xff]   ;;  %v9597_v5 = vld [vmem:[%s9454_s13 + $0x30] sm:$0xff] }
  0x7a   : > { %360 = vst [vmem:[#allocation2 + $0x108] sm:$0xff] %v9222_v0  ;;  %361 = vst [vmem:[#allocation2 + $0x110] sm:$0xff] %v9222_v0  ;;  %7453 = vmatpush3.bf16.msra.mxu0 %v8896_v15  ;;  %v8919_v6 = vld [vmem:[#allocation7 + $0x30] sm:$0xff]   ;;  %v9600_v7 = vld [vmem:[%s9454_s13 + $0x38] sm:$0xff] }
  0x7b   : > { %362 = vst [vmem:[#allocation2 + $0x118] sm:$0x3] %v9222_v0  ;;  %363 = vst [vmem:[#allocation2 + $0x120] sm:$0xff] %v9222_v0  ;;  %7454 = vmatprep.subr.bf16.mxu0 %v8897_v26  ;;  %v8922_v8 = vld [vmem:[#allocation7 + $0x38] sm:$0xff]   ;;  %v9608_v11 = vld [vmem:[%s9454_s13 + $0x48] sm:$0xff] }
  0x7c   : > { %364 = vst [vmem:[#allocation2 + $0x128] sm:$0xff] %v9222_v0  ;;  %365 = vst [vmem:[#allocation2 + $0x130] sm:$0x3] %v9222_v0  ;;  %v9621_v14 = vld [vmem:[%s9454_s13 + $0x60] sm:$0xff]  ;;  %v9624_v15 = vld [vmem:[%s9454_s13 + $0x68] sm:$0xff] }
  0x7d   : > { %366 = vst [vmem:[#allocation2 + $0x138] sm:$0xff] %v9222_v0  ;;  %367 = vst [vmem:[#allocation2 + $0x140] sm:$0xff] %v9222_v0  ;;  %v8926_v31 = vld [vmem:[#allocation7 + $0x98] sm:$0xff]   ;;  %v8927_v37 = vld [vmem:[#allocation7 + $0xa0] sm:$0xff]  }
  0x7e   : > { %368 = vst [vmem:[#allocation2 + $0x148] sm:$0x3] %v9222_v0  ;;  %369 = vst [vmem:[#allocation2 + $0x150] sm:$0xff] %v9222_v0  ;;  %7455 = vmatpush3.bf16.msra.mxu0 %v8897_v26  ;;  %v8929_v45 = vld [vmem:[#allocation7 + $0xb0] sm:$0xff]  }
  0x7f   : > { %370 = vst [vmem:[#allocation2 + $0x158] sm:$0xff] %v9222_v0  ;;  %371 = vst [vmem:[#allocation2 + $0x160] sm:$0x3] %v9222_v0  ;;  %7456 = vmatprep.subr.bf16.mxu0 %v8898_v38 }
  0x80   : > { %372 = vst [vmem:[#allocation2 + $0x168] sm:$0xff] %v9222_v0  ;;  %373 = vst [vmem:[#allocation2 + $0x170] sm:$0xff] %v9222_v0 }
  0x81   : > { %374 = vst [vmem:[#allocation2 + $0x178] sm:$0x3] %v9222_v0  ;;  %375 = vst [vmem:[#allocation2 + $0x180] sm:$0xff] %v9222_v0 }
  0x82   : > { %376 = vst [vmem:[#allocation2 + $0x188] sm:$0xff] %v9222_v0  ;;  %377 = vst [vmem:[#allocation2 + $0x190] sm:$0x3] %v9222_v0  ;;  %7457 = vmatpush3.bf16.msra.mxu0 %v8898_v38 }
  0x83   : > { %378 = vst [vmem:[#allocation2 + $0x198] sm:$0xff] %v9222_v0  ;;  %379 = vst [vmem:[#allocation2 + $0x1a0] sm:$0xff] %v9222_v0  ;;  %7458 = vmatprep.subr.bf16.mxu0 %v8899_v50 }
  0x84   : > { %380 = vst [vmem:[#allocation2 + $0x1a8] sm:$0x3] %v9222_v0  ;;  %3278 = vst [vmem:[#allocation3] sm:$0xff] %v9222_v0 }
  0x85   : > { %3279 = vst [vmem:[#allocation3 + $0x8] sm:$0xff] %v9222_v0  ;;  %3280 = vst [vmem:[#allocation3 + $0x10] sm:$0x3] %v9222_v0 }
  0x86   : > { %3281 = vst [vmem:[#allocation3 + $0x18] sm:$0xff] %v9222_v0  ;;  %3282 = vst [vmem:[#allocation3 + $0x20] sm:$0xff] %v9222_v0  ;;  %7459 = vmatpush3.bf16.msra.mxu0 %v8899_v50 }
  0x87   : > { %3283 = vst [vmem:[#allocation3 + $0x28] sm:$0x3] %v9222_v0  ;;  %3284 = vst [vmem:[#allocation3 + $0x30] sm:$0xff] %v9222_v0  ;;  %7492 = vmatprep.subr.bf16.mxu0 %v8901_v57 }
  0x88   : > { %3285 = vst [vmem:[#allocation3 + $0x38] sm:$0xff] %v9222_v0  ;;  %3286 = vst [vmem:[#allocation3 + $0x40] sm:$0x3] %v9222_v0 }
  0x89   : > { %3287 = vst [vmem:[#allocation3 + $0x48] sm:$0xff] %v9222_v0  ;;  %3288 = vst [vmem:[#allocation3 + $0x50] sm:$0xff] %v9222_v0  ;;  %7461 = vmatmul.mubr.bf16.vlgmr.msra.gmra.mrb[0].mxu0 %v8900_v58 }
  0x8a   : > { %3289 = vst [vmem:[#allocation3 + $0x58] sm:$0x3] %v9222_v0  ;;  %3290 = vst [vmem:[#allocation3 + $0x60] sm:$0xff] %v9222_v0  ;;  %7493 = vmatpush3.bf16.msra.mxu0 %v8901_v57  ;;  %7464 = vmatprep.mubr.bf16.mxu0 %v8902_v59 }
  0x8b   : > { %3291 = vst [vmem:[#allocation3 + $0x68] sm:$0xff] %v9222_v0  ;;  %3292 = vst [vmem:[#allocation3 + $0x70] sm:$0x3] %v9222_v0  ;;  %7494 = vmatprep.subr.bf16.mxu0 %v8904_v60 }
  0x8c   : > { %3293 = vst [vmem:[#allocation3 + $0x78] sm:$0xff] %v9222_v0  ;;  %3294 = vst [vmem:[#allocation3 + $0x80] sm:$0xff] %v9222_v0 }
  0x8d   : > { %3295 = vst [vmem:[#allocation3 + $0x88] sm:$0x3] %v9222_v0  ;;  %3296 = vst [vmem:[#allocation3 + $0x90] sm:$0xff] %v9222_v0 }
  0x8e   : > { %3297 = vst [vmem:[#allocation3 + $0x98] sm:$0xff] %v9222_v0  ;;  %3298 = vst [vmem:[#allocation3 + $0xa0] sm:$0x3] %v9222_v0  ;;  %7495 = vmatpush3.bf16.msra.mxu0 %v8904_v60 }
  0x8f   : > { %3299 = vst [vmem:[#allocation3 + $0xa8] sm:$0xff] %v9222_v0  ;;  %3300 = vst [vmem:[#allocation3 + $0xb0] sm:$0xff] %v9222_v0  ;;  %7496 = vmatprep.subr.bf16.mxu0 %v8907_v61 }
  0x90   : > { %3301 = vst [vmem:[#allocation3 + $0xb8] sm:$0x3] %v9222_v0  ;;  %3302 = vst [vmem:[#allocation3 + $0xc0] sm:$0xff] %v9222_v0 }
  0x91   : > { %3303 = vst [vmem:[#allocation3 + $0xc8] sm:$0xff] %v9222_v0  ;;  %3304 = vst [vmem:[#allocation3 + $0xd0] sm:$0x3] %v9222_v0  ;;  %7465 = vmatmul.mubr.bf16.gmra.mrb[4].mxu0 %v8903_v62 }
  0x92   : > { %3305 = vst [vmem:[#allocation3 + $0xd8] sm:$0xff] %v9222_v0  ;;  %3306 = vst [vmem:[#allocation3 + $0xe0] sm:$0xff] %v9222_v0  ;;  %7468 = vmatprep.mubr.bf16.mxu0 %v8905_v63  ;;  %7497 = vmatpush3.bf16.msra.mxu0 %v8907_v61 }
  0x93   : > { %3307 = vst [vmem:[#allocation3 + $0xe8] sm:$0x3] %v9222_v0  ;;  %3308 = vst [vmem:[#allocation3 + $0xf0] sm:$0xff] %v9222_v0 }
  0x94   : > { %3309 = vst [vmem:[#allocation3 + $0xf8] sm:$0xff] %v9222_v0  ;;  %3310 = vst [vmem:[#allocation3 + $0x100] sm:$0x3] %v9222_v0 }
  0x95   : > { %3311 = vst [vmem:[#allocation3 + $0x108] sm:$0xff] %v9222_v0  ;;  %3312 = vst [vmem:[#allocation3 + $0x110] sm:$0xff] %v9222_v0 }
  0x96   : > { %3313 = vst [vmem:[#allocation3 + $0x118] sm:$0x3] %v9222_v0  ;;  %3314 = vst [vmem:[#allocation3 + $0x120] sm:$0xff] %v9222_v0 }
  0x97   : > { %3315 = vst [vmem:[#allocation3 + $0x128] sm:$0xff] %v9222_v0  ;;  %3316 = vst [vmem:[#allocation3 + $0x130] sm:$0x3] %v9222_v0 }
  0x98   : > { %3317 = vst [vmem:[#allocation3 + $0x138] sm:$0xff] %v9222_v0  ;;  %3318 = vst [vmem:[#allocation3 + $0x140] sm:$0xff] %v9222_v0 }
  0x99   : > { %3319 = vst [vmem:[#allocation3 + $0x148] sm:$0x3] %v9222_v0  ;;  %3320 = vst [vmem:[#allocation3 + $0x150] sm:$0xff] %v9222_v0  ;;  %7469 = vmatmul.mubr.bf16.gmra.mrb[8].mxu0 %v9592_v2 }
  0x9a   : > { %3321 = vst [vmem:[#allocation3 + $0x158] sm:$0xff] %v9222_v0  ;;  %3322 = vst [vmem:[#allocation3 + $0x160] sm:$0x3] %v9222_v0  ;;  %7472 = vmatprep.mubr.bf16.mxu0 %v8908_v3  ;;  %v6981_v3 = vld [vmem:[%s9454_s13 + $0x78] sm:$0xff]  }
  0x9b   : > { %3323 = vst [vmem:[#allocation3 + $0x168] sm:$0xff] %v9222_v0  ;;  %3324 = vst [vmem:[#allocation3 + $0x170] sm:$0xff] %v9222_v0 }
  0x9c   : > { %3325 = vst [vmem:[#allocation3 + $0x178] sm:$0x3] %v9222_v0  ;;  %3326 = vst [vmem:[#allocation3 + $0x180] sm:$0xff] %v9222_v0 }
  0x9d   : > { %3327 = vst [vmem:[#allocation3 + $0x188] sm:$0xff] %v9222_v0  ;;  %3328 = vst [vmem:[#allocation3 + $0x190] sm:$0x3] %v9222_v0 }
  0x9e   : > { %3329 = vst [vmem:[#allocation3 + $0x198] sm:$0xff] %v9222_v0  ;;  %3330 = vst [vmem:[#allocation3 + $0x1a0] sm:$0xff] %v9222_v0 }
  0x9f   : > { %3331 = vst [vmem:[#allocation3 + $0x1a8] sm:$0x3] %v9222_v0  ;;  %446 = vst [vmem:[#allocation2 + $0x19] sm:$0xff] %v6761_v9  ;;  %v8910_v0 = vld [vmem:[#allocation7 + $0x18] sm:$0xff]   ;;  %v8923_v9 = vld [vmem:[#allocation7 + $0x80] sm:$0xff]  }
  0xa0   : > { %447 = vst [vmem:[#allocation2 + $0x21] sm:$0xff] %v6762_v10  ;;  %448 = vst [vmem:[#allocation2 + $0x31] sm:$0xff] %v6765_v12  ;;  %7498 = vmatprep.subr.bf16.mxu0 %v8910_v0  ;;  %v9605_v10 = vld [vmem:[%s9454_s13 + $0x40] sm:$0xff]  ;;  %v9613_v12 = vld [vmem:[%s9454_s13 + $0x50] sm:$0xff] }
  0xa1   : > { %449 = vst [vmem:[#allocation2 + $0x39] sm:$0xff] %v6766_v13  ;;  %450 = vst [vmem:[#allocation2 + $0x49] sm:$0xff] %v6769_v16  ;;  %7499 = vmatpush3.bf16.msra.mxu0 %v8910_v0  ;;  %v9616_v13 = vld [vmem:[%s9454_s13 + $0x58] sm:$0xff]  ;;  %v9629_v16 = vld [vmem:[%s9454_s13 + $0x70] sm:$0xff] }
  0xa2   : > { %451 = vst [vmem:[#allocation2 + $0x51] sm:$0xff] %v6770_v17  ;;  %452 = vst [vmem:[#allocation2 + $0x61] sm:$0xff] %v6773_v19  ;;  %7500 = vmatprep.subr.bf16.mxu0 %v8913_v1  ;;  %7473 = vmatmul.mubr.bf16.gmra.mrb[12].mxu0 %v9597_v5 }
  0xa3   : > { %453 = vst [vmem:[#allocation2 + $0x69] sm:$0xff] %v6774_v20  ;;  %454 = vst [vmem:[#allocation2 + $0x79] sm:$0xff] %v6777_v22  ;;  %7476 = vmatprep.mubr.bf16.mxu0 %v9600_v7 }
  0xa4   : > { %455 = vst [vmem:[#allocation2 + $0x81] sm:$0xff] %v6778_v23  ;;  %456 = vst [vmem:[#allocation2 + $0x91] sm:$0xff] %v6781_v27  ;;  %v8924_v23 = vld [vmem:[#allocation7 + $0x88] sm:$0xff]  }
  0xa5   : > { %457 = vst [vmem:[#allocation2 + $0x99] sm:$0xff] %v6782_v28  ;;  %458 = vst [vmem:[#allocation2 + $0xa9] sm:$0xff] %v6785_v29  ;;  %7501 = vmatpush3.bf16.msra.mxu0 %v8913_v1  ;;  %v8925_v29 = vld [vmem:[#allocation7 + $0x90] sm:$0xff]  }
  0xa6   : > { %459 = vst [vmem:[#allocation2 + $0xb1] sm:$0xff] %v6786_v30  ;;  %460 = vst [vmem:[#allocation2 + $0xc1] sm:$0xff] %v6789_v32  ;;  %7502 = vmatprep.subr.bf16.mxu0 %v8916_v4  ;;  %v480_v17 = vld [vmem:[#allocation2 + $0x18] sm:$0xff] }
  0xa7   : > { %461 = vst [vmem:[#allocation2 + $0xc9] sm:$0xff] %v6790_v33  ;;  %462 = vst [vmem:[#allocation2 + $0xd9] sm:$0xff] %v6793_v35  ;;  %v481_v18 = vld [vmem:[#allocation2 + $0x20] sm:$0xff]  ;;  %v482_v19 = vld [vmem:[#allocation2 + $0x30] sm:$0xff] }
  0xa8   : > { %463 = vst [vmem:[#allocation2 + $0xe1] sm:$0xff] %v6794_v36  ;;  %464 = vst [vmem:[#allocation2 + $0xf1] sm:$0xff] %v6797_v39  ;;  %v483_v20 = vld [vmem:[#allocation2 + $0x38] sm:$0xff]  ;;  %v9632_v22 = vpack.c.bf16 %v481_v18, %v480_v17  ;;  %v484_v25 = vld [vmem:[#allocation2 + $0x48] sm:$0xff] }
  0xa9   : > { %465 = vst [vmem:[#allocation2 + $0xf9] sm:$0xff] %v6798_v40  ;;  %466 = vst [vmem:[#allocation2 + $0x109] sm:$0xff] %v6801_v42  ;;  %7503 = vmatpush3.bf16.msra.mxu0 %v8916_v4  ;;  %v9634_v24 = vpack.c.bf16 %v483_v20, %v482_v19  ;;  %v485_v26 = vld [vmem:[#allocation2 + $0x50] sm:$0xff]  ;;  %v486_v27 = vld [vmem:[#allocation2 + $0x60] sm:$0xff] }
  0xaa   : > { %467 = vst [vmem:[#allocation2 + $0x111] sm:$0xff] %v6802_v43  ;;  %468 = vst [vmem:[#allocation2 + $0x121] sm:$0xff] %v6805_v46  ;;  %7504 = vmatprep.subr.bf16.mxu0 %v8919_v6  ;;  %7477 = vmatmul.mubr.bf16.gmra.mrb[16].mxu0 %v9605_v10  ;;  %v487_v28 = vld [vmem:[#allocation2 + $0x68] sm:$0xff]  ;;  %v9638_v30 = vpack.c.bf16 %v485_v26, %v484_v25  ;;  %v488_v33 = vld [vmem:[#allocation2 + $0x78] sm:$0xff] }
  0xab   : > { %469 = vst [vmem:[#allocation2 + $0x129] sm:$0xff] %v6806_v47  ;;  %470 = vst [vmem:[#allocation2 + $0x139] sm:$0xff] %v6809_v48  ;;  %7480 = vmatprep.mubr.bf16.mxu0 %v9608_v11  ;;  %v9640_v32 = vpack.c.bf16 %v487_v28, %v486_v27  ;;  %v489_v34 = vld [vmem:[#allocation2 + $0x80] sm:$0xff]  ;;  %v490_v35 = vld [vmem:[#allocation2 + $0x90] sm:$0xff] }
  0xac   : > { %471 = vst [vmem:[#allocation2 + $0x141] sm:$0xff] %v6810_v49  ;;  %472 = vst [vmem:[#allocation2 + $0x151] sm:$0xff] %v6813_v52  ;;  %v491_v36 = vld [vmem:[#allocation2 + $0x98] sm:$0xff]  ;;  %v9644_v38 = vpack.c.bf16 %v489_v34, %v488_v33  ;;  %v8928_v39 = vld [vmem:[#allocation7 + $0xa8] sm:$0xff]  }
  0xad   : > { %473 = vst [vmem:[#allocation2 + $0x159] sm:$0xff] %v6814_v53  ;;  %474 = vst [vmem:[#allocation2 + $0x169] sm:$0xff] %v6817_v55  ;;  %7505 = vmatpush3.bf16.msra.mxu0 %v8919_v6  ;;  %v9646_v40 = vpack.c.bf16 %v491_v36, %v490_v35  ;;  %v492_v41 = vld [vmem:[#allocation2 + $0xa8] sm:$0xff]  ;;  %v493_v42 = vld [vmem:[#allocation2 + $0xb0] sm:$0xff]  ;;  %v6821_v6 = vunpack.c.l.bf16 %v6981_v3 }
  0xae   : > { %475 = vst [vmem:[#allocation2 + $0x171] sm:$0xff] %v6818_v56  ;;  %7506 = vmatprep.subr.bf16.mxu0 %v8922_v8  ;;  %v494_v43 = vld [vmem:[#allocation2 + $0xc0] sm:$0xff]  ;;  %v495_v44 = vld [vmem:[#allocation2 + $0xc8] sm:$0xff]  ;;  %v9650_v46 = vpack.c.bf16 %v493_v42, %v492_v41  ;;  %v8930_v47 = vld [vmem:[#allocation7 + $0xb8] sm:$0xff]  }
  0xaf   : > { %v9652_v48 = vpack.c.bf16 %v495_v44, %v494_v43  ;;  %v496_v49 = vld [vmem:[#allocation2 + $0xd8] sm:$0xff]  ;;  %v497_v50 = vld [vmem:[#allocation2 + $0xe0] sm:$0xff]  ;;  %v498_v51 = vld [vmem:[#allocation2 + $0xf0] sm:$0xff]  ;;  %476 = vst [vmem:[#allocation2 + $0x181] sm:$0xff] %v6821_v6 }
  0xb0   : > { %v499_v52 = vld [vmem:[#allocation2 + $0xf8] sm:$0xff]  ;;  %v8931_v53 = vld [vmem:[#allocation7 + $0xc0] sm:$0xff]   ;;  %v9656_v54 = vpack.c.bf16 %v497_v50, %v496_v49  ;;  %v500_v56 = vld [vmem:[#allocation2 + $0x108] sm:$0xff] }
  0xb1   : > { %7507 = vmatpush3.bf16.msra.mxu0 %v8922_v8  ;;  %v9658_v55 = vpack.c.bf16 %v499_v52, %v498_v51  ;;  %v501_v57 = vld [vmem:[#allocation2 + $0x110] sm:$0xff]  ;;  %v502_v58 = vld [vmem:[#allocation2 + $0x120] sm:$0xff]  ;;  %v6822_v8 = vunpack.c.h.bf16 %v6981_v3  ;;  %v8932_v33 = vld [vmem:[#allocation7 + $0xc8] sm:$0xff]  }
  0xb2   : > { %7540 = vmatprep.subr.bf16.mxu0 %v8923_v9  ;;  %7481 = vmatmul.mubr.bf16.gmra.mrb[20].mxu0 %v9613_v12  ;;  %v503_v59 = vld [vmem:[#allocation2 + $0x128] sm:$0xff]  ;;  %v9662_v60 = vpack.c.bf16 %v501_v57, %v500_v56  ;;  %v504_v62 = vld [vmem:[#allocation2 + $0x138] sm:$0xff]  ;;  %v8935_v50 = vld [vmem:[#allocation7 + $0xe0] sm:$0xff]  }
  0xb3   : > { %7484 = vmatprep.mubr.bf16.mxu0 %v9616_v13  ;;  %v9664_v61 = vpack.c.bf16 %v503_v59, %v502_v58  ;;  %v505_v63 = vld [vmem:[#allocation2 + $0x140] sm:$0xff]  ;;  %v506_v0 = vld [vmem:[#allocation2 + $0x150] sm:$0xff]  ;;  %477 = vst [vmem:[#allocation2 + $0x189] sm:$0xff] %v6822_v8  ;;  %v8934_v43 = vld [vmem:[#allocation7 + $0xd8] sm:$0xff]  }
  0xb4   : > { %v507_v1 = vld [vmem:[#allocation2 + $0x158] sm:$0xff]  ;;  %v9669_v4 = vpack.c.bf16 %v505_v63, %v504_v62  ;;  %v508_v17 = vld [vmem:[#allocation2 + $0x168] sm:$0xff]  ;;  %v8937_v62 = vld [vmem:[#allocation7 + $0xf0] sm:$0xff]  }
  0xb5   : > { %v509_v18 = vld [vmem:[#allocation2 + $0x170] sm:$0xff]  ;;  %v1025_v19 = vld [vmem:[#allocation2 + $0x2] sm:$0xff]  ;;  %v1027_v25 = vld [vmem:[#allocation2 + $0x1a] sm:$0xff] }
  0xb6   : > { %v1026_v20 = vld [vmem:[#allocation2 + $0xa] sm:$0xff]  ;;  %v1028_v26 = vld [vmem:[#allocation2 + $0x22] sm:$0xff]  ;;  %v1029_v27 = vld [vmem:[#allocation2 + $0x32] sm:$0xff] }
  0xb7   : > { %v1030_v28 = vld [vmem:[#allocation2 + $0x3a] sm:$0xff]  ;;  %v1031_v34 = vld [vmem:[#allocation2 + $0x4a] sm:$0xff]  ;;  %v1032_v35 = vld [vmem:[#allocation2 + $0x52] sm:$0xff] }
  0xb8   : > { %v1033_v36 = vld [vmem:[#allocation2 + $0x62] sm:$0xff]  ;;  %v9684_v41 = vpack.c.bf16 %v1032_v35, %v1031_v34  ;;  %v1035_v44 = vld [vmem:[#allocation2 + $0x7a] sm:$0xff]  ;;  %v1039_v56 = vld [vmem:[#allocation2 + $0xaa] sm:$0xff] }
  0xb9   : > { %v1038_v49 = vld [vmem:[#allocation2 + $0x9a] sm:$0xff]  ;;  %v1040_v57 = vld [vmem:[#allocation2 + $0xb2] sm:$0xff]  ;;  %v1041_v58 = vld [vmem:[#allocation2 + $0xc2] sm:$0xff] }
  0xba   : > { %7485 = vmatmul.mubr.bf16.gmra.mrb[24].mxu0 %v9621_v14  ;;  %v1042_v59 = vld [vmem:[#allocation2 + $0xca] sm:$0xff]  ;;  %v9696_v63 = vpack.c.bf16 %v1040_v57, %v1039_v56  ;;  %v1043_v3 = vld [vmem:[#allocation2 + $0xda] sm:$0xff]  ;;  %v1044_v6 = vld [vmem:[#allocation2 + $0xe2] sm:$0xff] }
  0xbb   : > { %7488 = vmatprep.mubr.bf16.mxu0 %v9624_v15  ;;  %v1045_v8 = vld [vmem:[#allocation2 + $0xf2] sm:$0xff]  ;;  %v1051_v34 = vld [vmem:[#allocation2 + $0x13a] sm:$0xff]  ;;  %v1052_v35 = vld [vmem:[#allocation2 + $0x142] sm:$0xff] }
  0xbc   : > { %v8943_v56 = vld [vmem:[#allocation7 + $0x120] sm:$0xff]   ;;  %v8945_v57 = vld [vmem:[#allocation7 + $0x130] sm:$0xff]  }
  0xc2   : > { %7489 = vmatmul.mubr.bf16.gmra.mrb[28].mxu0 %v9629_v16 }
  0xc3   : > { %7508 = vmatprep.mubr.bf16.mxu0 %v9223_v21  ;;  %v9675_v21 = vpack.c.bf16 %v509_v18, %v508_v17  ;;  %v1046_v17 = vld [vmem:[#allocation2 + $0xfa] sm:$0xff] }
  0xc4   : > { %v8939_v18 = vld [vmem:[#allocation7 + $0x100] sm:$0xff]  }
  0xca   : > { %7509 = vmatmul.mubr.bf16.vlgmr.msra.gmra.mrb[0].mxu0 %v9632_v22 }
  0xcb   : > { %7541 = vmatpush3.bf16.msra.mxu0 %v8923_v9  ;;  %7512 = vmatprep.mubr.bf16.mxu0 %v9634_v24  ;;  %v9671_v9 = vpack.c.bf16 %v507_v1, %v506_v0  ;;  %v9698_v0 = vpack.c.bf16 %v1042_v59, %v1041_v58  ;;  %v8938_v1 = vld [vmem:[#allocation7 + $0xf8] sm:$0xff]   ;;  %v8947_v59 = vld [vmem:[#allocation7 + $0x140] sm:$0xff]  }
  0xcc   : > { %7542 = vmatprep.subr.bf16.mxu0 %v8924_v23  ;;  %v8946_v58 = vld [vmem:[#allocation7 + $0x138] sm:$0xff]  }
  0xcf   : > { %7543 = vmatpush3.bf16.msra.mxu0 %v8924_v23  ;;  %v1057_v23 = vpack.c.bf16 %v1026_v20, %v1025_v19  ;;  %v9702_v19 = vpack.c.bf16 %v1044_v6, %v1043_v3  ;;  %v9704_v20 = vpack.c.bf16 %v1046_v17, %v1045_v8  ;;  %v9052_v6 = vld [vmem:[%s9454_s13] sm:$0xff]  ;;  %v8948_v8 = vld [vmem:[#allocation7 + $0x148] sm:$0xff]  }
  0xd0   : > { %7544 = vmatprep.subr.bf16.mxu0 %v8925_v29  ;;  %v9053_v17 = vld [vmem:[%s9454_s13 + $0x8] sm:$0xff] }
  0xd2   : > { %7513 = vmatmul.mubr.bf16.gmra.mrb[4].mxu0 %v9638_v30 }
  0xd3   : > { %7516 = vmatprep.mubr.bf16.mxu0 %v9640_v32  ;;  %7545 = vmatpush3.bf16.msra.mxu0 %v8925_v29  ;;  %v9678_v29 = vpack.c.bf16 %v1028_v26, %v1027_v25  ;;  %v1048_v25 = vld [vmem:[#allocation2 + $0x112] sm:$0xff]  ;;  %v1049_v26 = vld [vmem:[#allocation2 + $0x122] sm:$0xff] }
  0xd4   : > { %7546 = vmatprep.subr.bf16.mxu0 %v8926_v31 }
  0xd7   : > { %7547 = vmatpush3.bf16.msra.mxu0 %v8926_v31  ;;  %v9680_v31 = vpack.c.bf16 %v1030_v28, %v1029_v27  ;;  %v1050_v27 = vld [vmem:[#allocation2 + $0x12a] sm:$0xff] }
  0xd8   : > { %7548 = vmatprep.subr.bf16.mxu0 %v8927_v37 }
  0xda   : > { %7517 = vmatmul.mubr.bf16.gmra.mrb[8].mxu0 %v9644_v38 }
  0xdb   : > { %7520 = vmatprep.mubr.bf16.mxu0 %v9646_v40  ;;  %7549 = vmatpush3.bf16.msra.mxu0 %v8927_v37  ;;  %v1034_v37 = vld [vmem:[#allocation2 + $0x6a] sm:$0xff] }
  0xdc   : > { %7550 = vmatprep.subr.bf16.mxu0 %v8928_v39  ;;  %v9686_v42 = vpack.c.bf16 %v1034_v37, %v1033_v36  ;;  %v1053_v36 = vld [vmem:[#allocation2 + $0x152] sm:$0xff]  ;;  %v1054_v37 = vld [vmem:[#allocation2 + $0x15a] sm:$0xff] }
  0xdf   : > { %7551 = vmatpush3.bf16.msra.mxu0 %v8928_v39  ;;  %v8933_v39 = vld [vmem:[#allocation7 + $0xd0] sm:$0xff]  }
  0xe0   : > { %7552 = vmatprep.subr.bf16.mxu0 %v8929_v45 }
  0xe2   : > { %7521 = vmatmul.mubr.bf16.gmra.mrb[12].mxu0 %v9650_v46 }
  0xe3   : > { %7524 = vmatprep.mubr.bf16.mxu0 %v9652_v48  ;;  %7553 = vmatpush3.bf16.msra.mxu0 %v8929_v45  ;;  %v1036_v45 = vld [vmem:[#allocation2 + $0x82] sm:$0xff] }
  0xe4   : > { %7554 = vmatprep.subr.bf16.mxu0 %v8930_v47  ;;  %v9690_v51 = vpack.c.bf16 %v1036_v45, %v1035_v44  ;;  %v1055_v44 = vld [vmem:[#allocation2 + $0x16a] sm:$0xff]  ;;  %v1056_v45 = vld [vmem:[#allocation2 + $0x172] sm:$0xff] }
  0xe7   : > { %7555 = vmatpush3.bf16.msra.mxu0 %v8930_v47  ;;  %v1037_v47 = vld [vmem:[#allocation2 + $0x92] sm:$0xff] }
  0xe8   : > { %7588 = vmatprep.subr.bf16.mxu0 %v8931_v53  ;;  %v9692_v52 = vpack.c.bf16 %v1038_v49, %v1037_v47  ;;  %v9720_v47 = vpack.c.bf16 %v1056_v45, %v1055_v44  ;;  %v8940_v49 = vld [vmem:[#allocation7 + $0x108] sm:$0xff]   ;;  %v2564_v44 = vld [vmem:[#allocation2 + $0x91] sm:$0xff]  ;;  %v2565_v45 = vld [vmem:[#allocation2 + $0x99] sm:$0xff] }
  0xea   : > { %7525 = vmatmul.mubr.bf16.gmra.mrb[16].mxu0 %v9656_v54 }
  0xeb   : > { %7528 = vmatprep.mubr.bf16.mxu0 %v9658_v55 }
  0xf2   : > { %7529 = vmatmul.mubr.bf16.gmra.mrb[20].mxu0 %v9662_v60 }
  0xf3   : > { %7532 = vmatprep.mubr.bf16.mxu0 %v9664_v61 }
  0xfa   : > { %7533 = vmatmul.mubr.bf16.gmra.mrb[24].mxu0 %v9669_v4 }
  0xfb   : > { %7536 = vmatprep.mubr.bf16.mxu0 %v9671_v9 }
 0x102   : > { %7537 = vmatmul.mubr.bf16.gmra.mrb[28].mxu0 %v9675_v21 }
 0x103   : > { %7556 = vmatprep.mubr.bf16.mxu0 %v1057_v23  ;;  %v1047_v23 = vld [vmem:[#allocation2 + $0x10a] sm:$0xff] }
 0x104   : > { %v9708_v28 = vpack.c.bf16 %v1048_v25, %v1047_v23  ;;  %v8949_v23 = vld [vmem:[#allocation7 + $0x150] sm:$0xff]   ;;  %v8950_v25 = vld [vmem:[#allocation7 + $0x158] sm:$0xff]  }
 0x10a   : > { %7557 = vmatmul.mubr.bf16.vlgmr.msra.gmra.mrb[0].mxu0 %v9678_v29 }
 0x10b   : > { %7589 = vmatpush3.bf16.msra.mxu0 %v8931_v53  ;;  %7560 = vmatprep.mubr.bf16.mxu0 %v9680_v31  ;;  %v8936_v53 = vld [vmem:[#allocation7 + $0xe8] sm:$0xff]  }
 0x10c   : > { %7590 = vmatprep.subr.bf16.mxu0 %v8932_v33 }
 0x10f   : > { %7591 = vmatpush3.bf16.msra.mxu0 %v8932_v33  ;;  %v9710_v33 = vpack.c.bf16 %v1050_v27, %v1049_v26  ;;  %v9055_v26 = vld [vmem:[%s9454_s13 + $0x18] sm:$0xff]  ;;  %v8951_v27 = vld [vmem:[#allocation7 + $0x160] sm:$0xff]  }
 0x110   : > { %7592 = vmatprep.subr.bf16.mxu0 %v8933_v39 }
 0x112   : > { %7561 = vmatmul.mubr.bf16.gmra.mrb[4].mxu0 %v9684_v41 }
 0x113   : > { %7564 = vmatprep.mubr.bf16.mxu0 %v9686_v42  ;;  %7593 = vmatpush3.bf16.msra.mxu0 %v8933_v39  ;;  %v9714_v39 = vpack.c.bf16 %v1052_v35, %v1051_v34  ;;  %v8952_v34 = vld [vmem:[#allocation7 + $0x168] sm:$0xff]  }
 0x114   : > { %7594 = vmatprep.subr.bf16.mxu0 %v8934_v43  ;;  %v9056_v35 = vld [vmem:[%s9454_s13 + $0x28] sm:$0xff] }
 0x117   : > { %7595 = vmatpush3.bf16.msra.mxu0 %v8934_v43  ;;  %v9716_v43 = vpack.c.bf16 %v1054_v37, %v1053_v36  ;;  %v8953_v36 = vld [vmem:[#allocation7 + $0x170] sm:$0xff]   ;;  %v8955_v37 = vld [vmem:[#allocation7 + $0x178] sm:$0xff]  }
 0x118   : > { %7596 = vmatprep.subr.bf16.mxu0 %v8935_v50 }
 0x11a   : > { %7565 = vmatmul.mubr.bf16.gmra.mrb[8].mxu0 %v9690_v51 }
 0x11b   : > { %7568 = vmatprep.mubr.bf16.mxu0 %v9692_v52  ;;  %7597 = vmatpush3.bf16.msra.mxu0 %v8935_v50  ;;  %v8941_v50 = vld [vmem:[#allocation7 + $0x110] sm:$0xff]  }
 0x11c   : > { %7598 = vmatprep.subr.bf16.mxu0 %v8936_v53 }
 0x11f   : > { %7599 = vmatpush3.bf16.msra.mxu0 %v8936_v53  ;;  %v8942_v53 = vld [vmem:[#allocation7 + $0x118] sm:$0xff]  }
 0x120   : > { %7600 = vmatprep.subr.bf16.mxu0 %v8937_v62 }
 0x122   : > { %7569 = vmatmul.mubr.bf16.gmra.mrb[12].mxu0 %v9696_v63 }
 0x123   : > { %7572 = vmatprep.mubr.bf16.mxu0 %v9698_v0  ;;  %7601 = vmatpush3.bf16.msra.mxu0 %v8937_v62  ;;  %v1361_v62 = vld [vmem:[#allocation2 + $0x180] sm:$0xff] }
 0x124   : > { %7602 = vmatprep.subr.bf16.mxu0 %v8938_v1 }
 0x127   : > { %7603 = vmatpush3.bf16.msra.mxu0 %v8938_v1  ;;  %v1362_v1 = vld [vmem:[#allocation2 + $0x188] sm:$0xff] }
 0x128   : > { %7636 = vmatprep.subr.bf16.mxu0 %v8939_v18  ;;  %v9738_v3 = vpack.c.bf16 %v1362_v1, %v1361_v62 }
 0x12a   : > { %7573 = vmatmul.mubr.bf16.gmra.mrb[16].mxu0 %v9702_v19 }
 0x12b   : > { %7576 = vmatprep.mubr.bf16.mxu0 %v9704_v20 }
 0x132   : > { %7577 = vmatmul.mubr.bf16.gmra.mrb[20].mxu0 %v9708_v28 }
 0x133   : > { %7580 = vmatprep.mubr.bf16.mxu0 %v9710_v33 }
 0x13a   : > { %7581 = vmatmul.mubr.bf16.gmra.mrb[24].mxu0 %v9714_v39 }
 0x13b   : > { %7584 = vmatprep.mubr.bf16.mxu0 %v9716_v43 }
 0x142   : > { %7585 = vmatmul.mubr.bf16.gmra.mrb[28].mxu0 %v9720_v47 }
 0x143   : > { %7604 = vmatprep.mubr.bf16.mxu0 %v9632_v22  ;;  %v8944_v22 = vld [vmem:[#allocation7 + $0x128] sm:$0xff]  }
 0x14a   : > { %7605 = vmatmul.mubr.bf16.vlgmr.msra.gmra.mrb[0].mxu0 %v9634_v24 }
 0x14b   : > { %7637 = vmatpush3.bf16.msra.mxu0 %v8939_v18  ;;  %7608 = vmatprep.mubr.bf16.mxu0 %v9638_v30  ;;  %v9054_v18 = vld [vmem:[%s9454_s13 + $0x10] sm:$0xff] }
 0x14c   : > { %7638 = vmatprep.subr.bf16.mxu0 %v8940_v49 }
 0x14f   : > { %7639 = vmatpush3.bf16.msra.mxu0 %v8940_v49 }
 0x150   : > { %7640 = vmatprep.subr.bf16.mxu0 %v8941_v50 }
 0x152   : > { %7609 = vmatmul.mubr.bf16.gmra.mrb[4].mxu0 %v9640_v32 }
 0x153   : > { %7612 = vmatprep.mubr.bf16.mxu0 %v9644_v38  ;;  %7641 = vmatpush3.bf16.msra.mxu0 %v8941_v50  ;;  %v2592_v50 = vpack.c.bf16 %v2565_v45, %v2564_v44  ;;  %v2877_v44 = vld [vmem:[#allocation2 + $0xe2] sm:$0xff]  ;;  %v2878_v45 = vld [vmem:[#allocation2 + $0xf2] sm:$0xff] }
 0x154   : > { %7642 = vmatprep.subr.bf16.mxu0 %v8942_v53 }
 0x157   : > { %7643 = vmatpush3.bf16.msra.mxu0 %v8942_v53  ;;  %v8975_v53 = vld [vmem:[#allocation7 + $0x218] sm:$0xff]  }
 0x158   : > { %7644 = vmatprep.subr.bf16.mxu0 %v8943_v56 }
 0x15a   : > { %7613 = vmatmul.mubr.bf16.gmra.mrb[8].mxu0 %v9646_v40 }
 0x15b   : > { %7616 = vmatprep.mubr.bf16.mxu0 %v9650_v46  ;;  %7645 = vmatpush3.bf16.msra.mxu0 %v8943_v56  ;;  %v2566_v56 = vld [vmem:[#allocation2 + $0xa9] sm:$0xff] }
 0x15c   : > { %7646 = vmatprep.subr.bf16.mxu0 %v8944_v22 }
 0x15f   : > { %7647 = vmatpush3.bf16.msra.mxu0 %v8944_v22  ;;  %v2567_v22 = vld [vmem:[#allocation2 + $0xb1] sm:$0xff] }
 0x160   : > { %7648 = vmatprep.subr.bf16.mxu0 %v8945_v57  ;;  %v2593_v62 = vpack.c.bf16 %v2567_v22, %v2566_v56  ;;  %v2881_v56 = vld [vmem:[#allocation2 + $0x112] sm:$0xff]  ;;  %v2882_v22 = vld [vmem:[#allocation2 + $0x122] sm:$0xff] }
 0x162   : > { %7617 = vmatmul.mubr.bf16.gmra.mrb[12].mxu0 %v9652_v48 }
 0x163   : > { %7620 = vmatprep.mubr.bf16.mxu0 %v9656_v54  ;;  %7649 = vmatpush3.bf16.msra.mxu0 %v8945_v57  ;;  %v2568_v57 = vld [vmem:[#allocation2 + $0xc1] sm:$0xff] }
 0x164   : > { %7650 = vmatprep.subr.bf16.mxu0 %v8946_v58 }
 0x167   : > { %7651 = vmatpush3.bf16.msra.mxu0 %v8946_v58  ;;  %v2569_v58 = vld [vmem:[#allocation2 + $0xc9] sm:$0xff] }
 0x168   : > { %7684 = vmatprep.subr.bf16.mxu0 %v8947_v59  ;;  %v2594_v1 = vpack.c.bf16 %v2569_v58, %v2568_v57  ;;  %v2883_v57 = vld [vmem:[#allocation2 + $0x12a] sm:$0xff] }
 0x16a   : > { %7621 = vmatmul.mubr.bf16.gmra.mrb[16].mxu0 %v9658_v55 }
 0x16b   : > { %7624 = vmatprep.mubr.bf16.mxu0 %v9662_v60 }
 0x172   : > { %7625 = vmatmul.mubr.bf16.gmra.mrb[20].mxu0 %v9664_v61 }
 0x173   : > { %7628 = vmatprep.mubr.bf16.mxu0 %v9669_v4 }
 0x17a   : > { %7629 = vmatmul.mubr.bf16.gmra.mrb[24].mxu0 %v9671_v9 }
 0x17b   : > { %7632 = vmatprep.mubr.bf16.mxu0 %v9675_v21 }
 0x182   : > { %7633 = vmatmul.mubr.bf16.gmra.mrb[28].mxu0 %v9738_v3 }
 0x183   : > { %7652 = vmatprep.mubr.bf16.mxu0 %v9052_v6  ;;  %v2570_v6 = vld [vmem:[#allocation2 + $0xd9] sm:$0xff] }
 0x18a   : > { %7653 = vmatmul.mubr.bf16.vlgmr.msra.gmra.mrb[0].mxu0 %v9053_v17  ;;  %v2572_v17 = vld [vmem:[#allocation2 + $0xf1] sm:$0xff] }
 0x18b   : > { %7685 = vmatpush3.bf16.msra.mxu0 %v8947_v59  ;;  %7656 = vmatprep.mubr.bf16.mxu0 %v9054_v18  ;;  %v8976_v59 = vld [vmem:[#allocation7 + $0x220] sm:$0xff]  }
 0x18c   : > { %7686 = vmatprep.subr.bf16.mxu0 %v8948_v8  ;;  %v2573_v18 = vld [vmem:[#allocation2 + $0xf9] sm:$0xff] }
 0x18f   : > { %7687 = vmatpush3.bf16.msra.mxu0 %v8948_v8  ;;  %v2571_v8 = vld [vmem:[#allocation2 + $0xe1] sm:$0xff] }
 0x190   : > { %7688 = vmatprep.subr.bf16.mxu0 %v8949_v23 }
 0x192   : > { %7657 = vmatmul.mubr.bf16.gmra.mrb[4].mxu0 %v9055_v26  ;;  %v2596_v26 = vpack.c.bf16 %v2573_v18, %v2572_v17  ;;  %v2888_v18 = vld [vmem:[#allocation2 + $0x16a] sm:$0xff] }
 0x193   : > { %7660 = vmatprep.mubr.bf16.mxu0 %v9592_v2  ;;  %7689 = vmatpush3.bf16.msra.mxu0 %v8949_v23  ;;  %v8956_v2 = vld [vmem:[#allocation7 + $0x180] sm:$0xff]   ;;  %v8978_v23 = vld [vmem:[#allocation7 + $0x230] sm:$0xff]  }
 0x194   : > { %7690 = vmatprep.subr.bf16.mxu0 %v8950_v25 }
 0x197   : > { %7691 = vmatpush3.bf16.msra.mxu0 %v8950_v25  ;;  %v2595_v25 = vpack.c.bf16 %v2571_v8, %v2570_v6  ;;  %v2887_v6 = vld [vmem:[#allocation2 + $0x15a] sm:$0xff] }
 0x198   : > { %7692 = vmatprep.subr.bf16.mxu0 %v8951_v27 }
 0x19a   : > { %7661 = vmatmul.mubr.bf16.gmra.mrb[8].mxu0 %v9056_v35  ;;  %v2575_v35 = vld [vmem:[#allocation2 + $0x111] sm:$0xff] }
 0x19b   : > { %7664 = vmatprep.mubr.bf16.mxu0 %v9597_v5  ;;  %7693 = vmatpush3.bf16.msra.mxu0 %v8951_v27  ;;  %v9757_v5 = vld [vmem:[%s9454_s13 + $0x78] sm:$0xff] }
 0x19c   : > { %7694 = vmatprep.subr.bf16.mxu0 %v8952_v34  ;;  %v8979_v27 = vld [vmem:[#allocation7 + $0x238] sm:$0xff]  }
 0x19f   : > { %7695 = vmatpush3.bf16.msra.mxu0 %v8952_v34  ;;  %v2574_v34 = vld [vmem:[#allocation2 + $0x109] sm:$0xff] }
 0x1a0   : > { %7696 = vmatprep.subr.bf16.mxu0 %v8953_v36 }
 0x1a2   : > { %7665 = vmatmul.mubr.bf16.gmra.mrb[12].mxu0 %v9600_v7  ;;  %v8957_v7 = vld [vmem:[#allocation7 + $0x188] sm:$0xff]  }
 0x1a3   : > { %7668 = vmatprep.mubr.bf16.mxu0 %v9605_v10  ;;  %7697 = vmatpush3.bf16.msra.mxu0 %v8953_v36  ;;  %v8958_v10 = vld [vmem:[#allocation7 + $0x190] sm:$0xff]   ;;  %v2576_v36 = vld [vmem:[#allocation2 + $0x121] sm:$0xff] }
 0x1a4   : > { %7698 = vmatprep.subr.bf16.mxu0 %v8955_v37 }
 0x1a7   : > { %7699 = vmatpush3.bf16.msra.mxu0 %v8955_v37  ;;  %v2577_v37 = vld [vmem:[#allocation2 + $0x129] sm:$0xff] }
 0x1a8   : > { %7732 = vmatprep.subr.bf16.mxu0 %v8956_v2 }
 0x1aa   : > { %7669 = vmatmul.mubr.bf16.gmra.mrb[16].mxu0 %v9608_v11  ;;  %v8959_v11 = vld [vmem:[#allocation7 + $0x198] sm:$0xff]  }
 0x1ab   : > { %7672 = vmatprep.mubr.bf16.mxu0 %v9613_v12  ;;  %v8960_v12 = vld [vmem:[#allocation7 + $0x1a0] sm:$0xff]  }
 0x1b2   : > { %7673 = vmatmul.mubr.bf16.gmra.mrb[20].mxu0 %v9616_v13  ;;  %v8961_v13 = vld [vmem:[#allocation7 + $0x1a8] sm:$0xff]  }
 0x1b3   : > { %7676 = vmatprep.mubr.bf16.mxu0 %v9621_v14  ;;  %v8962_v14 = vld [vmem:[#allocation7 + $0x1b0] sm:$0xff]  }
 0x1ba   : > { %7677 = vmatmul.mubr.bf16.gmra.mrb[24].mxu0 %v9624_v15  ;;  %v8963_v15 = vld [vmem:[#allocation7 + $0x1b8] sm:$0xff]  }
 0x1bb   : > { %7680 = vmatprep.mubr.bf16.mxu0 %v9629_v16  ;;  %v8964_v16 = vld [vmem:[#allocation7 + $0x1c0] sm:$0xff]  }
 0x1c2   : > { %7681 = vmatmul.mubr.bf16.gmra.mrb[28].mxu0 %v9757_v5 }
 0x1c3   : > { %7700 = vmatprep.mubr.bf16.mxu0 %v9678_v29  ;;  %v1973_v29 = vld [vmem:[#allocation2 + $0x182] sm:$0xff] }
 0x1ca   : > { %7701 = vmatmul.mubr.bf16.vlgmr.msra.gmra.mrb[0].mxu0 %v9680_v31  ;;  %v1974_v31 = vld [vmem:[#allocation2 + $0x18a] sm:$0xff] }
 0x1cb   : > { %7733 = vmatpush3.bf16.msra.mxu0 %v8956_v2  ;;  %7704 = vmatprep.mubr.bf16.mxu0 %v9684_v41  ;;  %v9775_v41 = vpack.c.bf16 %v1974_v31, %v1973_v29  ;;  %v2597_v2 = vpack.c.bf16 %v2575_v35, %v2574_v34  ;;  %v2583_v29 = vld [vmem:[#allocation2 + $0x171] sm:$0xff] }
 0x1cc   : > { %7734 = vmatprep.subr.bf16.mxu0 %v8957_v7  ;;  %v8983_v35 = vld [vmem:[#allocation9 + $0x58] sm:$0xff]  }
 0x1cf   : > { %7735 = vmatpush3.bf16.msra.mxu0 %v8957_v7  ;;  %v2598_v7 = vpack.c.bf16 %v2577_v37, %v2576_v36  ;;  %v8984_v36 = vld [vmem:[#allocation9 + $0x60] sm:$0xff]   ;;  %v8985_v37 = vld [vmem:[#allocation9 + $0x68] sm:$0xff]  }
 0x1d0   : > { %7736 = vmatprep.subr.bf16.mxu0 %v8958_v10 }
 0x1d2   : > { %7705 = vmatmul.mubr.bf16.gmra.mrb[4].mxu0 %v9686_v42  ;;  %v8965_v42 = vld [vmem:[#allocation7 + $0x1c8] sm:$0xff]  }
 0x1d3   : > { %7708 = vmatprep.mubr.bf16.mxu0 %v9690_v51  ;;  %7737 = vmatpush3.bf16.msra.mxu0 %v8958_v10  ;;  %v8966_v51 = vld [vmem:[#allocation7 + $0x1d0] sm:$0xff]   ;;  %v2578_v10 = vld [vmem:[#allocation2 + $0x139] sm:$0xff] }
 0x1d4   : > { %7738 = vmatprep.subr.bf16.mxu0 %v8959_v11 }
 0x1d7   : > { %7739 = vmatpush3.bf16.msra.mxu0 %v8959_v11  ;;  %v2579_v11 = vld [vmem:[#allocation2 + $0x141] sm:$0xff] }
 0x1d8   : > { %7740 = vmatprep.subr.bf16.mxu0 %v8960_v12 }
 0x1da   : > { %7709 = vmatmul.mubr.bf16.gmra.mrb[8].mxu0 %v9692_v52  ;;  %v8967_v52 = vld [vmem:[#allocation7 + $0x1d8] sm:$0xff]  }
 0x1db   : > { %7712 = vmatprep.mubr.bf16.mxu0 %v9696_v63  ;;  %7741 = vmatpush3.bf16.msra.mxu0 %v8960_v12  ;;  %v8968_v63 = vld [vmem:[#allocation7 + $0x1e0] sm:$0xff]   ;;  %v2580_v12 = vld [vmem:[#allocation2 + $0x151] sm:$0xff] }
 0x1dc   : > { %7742 = vmatprep.subr.bf16.mxu0 %v8961_v13 }
 0x1df   : > { %7743 = vmatpush3.bf16.msra.mxu0 %v8961_v13  ;;  %v2581_v13 = vld [vmem:[#allocation2 + $0x159] sm:$0xff] }
 0x1e0   : > { %7744 = vmatprep.subr.bf16.mxu0 %v8962_v14 }
 0x1e2   : > { %7713 = vmatmul.mubr.bf16.gmra.mrb[12].mxu0 %v9698_v0  ;;  %v8980_v0 = vld [vmem:[#allocation9 + $0x40] sm:$0xff]  }
 0x1e3   : > { %7716 = vmatprep.mubr.bf16.mxu0 %v9702_v19  ;;  %7745 = vmatpush3.bf16.msra.mxu0 %v8962_v14  ;;  %v2559_v19 = vld [vmem:[#allocation2 + $0x51] sm:$0xff]  ;;  %v2599_v14 = vpack.c.bf16 %v2579_v11, %v2578_v10 }
 0x1e4   : > { %7746 = vmatprep.subr.bf16.mxu0 %v8963_v15  ;;  %7876 = vmatprep.subr.bf16.mxu1 %v8980_v0  ;;  %v3429_v10 = vld [vmem:[#allocation3 + $0x1] sm:$0xff] }
 0x1e5   : > { %7877 = vmatpush3.bf16.msra.mxu1 %v8980_v0  ;;  %v2868_v0 = vld [vmem:[#allocation2 + $0x7a] sm:$0xff] }
 0x1e7   : > { %7747 = vmatpush3.bf16.msra.mxu0 %v8963_v15  ;;  %v2600_v15 = vpack.c.bf16 %v2581_v13, %v2580_v12  ;;  %v8988_v12 = vld [vmem:[#allocation9] sm:$0xff]  }
 0x1e8   : > { %7780 = vmatprep.subr.bf16.mxu0 %v8964_v16  ;;  %v9801_v13 = vld [vmem:[%s10246_s2] ss:$0 sm:$0xff] }
 0x1ea   : > { %7717 = vmatmul.mubr.bf16.gmra.mrb[16].mxu0 %v9704_v20  ;;  %v2561_v20 = vld [vmem:[#allocation2 + $0x69] sm:$0xff] }
 0x1eb   : > { %7720 = vmatprep.mubr.bf16.mxu0 %v9708_v28 }
 0x1f2   : > { %7721 = vmatmul.mubr.bf16.gmra.mrb[20].mxu0 %v9710_v33  ;;  %v8973_v33 = vld [vmem:[#allocation7 + $0x208] sm:$0xff]  }
 0x1f3   : > { %7724 = vmatprep.mubr.bf16.mxu0 %v9714_v39  ;;  %v2562_v39 = vld [vmem:[#allocation2 + $0x79] sm:$0xff] }
 0x1fa   : > { %7725 = vmatmul.mubr.bf16.gmra.mrb[24].mxu0 %v9716_v43  ;;  %v2563_v43 = vld [vmem:[#allocation2 + $0x81] sm:$0xff] }
 0x1fb   : > { %7728 = vmatprep.mubr.bf16.mxu0 %v9720_v47  ;;  %v8974_v47 = vld [vmem:[#allocation7 + $0x210] sm:$0xff]   ;;  %v2591_v49 = vpack.c.bf16 %v2563_v43, %v2562_v39  ;;  %v2876_v43 = vld [vmem:[#allocation2 + $0xda] sm:$0xff] }
 0x202   : > { %7729 = vmatmul.mubr.bf16.gmra.mrb[28].mxu0 %v9775_v41 }
 0x203   : > { %7748 = vmatprep.mubr.bf16.mxu0 %v9634_v24  ;;  %v8969_v24 = vld [vmem:[#allocation7 + $0x1e8] sm:$0xff]  }
 0x20a   : > { %7749 = vmatmul.mubr.bf16.vlgmr.msra.gmra.mrb[0].mxu0 %v9638_v30  ;;  %v8970_v30 = vld [vmem:[#allocation7 + $0x1f0] sm:$0xff]  }
 0x20b   : > { %7781 = vmatpush3.bf16.msra.mxu0 %v8964_v16  ;;  %7752 = vmatprep.mubr.bf16.mxu0 %v9640_v32  ;;  %v8971_v32 = vld [vmem:[#allocation7 + $0x1f8] sm:$0xff]   ;;  %v2582_v16 = vld [vmem:[#allocation2 + $0x169] sm:$0xff] }
 0x20c   : > { %7782 = vmatprep.subr.bf16.mxu0 %v8965_v42  ;;  %v2601_v31 = vpack.c.bf16 %v2583_v29, %v2582_v16 }
 0x20f   : > { %7783 = vmatpush3.bf16.msra.mxu0 %v8965_v42  ;;  %v2586_v42 = vld [vmem:[#allocation2 + $0x199] sm:$0xff] }
 0x210   : > { %7784 = vmatprep.subr.bf16.mxu0 %v8966_v51 }
 0x212   : > { %7753 = vmatmul.mubr.bf16.gmra.mrb[4].mxu0 %v9644_v38  ;;  %v8972_v38 = vld [vmem:[#allocation7 + $0x200] sm:$0xff]  }
 0x213   : > { %7756 = vmatprep.mubr.bf16.mxu0 %v9646_v40  ;;  %7785 = vmatpush3.bf16.msra.mxu0 %v8966_v51  ;;  %v2556_v40 = vld [vmem:[#allocation2 + $0x31] sm:$0xff]  ;;  %v2587_v51 = vld [vmem:[#allocation2 + $0x1a1] sm:$0xff] }
 0x214   : > { %7786 = vmatprep.subr.bf16.mxu0 %v8967_v52 }
 0x217   : > { %7787 = vmatpush3.bf16.msra.mxu0 %v8967_v52  ;;  %v2862_v52 = vld [vmem:[#allocation2 + $0x32] sm:$0xff] }
 0x218   : > { %7788 = vmatprep.subr.bf16.mxu0 %v8968_v63 }
 0x21a   : > { %7757 = vmatmul.mubr.bf16.gmra.mrb[8].mxu0 %v9650_v46  ;;  %v2557_v46 = vld [vmem:[#allocation2 + $0x39] sm:$0xff] }
 0x21b   : > { %7760 = vmatprep.mubr.bf16.mxu0 %v9652_v48  ;;  %7789 = vmatpush3.bf16.msra.mxu0 %v8968_v63  ;;  %v9057_v48 = vld [vmem:[#allocation2] sm:$0xff] }
 0x21c   : > { %7790 = vmatprep.subr.bf16.mxu0 %v8969_v24  ;;  %v2863_v63 = vld [vmem:[#allocation2 + $0x3a] sm:$0xff] }
 0x21f   : > { %7791 = vmatpush3.bf16.msra.mxu0 %v8969_v24  ;;  %v2603_v24 = vpack.c.bf16 %v2587_v51, %v2586_v42 }
 0x220   : > { %7792 = vmatprep.subr.bf16.mxu0 %v8970_v30 }
 0x222   : > { %7761 = vmatmul.mubr.bf16.gmra.mrb[12].mxu0 %v9656_v54  ;;  %v9793_v54 = vpack.c.bf16 %v9057_v48, %v9057_v48 }
 0x223   : > { %7764 = vmatprep.mubr.bf16.mxu0 %v9658_v55  ;;  %7793 = vmatpush3.bf16.msra.mxu0 %v8970_v30  ;;  %v2588_v55 = vpack.c.bf16 %v2557_v46, %v2556_v40  ;;  %v2894_v30 = vpack.c.bf16 %v2863_v63, %v2862_v52  ;;  %v2866_v40 = vld [vmem:[#allocation2 + $0x62] sm:$0xff]  ;;  %v2867_v46 = vld [vmem:[#allocation2 + $0x6a] sm:$0xff] }
 0x224   : > { %7794 = vmatprep.subr.bf16.mxu0 %v8971_v32 }
 0x227   : > { %7795 = vmatpush3.bf16.msra.mxu0 %v8971_v32  ;;  %v2864_v32 = vld [vmem:[#allocation2 + $0x4a] sm:$0xff] }
 0x228   : > { %7828 = vmatprep.subr.bf16.mxu0 %v8972_v38 }
 0x22a   : > { %7765 = vmatmul.mubr.bf16.gmra.mrb[16].mxu0 %v9662_v60  ;;  %v8981_v60 = vld [vmem:[#allocation9 + $0x48] sm:$0xff]  }
 0x22b   : > { %7768 = vmatprep.mubr.bf16.mxu0 %v9664_v61  ;;  %v2558_v61 = vld [vmem:[#allocation2 + $0x49] sm:$0xff]  ;;  %7878 = vmatprep.subr.bf16.mxu1 %v8981_v60 }
 0x22c   : > { %7879 = vmatpush3.bf16.msra.mxu1 %v8981_v60  ;;  %v2869_v60 = vld [vmem:[#allocation2 + $0x82] sm:$0xff] }
 0x232   : > { %7769 = vmatmul.mubr.bf16.gmra.mrb[20].mxu0 %v9669_v4  ;;  %v2560_v4 = vld [vmem:[#allocation2 + $0x61] sm:$0xff] }
 0x233   : > { %7772 = vmatprep.mubr.bf16.mxu0 %v9671_v9  ;;  %v2589_v9 = vpack.c.bf16 %v2559_v19, %v2558_v61  ;;  %v2590_v28 = vpack.c.bf16 %v2561_v20, %v2560_v4  ;;  %v2870_v61 = vld [vmem:[#allocation2 + $0x92] sm:$0xff]  ;;  %v2897_v19 = vpack.c.bf16 %v2869_v60, %v2868_v0  ;;  %v2872_v20 = vld [vmem:[#allocation2 + $0xaa] sm:$0xff] }
 0x23a   : > { %7773 = vmatmul.mubr.bf16.gmra.mrb[24].mxu0 %v9675_v21  ;;  %v8982_v21 = vld [vmem:[#allocation9 + $0x50] sm:$0xff]  }
 0x23b   : > { %7776 = vmatprep.mubr.bf16.mxu0 %v9738_v3  ;;  %7880 = vmatprep.subr.bf16.mxu1 %v8982_v21  ;;  %v8977_v3 = vld [vmem:[#allocation7 + $0x228] sm:$0xff]  }
 0x23c   : > { %7881 = vmatpush3.bf16.msra.mxu1 %v8982_v21  ;;  %v2874_v21 = vld [vmem:[#allocation2 + $0xc2] sm:$0xff] }
 0x23d   : > { %7882 = vmatprep.subr.bf16.mxu1 %v8983_v35 }
 0x240   : > { %7883 = vmatpush3.bf16.msra.mxu1 %v8983_v35 }
 0x241   : > { %7884 = vmatprep.subr.bf16.mxu1 %v8984_v36 }
 0x242   : > { %7777 = vmatmul.mubr.bf16.gmra.mrb[28].mxu0 %v9793_v54 }
 0x243   : > { %7796 = vmatprep.mubr.bf16.mxu0 %v2588_v55  ;;  %v2896_v55 = vpack.c.bf16 %v2867_v46, %v2866_v40 }
 0x244   : > { %7885 = vmatpush3.bf16.msra.mxu1 %v8984_v36  ;;  %v8992_v36 = vld [vmem:[#allocation9 + $0x20] sm:$0xff]  }
 0x245   : > { %7886 = vmatprep.subr.bf16.mxu1 %v8985_v37 }
 0x248   : > { %7887 = vmatpush3.bf16.msra.mxu1 %v8985_v37 }
 0x24a   : > { %7797 = vmatmul.mubr.bf16.vlgmr.msra.gmra.mrb[0].mxu0 %v2589_v9  ;;  %v2873_v9 = vld [vmem:[#allocation2 + $0xb2] sm:$0xff] }
 0x24b   : > { %7829 = vmatpush3.bf16.msra.mxu0 %v8972_v38  ;;  %7800 = vmatprep.mubr.bf16.mxu0 %v2590_v28  ;;  %v2865_v38 = vld [vmem:[#allocation2 + $0x52] sm:$0xff]  ;;  %v2875_v28 = vld [vmem:[#allocation2 + $0xca] sm:$0xff] }
 0x24c   : > { %7830 = vmatprep.subr.bf16.mxu0 %v8973_v33  ;;  %v2895_v48 = vpack.c.bf16 %v2865_v38, %v2864_v32  ;;  %v2900_v39 = vpack.c.bf16 %v2875_v28, %v2874_v21 }
 0x24f   : > { %7831 = vmatpush3.bf16.msra.mxu0 %v8973_v33  ;;  %v2899_v33 = vpack.c.bf16 %v2873_v9, %v2872_v20  ;;  %v8989_v9 = vld [vmem:[#allocation9 + $0x8] sm:$0xff]  }
 0x250   : > { %7832 = vmatprep.subr.bf16.mxu0 %v8974_v47 }
 0x252   : > { %7801 = vmatmul.mubr.bf16.gmra.mrb[4].mxu0 %v2591_v49  ;;  %v2901_v49 = vpack.c.bf16 %v2877_v44, %v2876_v43 }
 0x253   : > { %7804 = vmatprep.mubr.bf16.mxu0 %v2592_v50  ;;  %7833 = vmatpush3.bf16.msra.mxu0 %v8974_v47  ;;  %v2879_v47 = vld [vmem:[#allocation2 + $0xfa] sm:$0xff] }
 0x254   : > { %7834 = vmatprep.subr.bf16.mxu0 %v8975_v53  ;;  %v2902_v50 = vpack.c.bf16 %v2879_v47, %v2878_v45 }
 0x257   : > { %7835 = vmatpush3.bf16.msra.mxu0 %v8975_v53  ;;  %v2880_v53 = vld [vmem:[#allocation2 + $0x10a] sm:$0xff] }
 0x258   : > { %7836 = vmatprep.subr.bf16.mxu0 %v8976_v59  ;;  %v2903_v58 = vpack.c.bf16 %v2881_v56, %v2880_v53 }
 0x25a   : > { %7805 = vmatmul.mubr.bf16.gmra.mrb[8].mxu0 %v2593_v62  ;;  %v2884_v62 = vld [vmem:[#allocation2 + $0x13a] sm:$0xff] }
 0x25b   : > { %7808 = vmatprep.mubr.bf16.mxu0 %v2594_v1  ;;  %7837 = vmatpush3.bf16.msra.mxu0 %v8976_v59  ;;  %v2904_v59 = vpack.c.bf16 %v2883_v57, %v2882_v22  ;;  %v2885_v1 = vld [vmem:[#allocation2 + $0x142] sm:$0xff] }
 0x25c   : > { %7838 = vmatprep.subr.bf16.mxu0 %v8977_v3  ;;  %v2905_v8 = vpack.c.bf16 %v2885_v1, %v2884_v62 }
 0x25f   : > { %7839 = vmatpush3.bf16.msra.mxu0 %v8977_v3  ;;  %v2886_v3 = vld [vmem:[#allocation2 + $0x152] sm:$0xff] }
 0x260   : > { %7840 = vmatprep.subr.bf16.mxu0 %v8978_v23  ;;  %v2906_v17 = vpack.c.bf16 %v2887_v6, %v2886_v3  ;;  %v8991_v6 = vld [vmem:[#allocation9 + $0x18] sm:$0xff]  }
 0x262   : > { %7809 = vmatmul.mubr.bf16.gmra.mrb[12].mxu0 %v2595_v25 }
 0x263   : > { %7812 = vmatprep.mubr.bf16.mxu0 %v2596_v26  ;;  %7841 = vmatpush3.bf16.msra.mxu0 %v8978_v23  ;;  %v2889_v23 = vld [vmem:[#allocation2 + $0x172] sm:$0xff]  ;;  %v2892_v26 = vld [vmem:[#allocation2 + $0x19a] sm:$0xff] }
 0x264   : > { %7842 = vmatprep.subr.bf16.mxu0 %v8979_v27  ;;  %v2907_v25 = vpack.c.bf16 %v2889_v23, %v2888_v18 }
 0x267   : > { %7843 = vmatpush3.bf16.msra.mxu0 %v8979_v27  ;;  %v2893_v27 = vld [vmem:[#allocation2 + $0x1a2] sm:$0xff] }
 0x268   : > { %v2909_v34 = vpack.c.bf16 %v2893_v27, %v2892_v26 }
 0x26a   : > { %7813 = vmatmul.mubr.bf16.gmra.mrb[16].mxu0 %v2597_v2  ;;  %v8986_v2 = vld [vmem:[#allocation9 + $0x70] sm:$0xff]  }
 0x26b   : > { %7816 = vmatprep.mubr.bf16.mxu0 %v2598_v7  ;;  %7888 = vmatprep.subr.bf16.mxu1 %v8986_v2  ;;  %v8987_v7 = vld [vmem:[#allocation9 + $0x78] sm:$0xff]  }
 0x26c   : > { %7889 = vmatpush3.bf16.msra.mxu1 %v8986_v2 }
 0x26d   : > { %7890 = vmatprep.subr.bf16.mxu1 %v8987_v7 }
 0x270   : > { %7891 = vmatpush3.bf16.msra.mxu1 %v8987_v7 }
 0x271   : > { %7924 = vmatprep.subr.bf16.mxu1 %v8988_v12 }
 0x272   : > { %7817 = vmatmul.mubr.bf16.gmra.mrb[20].mxu0 %v2599_v14 }
 0x273   : > { %7820 = vmatprep.mubr.bf16.mxu0 %v2600_v15  ;;  %v9806_v15 = vld [vmem:[%s10247_s3] ss:$0 sm:$0xff] }
 0x27a   : > { %7821 = vmatmul.mubr.bf16.gmra.mrb[24].mxu0 %v2601_v31 }
 0x27b   : > { %7824 = vmatprep.mubr.bf16.mxu0 %v9757_v5  ;;  %v2871_v5 = vld [vmem:[#allocation2 + $0x9a] sm:$0xff] }
 0x27c   : > { %v2898_v4 = vpack.c.bf16 %v2871_v5, %v2870_v61 }
 0x282   : > { %7825 = vmatmul.mubr.bf16.gmra.mrb[28].mxu0 %v2603_v24 }
 0x283   : > { %7844 = vmatprep.mubr.bf16.mxu0 %v2894_v30 }
 0x28a   : > { %7845 = vmatmul.mubr.bf16.vlgmr.msra.gmra.mrb[0].mxu0 %v2895_v48 }
 0x28b   : > { %7848 = vmatprep.mubr.bf16.mxu0 %v2896_v55 }
 0x292   : > { %7849 = vmatmul.mubr.bf16.gmra.mrb[4].mxu0 %v2897_v19 }
 0x293   : > { %7852 = vmatprep.mubr.bf16.mxu0 %v2898_v4 }
 0x29a   : > { %7853 = vmatmul.mubr.bf16.gmra.mrb[8].mxu0 %v2899_v33 }
 0x29b   : > { %7856 = vmatprep.mubr.bf16.mxu0 %v2900_v39 }
 0x2a2   : > { %7857 = vmatmul.mubr.bf16.gmra.mrb[12].mxu0 %v2901_v49 }
 0x2a3   : > { %7860 = vmatprep.mubr.bf16.mxu0 %v2902_v50  ;;  %v8990_v50 = vld [vmem:[#allocation9 + $0x10] sm:$0xff]  }
 0x2aa   : > { %7861 = vmatmul.mubr.bf16.gmra.mrb[16].mxu0 %v2903_v58 }
 0x2ab   : > { %7864 = vmatprep.mubr.bf16.mxu0 %v2904_v59 }
 0x2b2   : > { %7865 = vmatmul.mubr.bf16.gmra.mrb[20].mxu0 %v2905_v8 }
 0x2b3   : > { %7868 = vmatprep.mubr.bf16.mxu0 %v2906_v17 }
 0x2ba   : > { %7869 = vmatmul.mubr.bf16.gmra.mrb[24].mxu0 %v2907_v25 }
 0x2bb   : > { %7872 = vmatprep.mubr.bf16.mxu0 %v9775_v41  ;;  %v3430_v41 = vld [vmem:[#allocation3 + $0x9] sm:$0xff] }
 0x2bc   : > { %v3461_v11 = vpack.c.bf16 %v3430_v41, %v3429_v10 }
 0x2be   : > { %7892 = vmatprep.mubr.bf16.mxu1 %v3461_v11 }
 0x2c2   : > { %7873 = vmatmul.mubr.bf16.gmra.mrb[28].mxu0 %v2909_v34 }
 0x35d   : > { %v7846_v14 = vpop.f32.mrb[0].mxu0 }
 0x35e   : > { %v3177_v16 = vmul.f32 %v7846_v14, %v9801_v13  ;;  %v3009_v29 = vpop.f32.mrb[1].mxu0 }
 0x35f   : > { %v3175_v31 = vmul.f32 %v9801_v13, %v3009_v29  ;;  %v7847_v42 = vpop.f32.mrb[2].mxu0  ;;  %v8993_v29 = vld [vmem:[#allocation9 + $0x28] sm:$0xff]  }
 0x360   : > { %v3216_v51 = vadd.f32 %v9806_v15, %v3177_v16  ;;  %v3178_v52 = vmul.f32 %v7847_v42, %v9801_v13  ;;  %v3012_v63 = vpop.f32.mrb[3].mxu0 }
 0x361   : > { %v3214_v24 = vadd.f32 %v9806_v15, %v3175_v31  ;;  %v3176_v30 = vmul.f32 %v9801_v13, %v3012_v63 }
 0x362   : > { %v3248_v32 = vmax.f32 %v3216_v51, 0.0  ;;  %v3217_v38 = vadd.f32 %v9806_v15, %v3178_v52 }
 0x363   : > { %v3246_v40 = vmax.f32 %v3214_v24, 0.0  ;;  %v3215_v46 = vadd.f32 %v9806_v15, %v3176_v30 }
 0x364   : > { %3335 = vst [vmem:[#allocation3 + $0x31] sm:$0xff] %v3248_v32  ;;  %v3249_v48 = vmax.f32 %v3217_v38, 0.0 }
 0x365   : > { %3333 = vst [vmem:[#allocation3 + $0x19] sm:$0xff] %v3246_v40  ;;  %v3247_v55 = vmax.f32 %v3215_v46, 0.0  ;;  %v7850_v0 = vpop.f32.mrb[4].mxu0 }
 0x366   : > { %3336 = vst [vmem:[#allocation3 + $0x39] sm:$0xff] %v3249_v48  ;;  %v3181_v60 = vmul.f32 %v7850_v0, %v9801_v13  ;;  %v3025_v61 = vpop.f32.mrb[5].mxu0  ;;  %v3463_v5 = vpack.c.bf16 %v3249_v48, %v3248_v32 }
 0x367   : > { %3334 = vst [vmem:[#allocation3 + $0x21] sm:$0xff] %v3247_v55  ;;  %v3179_v19 = vmul.f32 %v9801_v13, %v3025_v61  ;;  %v7851_v4 = vpop.f32.mrb[6].mxu0  ;;  %v3462_v20 = vpack.c.bf16 %v3247_v55, %v3246_v40  ;;  %v8994_v40 = vld [vmem:[#allocation9 + $0x30] sm:$0xff]  }
 0x368   : > { %v3220_v21 = vadd.f32 %v9806_v15, %v3181_v60  ;;  %v3182_v28 = vmul.f32 %v7851_v4, %v9801_v13  ;;  %v3028_v33 = vpop.f32.mrb[7].mxu0 }
 0x369   : > { %v3218_v39 = vadd.f32 %v9806_v15, %v3179_v19  ;;  %v3180_v43 = vmul.f32 %v9801_v13, %v3028_v33  ;;  %7893 = vmatmul.mubr.bf16.vlgmr.msra.gmra.mrb[0].mxu1 %v3462_v20  ;;  %v8995_v20 = vld [vmem:[#allocation9 + $0x38] sm:$0xff]  }
 0x36a   : > { %v3252_v44 = vmax.f32 %v3220_v21, 0.0  ;;  %v3221_v45 = vadd.f32 %v9806_v15, %v3182_v28  ;;  %7896 = vmatprep.mubr.bf16.mxu1 %v3463_v5  ;;  %7925 = vmatpush3.bf16.msra.mxu1 %v8988_v12 }
 0x36b   : > { %v3250_v47 = vmax.f32 %v3218_v39, 0.0  ;;  %v3219_v49 = vadd.f32 %v9806_v15, %v3180_v43  ;;  %7926 = vmatprep.subr.bf16.mxu1 %v8989_v9 }
 0x36c   : > { %3339 = vst [vmem:[#allocation3 + $0x61] sm:$0xff] %v3252_v44  ;;  %v3253_v53 = vmax.f32 %v3221_v45, 0.0 }
 0x36d   : > { %3337 = vst [vmem:[#allocation3 + $0x49] sm:$0xff] %v3250_v47  ;;  %v3251_v56 = vmax.f32 %v3219_v49, 0.0  ;;  %v7854_v22 = vpop.f32.mrb[8].mxu0  ;;  %v9848_v49 = vld [vmem:[#allocation9 + $0x80] sm:$0xff]  }
 0x36e   : > { %3340 = vst [vmem:[#allocation3 + $0x69] sm:$0xff] %v3253_v53  ;;  %v3185_v57 = vmul.f32 %v7854_v22, %v9801_v13  ;;  %v3041_v58 = vpop.f32.mrb[9].mxu0  ;;  %v3465_v59 = vpack.c.bf16 %v3253_v53, %v3252_v44  ;;  %7927 = vmatpush3.bf16.msra.mxu1 %v8989_v9 }
 0x36f   : > { %3338 = vst [vmem:[#allocation3 + $0x51] sm:$0xff] %v3251_v56  ;;  %v3183_v62 = vmul.f32 %v9801_v13, %v3041_v58  ;;  %v7855_v1 = vpop.f32.mrb[10].mxu0  ;;  %v3464_v3 = vpack.c.bf16 %v3251_v56, %v3250_v47  ;;  %7928 = vmatprep.subr.bf16.mxu1 %v8990_v50 }
 0x370   : > { %v3224_v8 = vadd.f32 %v9806_v15, %v3185_v57  ;;  %v3186_v17 = vmul.f32 %v7855_v1, %v9801_v13  ;;  %v3044_v18 = vpop.f32.mrb[11].mxu0 }
 0x371   : > { %v3222_v23 = vadd.f32 %v9806_v15, %v3183_v62  ;;  %v3184_v25 = vmul.f32 %v9801_v13, %v3044_v18  ;;  %7897 = vmatmul.mubr.bf16.gmra.mrb[4].mxu1 %v3464_v3 }
 0x372   : > { %v3256_v26 = vmax.f32 %v3224_v8, 0.0  ;;  %v3225_v27 = vadd.f32 %v9806_v15, %v3186_v17  ;;  %7900 = vmatprep.mubr.bf16.mxu1 %v3465_v59  ;;  %7929 = vmatpush3.bf16.msra.mxu1 %v8990_v50 }
 0x373   : > { %v3254_v34 = vmax.f32 %v3222_v23, 0.0  ;;  %v3223_v35 = vadd.f32 %v9806_v15, %v3184_v25  ;;  %7930 = vmatprep.subr.bf16.mxu1 %v8991_v6 }
 0x374   : > { %3343 = vst [vmem:[#allocation3 + $0x91] sm:$0xff] %v3256_v26  ;;  %v3257_v37 = vmax.f32 %v3225_v27, 0.0 }
 0x375   : > { %3341 = vst [vmem:[#allocation3 + $0x79] sm:$0xff] %v3254_v34  ;;  %v3255_v2 = vmax.f32 %v3223_v35, 0.0  ;;  %v7858_v7 = vpop.f32.mrb[12].mxu0 }
 0x376   : > { %3344 = vst [vmem:[#allocation3 + $0x99] sm:$0xff] %v3257_v37  ;;  %v3189_v10 = vmul.f32 %v7858_v7, %v9801_v13  ;;  %v3057_v41 = vpop.f32.mrb[13].mxu0  ;;  %v3467_v11 = vpack.c.bf16 %v3257_v37, %v3256_v26  ;;  %7931 = vmatpush3.bf16.msra.mxu1 %v8991_v6 }
 0x377   : > { %3342 = vst [vmem:[#allocation3 + $0x81] sm:$0xff] %v3255_v2  ;;  %v3187_v12 = vmul.f32 %v9801_v13, %v3057_v41  ;;  %v7859_v14 = vpop.f32.mrb[14].mxu0  ;;  %v3466_v16 = vpack.c.bf16 %v3255_v2, %v3254_v34  ;;  %7932 = vmatprep.subr.bf16.mxu1 %v8992_v36 }
 0x378   : > { %v3228_v31 = vadd.f32 %v9806_v15, %v3189_v10  ;;  %v3190_v42 = vmul.f32 %v7859_v14, %v9801_v13  ;;  %v3060_v51 = vpop.f32.mrb[15].mxu0 }
 0x379   : > { %v3226_v52 = vadd.f32 %v9806_v15, %v3187_v12  ;;  %v3188_v63 = vmul.f32 %v9801_v13, %v3060_v51  ;;  %7901 = vmatmul.mubr.bf16.gmra.mrb[8].mxu1 %v3466_v16 }
 0x37a   : > { %v3260_v24 = vmax.f32 %v3228_v31, 0.0  ;;  %v3229_v30 = vadd.f32 %v9806_v15, %v3190_v42  ;;  %7904 = vmatprep.mubr.bf16.mxu1 %v3467_v11  ;;  %7933 = vmatpush3.bf16.msra.mxu1 %v8992_v36 }
 0x37b   : > { %v3258_v32 = vmax.f32 %v3226_v52, 0.0  ;;  %v3227_v38 = vadd.f32 %v9806_v15, %v3188_v63  ;;  %7934 = vmatprep.subr.bf16.mxu1 %v8993_v29 }
 0x37c   : > { %3347 = vst [vmem:[#allocation3 + $0xc1] sm:$0xff] %v3260_v24  ;;  %v3261_v46 = vmax.f32 %v3229_v30, 0.0 }
 0x37d   : > { %3345 = vst [vmem:[#allocation3 + $0xa9] sm:$0xff] %v3258_v32  ;;  %v3259_v48 = vmax.f32 %v3227_v38, 0.0  ;;  %v7862_v55 = vpop.f32.mrb[16].mxu0 }
 0x37e   : > { %3348 = vst [vmem:[#allocation3 + $0xc9] sm:$0xff] %v3261_v46  ;;  %v3193_v0 = vmul.f32 %v7862_v55, %v9801_v13  ;;  %v3073_v60 = vpop.f32.mrb[17].mxu0  ;;  %v3469_v61 = vpack.c.bf16 %v3261_v46, %v3260_v24  ;;  %7935 = vmatpush3.bf16.msra.mxu1 %v8993_v29 }
 0x37f   : > { %3346 = vst [vmem:[#allocation3 + $0xb1] sm:$0xff] %v3259_v48  ;;  %v3191_v5 = vmul.f32 %v9801_v13, %v3073_v60  ;;  %v7863_v19 = vpop.f32.mrb[18].mxu0  ;;  %v3468_v4 = vpack.c.bf16 %v3259_v48, %v3258_v32  ;;  %7936 = vmatprep.subr.bf16.mxu1 %v8994_v40 }
 0x380   : > { %v3232_v9 = vadd.f32 %v9806_v15, %v3193_v0  ;;  %v3194_v21 = vmul.f32 %v7863_v19, %v9801_v13  ;;  %v3076_v28 = vpop.f32.mrb[19].mxu0 }
 0x381   : > { %v3230_v33 = vadd.f32 %v9806_v15, %v3191_v5  ;;  %v3192_v39 = vmul.f32 %v9801_v13, %v3076_v28  ;;  %7905 = vmatmul.mubr.bf16.gmra.mrb[12].mxu1 %v3468_v4 }
 0x382   : > { %v3264_v43 = vmax.f32 %v3232_v9, 0.0  ;;  %v3233_v44 = vadd.f32 %v9806_v15, %v3194_v21  ;;  %7908 = vmatprep.mubr.bf16.mxu1 %v3469_v61  ;;  %7937 = vmatpush3.bf16.msra.mxu1 %v8994_v40 }
 0x383   : > { %v3262_v45 = vmax.f32 %v3230_v33, 0.0  ;;  %v3231_v47 = vadd.f32 %v9806_v15, %v3192_v39  ;;  %7938 = vmatprep.subr.bf16.mxu1 %v8995_v20 }
 0x384   : > { %3351 = vst [vmem:[#allocation3 + $0xf1] sm:$0xff] %v3264_v43  ;;  %v9850_v50 = vmax.f32 %v3233_v44, 0.0 }
 0x385   : > { %3349 = vst [vmem:[#allocation3 + $0xd9] sm:$0xff] %v3262_v45  ;;  %v3263_v53 = vmax.f32 %v3231_v47, 0.0  ;;  %v7866_v56 = vpop.f32.mrb[20].mxu0  ;;  %v3367_v47 = vld [vmem:[#allocation3 + $0x18] sm:$0xff] }
 0x386   : > { %3352 = vst [vmem:[#allocation3 + $0xf9] sm:$0xff] %v9850_v50  ;;  %v3197_v22 = vmul.f32 %v7866_v56, %v9801_v13  ;;  %v3089_v57 = vpop.f32.mrb[21].mxu0  ;;  %v3471_v58 = vpack.c.bf16 %v9850_v50, %v3264_v43  ;;  %7939 = vmatpush3.bf16.msra.mxu1 %v8995_v20  ;;  %v8997_v56 = vld [vmem:[#allocation9 + $0x88] sm:$0xff]  }
 0x387   : > { %3350 = vst [vmem:[#allocation3 + $0xe1] sm:$0xff] %v3263_v53  ;;  %v3195_v59 = vmul.f32 %v9801_v13, %v3089_v57  ;;  %v7867_v62 = vpop.f32.mrb[22].mxu0  ;;  %v9856_v1 = vpack.c.bf16 %v3263_v53, %v3262_v45  ;;  %7972 = vmatprep.subr.bf16.mxu1 %v9848_v49  ;;  %v3370_v45 = vld [vmem:[#allocation3 + $0x38] sm:$0xff]  ;;  %v8998_v57 = vld [vmem:[#allocation9 + $0x90] sm:$0xff]  }
 0x388   : > { %v3236_v3 = vadd.f32 %v9806_v15, %v3197_v22  ;;  %v3198_v6 = vmul.f32 %v7867_v62, %v9801_v13  ;;  %v3092_v8 = vpop.f32.mrb[23].mxu0 }
 0x389   : > { %v3234_v17 = vadd.f32 %v9806_v15, %v3195_v59  ;;  %v3196_v18 = vmul.f32 %v9801_v13, %v3092_v8  ;;  %7909 = vmatmul.mubr.bf16.gmra.mrb[16].mxu1 %v9856_v1  ;;  %v3374_v59 = vld [vmem:[#allocation3 + $0x68] sm:$0xff] }
 0x38a   : > { %v3268_v23 = vmax.f32 %v3236_v3, 0.0  ;;  %v3237_v25 = vadd.f32 %v9806_v15, %v3198_v6  ;;  %7912 = vmatprep.mubr.bf16.mxu1 %v3471_v58  ;;  %v3372_v58 = vld [vmem:[#allocation3 + $0x50] sm:$0xff]  ;;  %v3373_v3 = vld [vmem:[#allocation3 + $0x60] sm:$0xff]  ;;  %v8999_v6 = vld [vmem:[#allocation9 + $0x98] sm:$0xff]  }
 0x38b   : > { %v3266_v26 = vmax.f32 %v3234_v17, 0.0  ;;  %v3235_v27 = vadd.f32 %v9806_v15, %v3196_v18  ;;  %v9909_v8 = vpack.c.bf16 %v3374_v59, %v3373_v3  ;;  %v3376_v17 = vld [vmem:[#allocation3 + $0x80] sm:$0xff]  ;;  %v3378_v18 = vld [vmem:[#allocation3 + $0x98] sm:$0xff] }
 0x38c   : > { %3355 = vst [vmem:[#allocation3 + $0x121] sm:$0xff] %v3268_v23  ;;  %v3269_v34 = vmax.f32 %v3237_v25, 0.0  ;;  %v9006_v59 = vld [vmem:[#allocation9 + $0xd0] sm:$0xff]   ;;  %v3919_v3 = vld [vmem:[#allocation3 + $0x52] sm:$0xff] }
 0x38d   : > { %3353 = vst [vmem:[#allocation3 + $0x109] sm:$0xff] %v3266_v26  ;;  %v3267_v35 = vmax.f32 %v3235_v27, 0.0  ;;  %v7870_v36 = vpop.f32.mrb[24].mxu0  ;;  %v9001_v27 = vld [vmem:[#allocation9 + $0xa8] sm:$0xff]  }
 0x38e   : > { %3356 = vst [vmem:[#allocation3 + $0x129] sm:$0xff] %v3269_v34  ;;  %v3201_v37 = vmul.f32 %v7870_v36, %v9801_v13  ;;  %v3105_v2 = vpop.f32.mrb[25].mxu0  ;;  %v9867_v7 = vpack.c.bf16 %v3269_v34, %v3268_v23  ;;  %v3375_v23 = vld [vmem:[#allocation3 + $0x78] sm:$0xff]  ;;  %v3380_v36 = vld [vmem:[#allocation3 + $0xb0] sm:$0xff] }
 0x38f   : > { %3354 = vst [vmem:[#allocation3 + $0x111] sm:$0xff] %v3267_v35  ;;  %v3199_v10 = vmul.f32 %v9801_v13, %v3105_v2  ;;  %v7871_v41 = vpop.f32.mrb[26].mxu0  ;;  %v9870_v11 = vpack.c.bf16 %v3267_v35, %v3266_v26  ;;  %v9913_v25 = vpack.c.bf16 %v3376_v17, %v3375_v23  ;;  %v3377_v26 = vld [vmem:[#allocation3 + $0x90] sm:$0xff]  ;;  %v9002_v35 = vld [vmem:[#allocation9 + $0xb0] sm:$0xff]   ;;  %v3379_v2 = vld [vmem:[#allocation3 + $0xa8] sm:$0xff] }
 0x390   : > { %v3240_v12 = vadd.f32 %v9806_v15, %v3201_v37  ;;  %v3202_v14 = vmul.f32 %v7871_v41, %v9801_v13  ;;  %v3108_v16 = vpop.f32.mrb[27].mxu0  ;;  %v9915_v34 = vpack.c.bf16 %v3378_v18, %v3377_v26  ;;  %v3382_v37 = vld [vmem:[#allocation3 + $0xc8] sm:$0xff]  ;;  %v3381_v41 = vld [vmem:[#allocation3 + $0xc0] sm:$0xff]  ;;  %v9008_v26 = vld [vmem:[#allocation9 + $0xe0] sm:$0xff]  }
 0x391   : > { %v3238_v29 = vadd.f32 %v9806_v15, %v3199_v10  ;;  %v3200_v31 = vmul.f32 %v9801_v13, %v3108_v16  ;;  %7913 = vmatmul.mubr.bf16.gmra.mrb[20].mxu1 %v9870_v11  ;;  %v9919_v10 = vpack.c.bf16 %v3380_v36, %v3379_v2  ;;  %v9004_v16 = vld [vmem:[#allocation9 + $0xc0] sm:$0xff]   ;;  %v9007_v18 = vld [vmem:[#allocation9 + $0xd8] sm:$0xff]  }
 0x392   : > { %v3272_v42 = vmax.f32 %v3240_v12, 0.0  ;;  %v3241_v51 = vadd.f32 %v9806_v15, %v3202_v14  ;;  %7916 = vmatprep.mubr.bf16.mxu1 %v9867_v7  ;;  %v9003_v12 = vld [vmem:[#allocation9 + $0xb8] sm:$0xff]   ;;  %v9921_v14 = vpack.c.bf16 %v3382_v37, %v3381_v41  ;;  %v3924_v36 = vld [vmem:[#allocation3 + $0x92] sm:$0xff]  ;;  %v3925_v37 = vld [vmem:[#allocation3 + $0x9a] sm:$0xff] }
 0x393   : > { %v3270_v52 = vmax.f32 %v3238_v29, 0.0  ;;  %v3239_v63 = vadd.f32 %v9806_v15, %v3200_v31  ;;  %v3384_v29 = vld [vmem:[#allocation3 + $0xe0] sm:$0xff]  ;;  %v3386_v31 = vld [vmem:[#allocation3 + $0xf8] sm:$0xff] }
 0x394   : > { %3359 = vst [vmem:[#allocation3 + $0x151] sm:$0xff] %v3272_v42  ;;  %v3273_v24 = vmax.f32 %v3241_v51, 0.0  ;;  %v9009_v41 = vld [vmem:[#allocation9 + $0xe8] sm:$0xff]  }
 0x395   : > { %3357 = vst [vmem:[#allocation3 + $0x139] sm:$0xff] %v3270_v52  ;;  %v3271_v30 = vmax.f32 %v3239_v63, 0.0  ;;  %v7874_v32 = vpop.f32.mrb[28].mxu0 }
 0x396   : > { %3360 = vst [vmem:[#allocation3 + $0x159] sm:$0xff] %v3273_v24  ;;  %v3205_v38 = vmul.f32 %v7874_v32, %v9801_v13  ;;  %v3121_v40 = vpop.f32.mrb[29].mxu0  ;;  %v9881_v46 = vpack.c.bf16 %v3273_v24, %v3272_v42  ;;  %v3383_v42 = vld [vmem:[#allocation3 + $0xd8] sm:$0xff]  ;;  %v3388_v24 = vld [vmem:[#allocation3 + $0x110] sm:$0xff]  ;;  %v3387_v32 = vld [vmem:[#allocation3 + $0x108] sm:$0xff] }
 0x397   : > { %3358 = vst [vmem:[#allocation3 + $0x141] sm:$0xff] %v3271_v30  ;;  %v3203_v48 = vmul.f32 %v9801_v13, %v3121_v40  ;;  %v7875_v55 = vpop.f32.mrb[30].mxu0  ;;  %v9884_v0 = vpack.c.bf16 %v3271_v30, %v3270_v52  ;;  %v9925_v51 = vpack.c.bf16 %v3384_v29, %v3383_v42  ;;  %v3385_v52 = vld [vmem:[#allocation3 + $0xf0] sm:$0xff]  ;;  %v3390_v30 = vld [vmem:[#allocation3 + $0x128] sm:$0xff]  ;;  %v3389_v40 = vld [vmem:[#allocation3 + $0x120] sm:$0xff] }
 0x398   : > { %v3244_v60 = vadd.f32 %v9806_v15, %v3205_v38  ;;  %v3206_v61 = vmul.f32 %v7875_v55, %v9801_v13  ;;  %v3124_v5 = vpop.f32.mrb[31].mxu0  ;;  %v9927_v63 = vpack.c.bf16 %v3386_v31, %v3385_v52  ;;  %v9931_v38 = vpack.c.bf16 %v3388_v24, %v3387_v32  ;;  %v3926_v29 = vld [vmem:[#allocation3 + $0xaa] sm:$0xff]  ;;  %v3927_v31 = vld [vmem:[#allocation3 + $0xb2] sm:$0xff]  ;;  %v3928_v42 = vld [vmem:[#allocation3 + $0xc2] sm:$0xff] }
 0x399   : > { %v3242_v19 = vadd.f32 %v9806_v15, %v3203_v48  ;;  %v3204_v4 = vmul.f32 %v9801_v13, %v3124_v5  ;;  %7917 = vmatmul.mubr.bf16.gmra.mrb[24].mxu1 %v9884_v0  ;;  %v3368_v13 = vld [vmem:[#allocation3 + $0x20] sm:$0xff]  ;;  %v9933_v48 = vpack.c.bf16 %v3390_v30, %v3389_v40  ;;  %v3929_v52 = vld [vmem:[#allocation3 + $0xca] sm:$0xff]  ;;  %v9964_v24 = vpack.c.bf16 %v3927_v31, %v3926_v29 }
 0x39a   : > { %v3276_v20 = vmax.f32 %v3244_v60, 0.0  ;;  %v3245_v9 = vadd.f32 %v9806_v15, %v3206_v61  ;;  %7920 = vmatprep.mubr.bf16.mxu1 %v9881_v46  ;;  %v9900_v53 = vpack.c.bf16 %v3368_v13, %v3367_v47  ;;  %v3914_v13 = vld [vmem:[#allocation3 + $0x1a] sm:$0xff]  ;;  %v3916_v47 = vld [vmem:[#allocation3 + $0x32] sm:$0xff]  ;;  %v9011_v30 = vld [vmem:[#allocation9 + $0xf8] sm:$0xff]   ;;  %v9966_v32 = vpack.c.bf16 %v3929_v52, %v3928_v42 }
 0x39b   : > { %v3274_v21 = vmax.f32 %v3242_v19, 0.0  ;;  %v3243_v28 = vadd.f32 %v9806_v15, %v3204_v4  ;;  %v3369_v15 = vld [vmem:[#allocation3 + $0x30] sm:$0xff]  ;;  %v4525_v42 = vld [vmem:[#allocation3 + $0x21] sm:$0xff] }
 0x39c   : > { %3363 = vst [vmem:[#allocation3 + $0x181] sm:$0xff] %v3276_v20  ;;  %v3277_v33 = vmax.f32 %v3245_v9, 0.0  ;;  %v9902_v22 = vpack.c.bf16 %v3370_v45, %v3369_v15  ;;  %v3391_v61 = vld [vmem:[#allocation3 + $0x138] sm:$0xff]  ;;  %v3393_v19 = vld [vmem:[#allocation3 + $0x150] sm:$0xff]  ;;  %v3915_v45 = vld [vmem:[#allocation3 + $0x22] sm:$0xff] }
 0x39d   : > { %3361 = vst [vmem:[#allocation3 + $0x169] sm:$0xff] %v3274_v21  ;;  %v3275_v39 = vmax.f32 %v3243_v28, 0.0  ;;  %v3394_v60 = vld [vmem:[#allocation3 + $0x158] sm:$0xff]  ;;  %v3913_v9 = vld [vmem:[#allocation3 + $0xa] sm:$0xff] }
 0x39e   : > { %3364 = vst [vmem:[#allocation3 + $0x189] sm:$0xff] %v3277_v33  ;;  %v9894_v43 = vpack.c.bf16 %v3277_v33, %v3276_v20  ;;  %v3392_v55 = vld [vmem:[#allocation3 + $0x140] sm:$0xff]  ;;  %v9939_v4 = vpack.c.bf16 %v3394_v60, %v3393_v19  ;;  %v9012_v40 = vld [vmem:[#allocation9 + $0x100] sm:$0xff]  }
 0x39f   : > { %3362 = vst [vmem:[#allocation3 + $0x171] sm:$0xff] %v3275_v39  ;;  %v9896_v44 = vpack.c.bf16 %v3275_v39, %v3274_v21  ;;  %v9937_v5 = vpack.c.bf16 %v3392_v55, %v3391_v61  ;;  %v3912_v20 = vld [vmem:[#allocation3 + $0x2] sm:$0xff]  ;;  %v3917_v15 = vld [vmem:[#allocation3 + $0x3a] sm:$0xff]  ;;  %v3932_v61 = vld [vmem:[#allocation3 + $0xf2] sm:$0xff] }
 0x3a0   : > { %v3944_v33 = vpack.c.bf16 %v3913_v9, %v3912_v20  ;;  %v3930_v55 = vld [vmem:[#allocation3 + $0xda] sm:$0xff]  ;;  %v3931_v60 = vld [vmem:[#allocation3 + $0xe2] sm:$0xff]  ;;  %v9020_v29 = vld [vmem:[#allocation9 + $0x140] sm:$0xff]  }
 0x3a1   : > { %7921 = vmatmul.mubr.bf16.gmra.mrb[28].mxu1 %v9896_v44  ;;  %v3933_v19 = vld [vmem:[#allocation3 + $0xfa] sm:$0xff]  ;;  %v9970_v20 = vpack.c.bf16 %v3931_v60, %v3930_v55 }
 0x3a2   : > { %7940 = vmatprep.mubr.bf16.mxu1 %v9793_v54  ;;  %v3371_v54 = vld [vmem:[#allocation3 + $0x48] sm:$0xff]  ;;  %v9972_v9 = vpack.c.bf16 %v3933_v19, %v3932_v61  ;;  %v4527_v60 = vld [vmem:[#allocation3 + $0x39] sm:$0xff]  ;;  %v4529_v61 = vld [vmem:[#allocation3 + $0x51] sm:$0xff] }
 0x3a3   : > { %v9907_v62 = vpack.c.bf16 %v3372_v58, %v3371_v54  ;;  %v9948_v58 = vpack.c.bf16 %v3917_v15, %v3916_v47  ;;  %v3918_v54 = vld [vmem:[#allocation3 + $0x4a] sm:$0xff]  ;;  %v3938_v15 = vld [vmem:[#allocation3 + $0x13a] sm:$0xff] }
 0x3a4   : > { %v3395_v28 = vld [vmem:[#allocation3 + $0x168] sm:$0xff]  ;;  %v9952_v17 = vpack.c.bf16 %v3919_v3, %v3918_v54  ;;  %v3941_v54 = vld [vmem:[#allocation3 + $0x15a] sm:$0xff]  ;;  %v4526_v19 = vld [vmem:[#allocation3 + $0x31] sm:$0xff] }
 0x3a5   : > { %v4249_v31 = vld [vmem:[#allocation3 + $0x188] sm:$0xff]  ;;  %v4248_v52 = vld [vmem:[#allocation3 + $0x180] sm:$0xff] }
 0x3a6   : > { %v3396_v21 = vld [vmem:[#allocation3 + $0x170] sm:$0xff] }
 0x3a7   : > { %v9943_v39 = vpack.c.bf16 %v3396_v21, %v3395_v28  ;;  %v3934_v21 = vld [vmem:[#allocation3 + $0x10a] sm:$0xff]  ;;  %v3935_v28 = vld [vmem:[#allocation3 + $0x112] sm:$0xff] }
 0x3a9   : > { %7941 = vmatmul.mubr.bf16.vlgmr.msra.gmra.mrb[0].mxu1 %v9900_v53 }
 0x3aa   : > { %7944 = vmatprep.mubr.bf16.mxu1 %v9902_v22  ;;  %7973 = vmatpush3.bf16.msra.mxu1 %v9848_v49  ;;  %v9000_v49 = vld [vmem:[#allocation9 + $0xa0] sm:$0xff]  }
 0x3ab   : > { %7974 = vmatprep.subr.bf16.mxu1 %v8997_v56 }
 0x3ae   : > { %7975 = vmatpush3.bf16.msra.mxu1 %v8997_v56  ;;  %v9946_v56 = vpack.c.bf16 %v3915_v45, %v3914_v13  ;;  %v3937_v13 = vld [vmem:[#allocation3 + $0x12a] sm:$0xff]  ;;  %v9976_v45 = vpack.c.bf16 %v3935_v28, %v3934_v21  ;;  %v10009_v21 = vpack.c.bf16 %v4527_v60, %v4526_v19 }
 0x3af   : > { %7976 = vmatprep.subr.bf16.mxu1 %v8998_v57  ;;  %v4528_v28 = vld [vmem:[#allocation3 + $0x49] sm:$0xff] }
 0x3b0   : > { %v9028_v19 = vld [vmem:[#allocation9 + $0x180] sm:$0xff]  }
 0x3b1   : > { %7945 = vmatmul.mubr.bf16.gmra.mrb[4].mxu1 %v9907_v62 }
 0x3b2   : > { %7948 = vmatprep.mubr.bf16.mxu1 %v9909_v8  ;;  %7977 = vmatpush3.bf16.msra.mxu1 %v8998_v57  ;;  %v9005_v57 = vld [vmem:[#allocation9 + $0xc8] sm:$0xff]  }
 0x3b3   : > { %7978 = vmatprep.subr.bf16.mxu1 %v8999_v6 }
 0x3b6   : > { %7979 = vmatpush3.bf16.msra.mxu1 %v8999_v6  ;;  %v3920_v6 = vld [vmem:[#allocation3 + $0x62] sm:$0xff] }
 0x3b7   : > { %7980 = vmatprep.subr.bf16.mxu1 %v9000_v49 }
 0x3b9   : > { %7949 = vmatmul.mubr.bf16.gmra.mrb[8].mxu1 %v9913_v25 }
 0x3ba   : > { %7952 = vmatprep.mubr.bf16.mxu1 %v9915_v34  ;;  %7981 = vmatpush3.bf16.msra.mxu1 %v9000_v49  ;;  %v3921_v49 = vld [vmem:[#allocation3 + $0x6a] sm:$0xff] }
 0x3bb   : > { %7982 = vmatprep.subr.bf16.mxu1 %v9001_v27  ;;  %v9954_v23 = vpack.c.bf16 %v3921_v49, %v3920_v6  ;;  %v3942_v49 = vld [vmem:[#allocation3 + $0x16a] sm:$0xff] }
 0x3be   : > { %7983 = vmatpush3.bf16.msra.mxu1 %v9001_v27  ;;  %v3922_v27 = vld [vmem:[#allocation3 + $0x7a] sm:$0xff] }
 0x3bf   : > { %7984 = vmatprep.subr.bf16.mxu1 %v9002_v35 }
 0x3c1   : > { %7953 = vmatmul.mubr.bf16.gmra.mrb[12].mxu1 %v9919_v10 }
 0x3c2   : > { %7956 = vmatprep.mubr.bf16.mxu1 %v9921_v14  ;;  %7985 = vmatpush3.bf16.msra.mxu1 %v9002_v35  ;;  %v3923_v35 = vld [vmem:[#allocation3 + $0x82] sm:$0xff] }
 0x3c3   : > { %7986 = vmatprep.subr.bf16.mxu1 %v9003_v12  ;;  %v9958_v2 = vpack.c.bf16 %v3923_v35, %v3922_v27  ;;  %v9013_v27 = vld [vmem:[#allocation9 + $0x108] sm:$0xff]   ;;  %v9014_v35 = vld [vmem:[#allocation9 + $0x110] sm:$0xff]  }
 0x3c6   : > { %7987 = vmatpush3.bf16.msra.mxu1 %v9003_v12  ;;  %v9960_v12 = vpack.c.bf16 %v3925_v37, %v3924_v36  ;;  %v9015_v36 = vld [vmem:[#allocation9 + $0x118] sm:$0xff]   ;;  %v9016_v37 = vld [vmem:[#allocation9 + $0x120] sm:$0xff]  }
 0x3c7   : > { %8020 = vmatprep.subr.bf16.mxu1 %v9004_v16 }
 0x3c9   : > { %7957 = vmatmul.mubr.bf16.gmra.mrb[16].mxu1 %v9925_v51 }
 0x3ca   : > { %7960 = vmatprep.mubr.bf16.mxu1 %v9927_v63 }
 0x3d1   : > { %7961 = vmatmul.mubr.bf16.gmra.mrb[20].mxu1 %v9931_v38 }
 0x3d2   : > { %7964 = vmatprep.mubr.bf16.mxu1 %v9933_v48 }
 0x3d9   : > { %7965 = vmatmul.mubr.bf16.gmra.mrb[24].mxu1 %v9937_v5 }
 0x3da   : > { %7968 = vmatprep.mubr.bf16.mxu1 %v9939_v4 }
 0x3e1   : > { %7969 = vmatmul.mubr.bf16.gmra.mrb[28].mxu1 %v9943_v39 }
 0x3e2   : > { %7988 = vmatprep.mubr.bf16.mxu1 %v3944_v33  ;;  %v3936_v33 = vld [vmem:[#allocation3 + $0x122] sm:$0xff] }
 0x3e3   : > { %v9978_v47 = vpack.c.bf16 %v3937_v13, %v3936_v33  ;;  %v9021_v33 = vld [vmem:[#allocation9 + $0x148] sm:$0xff]   ;;  %v10011_v13 = vpack.c.bf16 %v4529_v61, %v4528_v28  ;;  %v9027_v61 = vld [vmem:[#allocation9 + $0x178] sm:$0xff]  }
 0x3e4   : > { %v10031_v28 = vld [vmem:[#allocation3 + $0xf1] sm:$0xff] }
 0x3e9   : > { %7989 = vmatmul.mubr.bf16.vlgmr.msra.gmra.mrb[0].mxu1 %v9946_v56 }
 0x3ea   : > { %7992 = vmatprep.mubr.bf16.mxu1 %v9948_v58  ;;  %8021 = vmatpush3.bf16.msra.mxu1 %v9004_v16  ;;  %v9010_v16 = vld [vmem:[#allocation9 + $0xf0] sm:$0xff]  }
 0x3eb   : > { %8022 = vmatprep.subr.bf16.mxu1 %v9005_v57 }
 0x3ee   : > { %8023 = vmatpush3.bf16.msra.mxu1 %v9005_v57  ;;  %v3939_v57 = vld [vmem:[#allocation3 + $0x142] sm:$0xff] }
 0x3ef   : > { %8024 = vmatprep.subr.bf16.mxu1 %v9006_v59  ;;  %v9982_v3 = vpack.c.bf16 %v3939_v57, %v3938_v15  ;;  %v9022_v15 = vld [vmem:[#allocation9 + $0x150] sm:$0xff]   ;;  %v4531_v57 = vld [vmem:[#allocation3 + $0x69] sm:$0xff] }
 0x3f1   : > { %7993 = vmatmul.mubr.bf16.gmra.mrb[4].mxu1 %v9952_v17 }
 0x3f2   : > { %7996 = vmatprep.mubr.bf16.mxu1 %v9954_v23  ;;  %8025 = vmatpush3.bf16.msra.mxu1 %v9006_v59  ;;  %v3940_v59 = vld [vmem:[#allocation3 + $0x152] sm:$0xff] }
 0x3f3   : > { %8026 = vmatprep.subr.bf16.mxu1 %v9007_v18  ;;  %v9984_v6 = vpack.c.bf16 %v3941_v54, %v3940_v59  ;;  %v4533_v59 = vld [vmem:[#allocation3 + $0x81] sm:$0xff] }
 0x3f4   : > { %v4530_v54 = vld [vmem:[#allocation3 + $0x61] sm:$0xff] }
 0x3f6   : > { %8027 = vmatpush3.bf16.msra.mxu1 %v9007_v18  ;;  %v3943_v18 = vld [vmem:[#allocation3 + $0x172] sm:$0xff] }
 0x3f7   : > { %8028 = vmatprep.subr.bf16.mxu1 %v9008_v26 }
 0x3f9   : > { %7997 = vmatmul.mubr.bf16.gmra.mrb[8].mxu1 %v9958_v2 }
 0x3fa   : > { %8000 = vmatprep.mubr.bf16.mxu1 %v9960_v12  ;;  %8029 = vmatpush3.bf16.msra.mxu1 %v9008_v26  ;;  %v9988_v26 = vpack.c.bf16 %v3943_v18, %v3942_v49  ;;  %v10015_v49 = vpack.c.bf16 %v4531_v57, %v4530_v54  ;;  %v4532_v18 = vld [vmem:[#allocation3 + $0x79] sm:$0xff]  ;;  %v5467_v54 = vld [vmem:[#allocation3 + $0x151] sm:$0xff] }
 0x3fb   : > { %8030 = vmatprep.subr.bf16.mxu1 %v9009_v41  ;;  %v5465_v57 = vld [vmem:[#allocation3 + $0x139] sm:$0xff] }
 0x3fe   : > { %8031 = vmatpush3.bf16.msra.mxu1 %v9009_v41  ;;  %v9018_v41 = vld [vmem:[#allocation9 + $0x130] sm:$0xff]  }
 0x3ff   : > { %8032 = vmatprep.subr.bf16.mxu1 %v9010_v16 }
 0x401   : > { %8001 = vmatmul.mubr.bf16.gmra.mrb[12].mxu1 %v9964_v24 }
 0x402   : > { %8004 = vmatprep.mubr.bf16.mxu1 %v9966_v32  ;;  %8033 = vmatpush3.bf16.msra.mxu1 %v9010_v16  ;;  %v9019_v16 = vld [vmem:[#allocation9 + $0x138] sm:$0xff]  }
 0x403   : > { %8034 = vmatprep.subr.bf16.mxu1 %v9011_v30 }
 0x406   : > { %8035 = vmatpush3.bf16.msra.mxu1 %v9011_v30  ;;  %v10006_v30 = vpack.c.bf16 %v4249_v31, %v4248_v52  ;;  %v9025_v31 = vld [vmem:[#allocation9 + $0x168] sm:$0xff]   ;;  %v9026_v52 = vld [vmem:[#allocation9 + $0x170] sm:$0xff]  }
 0x407   : > { %8068 = vmatprep.subr.bf16.mxu1 %v9012_v40 }
 0x409   : > { %8005 = vmatmul.mubr.bf16.gmra.mrb[16].mxu1 %v9970_v20 }
 0x40a   : > { %8008 = vmatprep.mubr.bf16.mxu1 %v9972_v9 }
 0x411   : > { %8009 = vmatmul.mubr.bf16.gmra.mrb[20].mxu1 %v9976_v45 }
 0x412   : > { %8012 = vmatprep.mubr.bf16.mxu1 %v9978_v47 }
 0x419   : > { %8013 = vmatmul.mubr.bf16.gmra.mrb[24].mxu1 %v9982_v3 }
 0x41a   : > { %8016 = vmatprep.mubr.bf16.mxu1 %v9984_v6 }
 0x421   : > { %8017 = vmatmul.mubr.bf16.gmra.mrb[28].mxu1 %v9988_v26 }
 0x422   : > { %8036 = vmatprep.mubr.bf16.mxu1 %v9900_v53  ;;  %v9017_v53 = vld [vmem:[#allocation9 + $0x128] sm:$0xff]  }
 0x429   : > { %8037 = vmatmul.mubr.bf16.vlgmr.msra.gmra.mrb[0].mxu1 %v9902_v22 }
 0x42a   : > { %8040 = vmatprep.mubr.bf16.mxu1 %v9907_v62  ;;  %8069 = vmatpush3.bf16.msra.mxu1 %v9012_v40  ;;  %v4524_v40 = vld [vmem:[#allocation3 + $0x19] sm:$0xff] }
 0x42b   : > { %8070 = vmatprep.subr.bf16.mxu1 %v9013_v27  ;;  %v4556_v55 = vpack.c.bf16 %v4525_v42, %v4524_v40  ;;  %v4539_v40 = vld [vmem:[#allocation3 + $0xc9] sm:$0xff] }
 0x42e   : > { %8071 = vmatpush3.bf16.msra.mxu1 %v9013_v27  ;;  %v9023_v27 = vld [vmem:[#allocation9 + $0x158] sm:$0xff]  }
 0x42f   : > { %8072 = vmatprep.subr.bf16.mxu1 %v9014_v35 }
 0x431   : > { %8041 = vmatmul.mubr.bf16.gmra.mrb[4].mxu1 %v9909_v8 }
 0x432   : > { %8044 = vmatprep.mubr.bf16.mxu1 %v9913_v25  ;;  %8073 = vmatpush3.bf16.msra.mxu1 %v9014_v35  ;;  %v10017_v35 = vpack.c.bf16 %v4533_v59, %v4532_v18  ;;  %v5470_v18 = vld [vmem:[#allocation3 + $0x171] sm:$0xff] }
 0x433   : > { %8074 = vmatprep.subr.bf16.mxu1 %v9015_v36 }
 0x436   : > { %8075 = vmatpush3.bf16.msra.mxu1 %v9015_v36  ;;  %v9024_v36 = vld [vmem:[#allocation9 + $0x160] sm:$0xff]  }
 0x437   : > { %8076 = vmatprep.subr.bf16.mxu1 %v9016_v37 }
 0x439   : > { %8045 = vmatmul.mubr.bf16.gmra.mrb[8].mxu1 %v9915_v34 }
 0x43a   : > { %8048 = vmatprep.mubr.bf16.mxu1 %v9919_v10  ;;  %8077 = vmatpush3.bf16.msra.mxu1 %v9016_v37  ;;  %v4535_v37 = vld [vmem:[#allocation3 + $0x99] sm:$0xff] }
 0x43b   : > { %8078 = vmatprep.subr.bf16.mxu1 %v9017_v53 }
 0x43e   : > { %8079 = vmatpush3.bf16.msra.mxu1 %v9017_v53  ;;  %v4537_v53 = vld [vmem:[#allocation3 + $0xb1] sm:$0xff] }
 0x43f   : > { %8080 = vmatprep.subr.bf16.mxu1 %v9018_v41 }
 0x441   : > { %8049 = vmatmul.mubr.bf16.gmra.mrb[12].mxu1 %v9921_v14 }
 0x442   : > { %8052 = vmatprep.mubr.bf16.mxu1 %v9925_v51  ;;  %8081 = vmatpush3.bf16.msra.mxu1 %v9018_v41  ;;  %v4534_v41 = vld [vmem:[#allocation3 + $0x91] sm:$0xff] }
 0x443   : > { %8082 = vmatprep.subr.bf16.mxu1 %v9019_v16 }
 0x446   : > { %8083 = vmatpush3.bf16.msra.mxu1 %v9019_v16  ;;  %v10021_v16 = vpack.c.bf16 %v4535_v37, %v4534_v41  ;;  %v5471_v37 = vld [vmem:[#allocation3 + $0x181] sm:$0xff]  ;;  %v5473_v41 = vld [vmem:[#allocation3 + $0x199] sm:$0xff] }
 0x447   : > { %8116 = vmatprep.subr.bf16.mxu1 %v9020_v29 }
 0x449   : > { %8053 = vmatmul.mubr.bf16.gmra.mrb[16].mxu1 %v9927_v63 }
 0x44a   : > { %8056 = vmatprep.mubr.bf16.mxu1 %v9931_v38 }
 0x451   : > { %8057 = vmatmul.mubr.bf16.gmra.mrb[20].mxu1 %v9933_v48 }
 0x452   : > { %8060 = vmatprep.mubr.bf16.mxu1 %v9937_v5 }
 0x459   : > { %8061 = vmatmul.mubr.bf16.gmra.mrb[24].mxu1 %v9939_v4 }
 0x45a   : > { %8064 = vmatprep.mubr.bf16.mxu1 %v9943_v39 }
 0x461   : > { %8065 = vmatmul.mubr.bf16.gmra.mrb[28].mxu1 %v10006_v30 }
 0x462   : > { %8084 = vmatprep.mubr.bf16.mxu1 %v4556_v55  ;;  %v4538_v55 = vld [vmem:[#allocation3 + $0xc1] sm:$0xff] }
 0x463   : > { %v10027_v60 = vpack.c.bf16 %v4539_v40, %v4538_v55  ;;  %v5751_v40 = vld [vmem:[#allocation3 + $0x4a] sm:$0xff]  ;;  %v5752_v55 = vld [vmem:[#allocation3 + $0x52] sm:$0xff] }
 0x469   : > { %8085 = vmatmul.mubr.bf16.vlgmr.msra.gmra.mrb[0].mxu1 %v10009_v21 }
 0x46a   : > { %8088 = vmatprep.mubr.bf16.mxu1 %v10011_v13  ;;  %8117 = vmatpush3.bf16.msra.mxu1 %v9020_v29  ;;  %v4536_v29 = vld [vmem:[#allocation3 + $0xa9] sm:$0xff] }
 0x46b   : > { %8118 = vmatprep.subr.bf16.mxu1 %v9021_v33  ;;  %v10023_v42 = vpack.c.bf16 %v4537_v53, %v4536_v29 }
 0x46e   : > { %8119 = vmatpush3.bf16.msra.mxu1 %v9021_v33  ;;  %v4565_v33 = vpack.c.bf16 %v9850_v50, %v10031_v28  ;;  %v9030_v50 = vld [vmem:[#allocation9 + $0x190] sm:$0xff]  }
 0x46f   : > { %8120 = vmatprep.subr.bf16.mxu1 %v9022_v15 }
 0x471   : > { %8089 = vmatmul.mubr.bf16.gmra.mrb[4].mxu1 %v10015_v49 }
 0x472   : > { %8092 = vmatprep.mubr.bf16.mxu1 %v10017_v35  ;;  %8121 = vmatpush3.bf16.msra.mxu1 %v9022_v15  ;;  %v5468_v15 = vld [vmem:[#allocation3 + $0x159] sm:$0xff] }
 0x473   : > { %8122 = vmatprep.subr.bf16.mxu1 %v9023_v27 }
 0x476   : > { %8123 = vmatpush3.bf16.msra.mxu1 %v9023_v27  ;;  %v5472_v27 = vld [vmem:[#allocation3 + $0x189] sm:$0xff] }
 0x477   : > { %8124 = vmatprep.subr.bf16.mxu1 %v9024_v36  ;;  %v5489_v53 = vpack.c.bf16 %v5472_v27, %v5471_v37 }
 0x479   : > { %8093 = vmatmul.mubr.bf16.gmra.mrb[8].mxu1 %v10021_v16 }
 0x47a   : > { %8096 = vmatprep.mubr.bf16.mxu1 %v10023_v42  ;;  %8125 = vmatpush3.bf16.msra.mxu1 %v9024_v36 }
 0x47b   : > { %8126 = vmatprep.subr.bf16.mxu1 %v9025_v31 }
 0x47e   : > { %8127 = vmatpush3.bf16.msra.mxu1 %v9025_v31  ;;  %v5749_v31 = vld [vmem:[#allocation3 + $0x32] sm:$0xff] }
 0x47f   : > { %8128 = vmatprep.subr.bf16.mxu1 %v9026_v52 }
 0x481   : > { %8097 = vmatmul.mubr.bf16.gmra.mrb[12].mxu1 %v10027_v60 }
 0x482   : > { %8100 = vmatprep.mubr.bf16.mxu1 %v9856_v1  ;;  %8129 = vmatpush3.bf16.msra.mxu1 %v9026_v52  ;;  %v9029_v1 = vld [vmem:[#allocation9 + $0x188] sm:$0xff]  }
 0x483   : > { %8130 = vmatprep.subr.bf16.mxu1 %v9027_v61 }
 0x486   : > { %8131 = vmatpush3.bf16.msra.mxu1 %v9027_v61  ;;  %v5754_v61 = vld [vmem:[#allocation3 + $0x6a] sm:$0xff] }
 0x487   : > { %8164 = vmatprep.subr.bf16.mxu1 %v9028_v19 }
 0x489   : > { %8101 = vmatmul.mubr.bf16.gmra.mrb[16].mxu1 %v4565_v33  ;;  %v5755_v33 = vld [vmem:[#allocation3 + $0x7a] sm:$0xff] }
 0x48a   : > { %8104 = vmatprep.mubr.bf16.mxu1 %v9870_v11  ;;  %v9032_v11 = vld [vmem:[#allocation9 + $0x1a0] sm:$0xff]  }
 0x491   : > { %8105 = vmatmul.mubr.bf16.gmra.mrb[20].mxu1 %v9867_v7  ;;  %v9031_v7 = vld [vmem:[#allocation9 + $0x198] sm:$0xff]  }
 0x492   : > { %8108 = vmatprep.mubr.bf16.mxu1 %v9884_v0  ;;  %v9034_v0 = vld [vmem:[#allocation9 + $0x1b0] sm:$0xff]  }
 0x499   : > { %8109 = vmatmul.mubr.bf16.gmra.mrb[24].mxu1 %v9881_v46  ;;  %v9033_v46 = vld [vmem:[#allocation9 + $0x1a8] sm:$0xff]  }
 0x49a   : > { %8112 = vmatprep.mubr.bf16.mxu1 %v9896_v44  ;;  %v9036_v44 = vld [vmem:[#allocation9 + $0x1c0] sm:$0xff]  }
 0x4a1   : > { %8113 = vmatmul.mubr.bf16.gmra.mrb[28].mxu1 %v9894_v43  ;;  %v9035_v43 = vld [vmem:[#allocation9 + $0x1b8] sm:$0xff]  }
 0x4a2   : > { %8132 = vmatprep.mubr.bf16.mxu1 %v9946_v56  ;;  %v4860_v56 = vld [vmem:[#allocation3 + $0x182] sm:$0xff] }
 0x4a9   : > { %8133 = vmatmul.mubr.bf16.vlgmr.msra.gmra.mrb[0].mxu1 %v9948_v58  ;;  %v4861_v58 = vld [vmem:[#allocation3 + $0x18a] sm:$0xff] }
 0x4aa   : > { %8136 = vmatprep.mubr.bf16.mxu1 %v9952_v17  ;;  %8165 = vmatpush3.bf16.msra.mxu1 %v9028_v19  ;;  %v10056_v17 = vpack.c.bf16 %v4861_v58, %v4860_v56  ;;  %v5782_v19 = vpack.c.bf16 %v5752_v55, %v5751_v40  ;;  %v5762_v56 = vld [vmem:[#allocation3 + $0xca] sm:$0xff] }
 0x4ab   : > { %8166 = vmatprep.subr.bf16.mxu1 %v9029_v1  ;;  %v6984_v40 = vld [vmem:[%s9454_s13 + $0x18] sm:$0xff]  }
 0x4ae   : > { %8167 = vmatpush3.bf16.msra.mxu1 %v9029_v1  ;;  %v5756_v1 = vld [vmem:[#allocation3 + $0x82] sm:$0xff] }
 0x4af   : > { %8168 = vmatprep.subr.bf16.mxu1 %v9030_v50 }
 0x4b1   : > { %8137 = vmatmul.mubr.bf16.gmra.mrb[4].mxu1 %v9954_v23  ;;  %v9037_v23 = vld [vmem:[#allocation9 + $0x1c8] sm:$0xff]  }
 0x4b2   : > { %8140 = vmatprep.mubr.bf16.mxu1 %v9958_v2  ;;  %8169 = vmatpush3.bf16.msra.mxu1 %v9030_v50  ;;  %v9038_v2 = vld [vmem:[#allocation9 + $0x1d0] sm:$0xff]   ;;  %v5757_v50 = vld [vmem:[#allocation3 + $0x92] sm:$0xff] }
 0x4b3   : > { %8170 = vmatprep.subr.bf16.mxu1 %v9031_v7 }
 0x4b6   : > { %8171 = vmatpush3.bf16.msra.mxu1 %v9031_v7  ;;  %v5758_v7 = vld [vmem:[#allocation3 + $0x9a] sm:$0xff] }
 0x4b7   : > { %8172 = vmatprep.subr.bf16.mxu1 %v9032_v11 }
 0x4b9   : > { %8141 = vmatmul.mubr.bf16.gmra.mrb[8].mxu1 %v9960_v12  ;;  %v9039_v12 = vld [vmem:[#allocation9 + $0x1d8] sm:$0xff]  }
 0x4ba   : > { %8144 = vmatprep.mubr.bf16.mxu1 %v9964_v24  ;;  %8173 = vmatpush3.bf16.msra.mxu1 %v9032_v11  ;;  %v9040_v24 = vld [vmem:[#allocation9 + $0x1e0] sm:$0xff]   ;;  %v5784_v11 = vpack.c.bf16 %v5756_v1, %v5755_v33  ;;  %v6837_v1 = vunpack.c.l.bf16 %v6984_v40 }
 0x4bb   : > { %8174 = vmatprep.subr.bf16.mxu1 %v9033_v46 }
 0x4be   : > { %8175 = vmatpush3.bf16.msra.mxu1 %v9033_v46  ;;  %v5785_v46 = vpack.c.bf16 %v5758_v7, %v5757_v50 }
 0x4bf   : > { %8176 = vmatprep.subr.bf16.mxu1 %v9034_v0 }
 0x4c1   : > { %8145 = vmatmul.mubr.bf16.gmra.mrb[12].mxu1 %v9966_v32  ;;  %v5457_v32 = vld [vmem:[#allocation3 + $0xd9] sm:$0xff] }
 0x4c2   : > { %8148 = vmatprep.mubr.bf16.mxu1 %v9970_v20  ;;  %8177 = vmatpush3.bf16.msra.mxu1 %v9034_v0  ;;  %v5759_v0 = vld [vmem:[#allocation3 + $0xaa] sm:$0xff] }
 0x4c3   : > { %8178 = vmatprep.subr.bf16.mxu1 %v9035_v43 }
 0x4c6   : > { %8179 = vmatpush3.bf16.msra.mxu1 %v9035_v43  ;;  %v5760_v43 = vld [vmem:[#allocation3 + $0xb2] sm:$0xff] }
 0x4c7   : > { %8212 = vmatprep.subr.bf16.mxu1 %v9036_v44  ;;  %v5786_v58 = vpack.c.bf16 %v5760_v43, %v5759_v0 }
 0x4c9   : > { %8149 = vmatmul.mubr.bf16.gmra.mrb[16].mxu1 %v9972_v9  ;;  %v9051_v9 = vld [vmem:[#allocation9 + $0x238] sm:$0xff]  }
 0x4ca   : > { %8152 = vmatprep.mubr.bf16.mxu1 %v9976_v45 }
 0x4d1   : > { %8153 = vmatmul.mubr.bf16.gmra.mrb[20].mxu1 %v9978_v47  ;;  %v5462_v47 = vld [vmem:[#allocation3 + $0x111] sm:$0xff] }
 0x4d2   : > { %8156 = vmatprep.mubr.bf16.mxu1 %v9982_v3  ;;  %v5464_v3 = vld [vmem:[#allocation3 + $0x129] sm:$0xff] }
 0x4d9   : > { %8157 = vmatmul.mubr.bf16.gmra.mrb[24].mxu1 %v9984_v6  ;;  %v5461_v6 = vld [vmem:[#allocation3 + $0x109] sm:$0xff] }
 0x4da   : > { %8160 = vmatprep.mubr.bf16.mxu1 %v9988_v26  ;;  %v5484_v26 = vpack.c.bf16 %v5462_v47, %v5461_v6  ;;  %v5779_v47 = vld [vmem:[#allocation3 + $0x19a] sm:$0xff] }
 0x4e1   : > { %8161 = vmatmul.mubr.bf16.gmra.mrb[28].mxu1 %v10056_v17 }
 0x4e2   : > { %8180 = vmatprep.mubr.bf16.mxu1 %v9902_v22  ;;  %v9041_v22 = vld [vmem:[#allocation9 + $0x1e8] sm:$0xff]  }
 0x4e9   : > { %8181 = vmatmul.mubr.bf16.vlgmr.msra.gmra.mrb[0].mxu1 %v9907_v62  ;;  %v9042_v62 = vld [vmem:[#allocation9 + $0x1f0] sm:$0xff]  }
 0x4ea   : > { %8184 = vmatprep.mubr.bf16.mxu1 %v9909_v8  ;;  %8213 = vmatpush3.bf16.msra.mxu1 %v9036_v44  ;;  %v9043_v8 = vld [vmem:[#allocation9 + $0x1f8] sm:$0xff]  }
 0x4eb   : > { %8214 = vmatprep.subr.bf16.mxu1 %v9037_v23  ;;  %v5761_v44 = vld [vmem:[#allocation3 + $0xc2] sm:$0xff] }
 0x4ee   : > { %8215 = vmatpush3.bf16.msra.mxu1 %v9037_v23  ;;  %v5787_v23 = vpack.c.bf16 %v5762_v56, %v5761_v44 }
 0x4ef   : > { %8216 = vmatprep.subr.bf16.mxu1 %v9038_v2 }
 0x4f1   : > { %8185 = vmatmul.mubr.bf16.gmra.mrb[4].mxu1 %v9913_v25  ;;  %v9044_v25 = vld [vmem:[#allocation9 + $0x200] sm:$0xff]  }
 0x4f2   : > { %8188 = vmatprep.mubr.bf16.mxu1 %v9915_v34  ;;  %8217 = vmatpush3.bf16.msra.mxu1 %v9038_v2  ;;  %v9058_v34 = vld [vmem:[#allocation2] sm:$0xff]  ;;  %v5763_v2 = vld [vmem:[#allocation3 + $0xda] sm:$0xff] }
 0x4f3   : > { %8218 = vmatprep.subr.bf16.mxu1 %v9039_v12 }
 0x4f6   : > { %8219 = vmatpush3.bf16.msra.mxu1 %v9039_v12  ;;  %v5764_v12 = vld [vmem:[#allocation3 + $0xe2] sm:$0xff] }
 0x4f7   : > { %8220 = vmatprep.subr.bf16.mxu1 %v9040_v24 }
 0x4f9   : > { %8189 = vmatmul.mubr.bf16.gmra.mrb[8].mxu1 %v9919_v10  ;;  %v5184_v10 = vpack.c.bf16 %v9058_v34, %v9058_v34  ;;  %v5768_v34 = vld [vmem:[#allocation3 + $0x112] sm:$0xff] }
 0x4fa   : > { %8192 = vmatprep.mubr.bf16.mxu1 %v9921_v14  ;;  %8221 = vmatpush3.bf16.msra.mxu1 %v9040_v24  ;;  %v9045_v14 = vld [vmem:[#allocation9 + $0x208] sm:$0xff]  }
 0x4fb   : > { %8222 = vmatprep.subr.bf16.mxu1 %v9041_v22  ;;  %v5765_v24 = vld [vmem:[#allocation3 + $0xf2] sm:$0xff] }
 0x4fe   : > { %8223 = vmatpush3.bf16.msra.mxu1 %v9041_v22  ;;  %v5766_v22 = vld [vmem:[#allocation3 + $0xfa] sm:$0xff] }
 0x4ff   : > { %8224 = vmatprep.subr.bf16.mxu1 %v9042_v62 }
 0x501   : > { %8193 = vmatmul.mubr.bf16.gmra.mrb[12].mxu1 %v9925_v51  ;;  %v9046_v51 = vld [vmem:[#allocation9 + $0x210] sm:$0xff]  }
 0x502   : > { %8196 = vmatprep.mubr.bf16.mxu1 %v9927_v63  ;;  %8225 = vmatpush3.bf16.msra.mxu1 %v9042_v62  ;;  %v9047_v63 = vld [vmem:[#allocation9 + $0x218] sm:$0xff]   ;;  %v5788_v62 = vpack.c.bf16 %v5764_v12, %v5763_v2 }
 0x503   : > { %8226 = vmatprep.subr.bf16.mxu1 %v9043_v8 }
 0x506   : > { %8227 = vmatpush3.bf16.msra.mxu1 %v9043_v8  ;;  %v5789_v8 = vpack.c.bf16 %v5766_v22, %v5765_v24 }
 0x507   : > { %8260 = vmatprep.subr.bf16.mxu1 %v9044_v25 }
 0x509   : > { %8197 = vmatmul.mubr.bf16.gmra.mrb[16].mxu1 %v9931_v38  ;;  %v9048_v38 = vld [vmem:[#allocation9 + $0x220] sm:$0xff]  }
 0x50a   : > { %8200 = vmatprep.mubr.bf16.mxu1 %v9933_v48  ;;  %v9049_v48 = vld [vmem:[#allocation9 + $0x228] sm:$0xff]  }
 0x511   : > { %8201 = vmatmul.mubr.bf16.gmra.mrb[20].mxu1 %v9937_v5  ;;  %v9050_v5 = vld [vmem:[#allocation9 + $0x230] sm:$0xff]  }
 0x512   : > { %8204 = vmatprep.mubr.bf16.mxu1 %v9939_v4  ;;  %v5458_v4 = vld [vmem:[#allocation3 + $0xe1] sm:$0xff] }
 0x513   : > { %v5482_v20 = vpack.c.bf16 %v5458_v4, %v5457_v32  ;;  %v5774_v4 = vld [vmem:[#allocation3 + $0x15a] sm:$0xff] }
 0x519   : > { %8205 = vmatmul.mubr.bf16.gmra.mrb[24].mxu1 %v9943_v39  ;;  %v5460_v39 = vld [vmem:[#allocation3 + $0xf9] sm:$0xff] }
 0x51a   : > { %8208 = vmatprep.mubr.bf16.mxu1 %v10006_v30  ;;  %v5483_v45 = vpack.c.bf16 %v5460_v39, %v10031_v28  ;;  %v5463_v30 = vld [vmem:[#allocation3 + $0x121] sm:$0xff] }
 0x521   : > { %8209 = vmatmul.mubr.bf16.gmra.mrb[28].mxu1 %v5184_v10  ;;  %v5769_v10 = vld [vmem:[#allocation3 + $0x122] sm:$0xff] }
 0x522   : > { %8228 = vmatprep.mubr.bf16.mxu1 %v10009_v21  ;;  %v5485_v21 = vpack.c.bf16 %v5464_v3, %v5463_v30  ;;  %v5780_v3 = vld [vmem:[#allocation3 + $0x1a2] sm:$0xff]  ;;  %v10087_v30 = vld [vmem:[%s10249_s5] ss:$0 sm:$0xff] }
 0x523   : > { %v5796_v6 = vpack.c.bf16 %v5780_v3, %v5779_v47 }
 0x529   : > { %8229 = vmatmul.mubr.bf16.vlgmr.msra.gmra.mrb[0].mxu1 %v10011_v13  ;;  %v5466_v13 = vld [vmem:[#allocation3 + $0x141] sm:$0xff] }
 0x52a   : > { %8232 = vmatprep.mubr.bf16.mxu1 %v10015_v49  ;;  %8261 = vmatpush3.bf16.msra.mxu1 %v9044_v25  ;;  %v5486_v59 = vpack.c.bf16 %v5466_v13, %v5465_v57  ;;  %v5487_v49 = vpack.c.bf16 %v5468_v15, %v5467_v54  ;;  %v5767_v25 = vld [vmem:[#allocation3 + $0x10a] sm:$0xff] }
 0x52b   : > { %8262 = vmatprep.subr.bf16.mxu1 %v9045_v14  ;;  %v10093_v15 = vld [vmem:[%s10250_s6] ss:$0 sm:$0xff] }
 0x52e   : > { %8263 = vmatpush3.bf16.msra.mxu1 %v9045_v14  ;;  %v5770_v14 = vld [vmem:[#allocation3 + $0x12a] sm:$0xff] }
 0x52f   : > { %8264 = vmatprep.subr.bf16.mxu1 %v9046_v51 }
 0x531   : > { %8233 = vmatmul.mubr.bf16.gmra.mrb[4].mxu1 %v10017_v35  ;;  %v5469_v35 = vld [vmem:[#allocation3 + $0x169] sm:$0xff] }
 0x532   : > { %8236 = vmatprep.mubr.bf16.mxu1 %v10021_v16  ;;  %8265 = vmatpush3.bf16.msra.mxu1 %v9046_v51  ;;  %v5488_v36 = vpack.c.bf16 %v5470_v18, %v5469_v35  ;;  %v5474_v16 = vld [vmem:[#allocation3 + $0x1a1] sm:$0xff]  ;;  %v5790_v51 = vpack.c.bf16 %v5768_v34, %v5767_v25 }
 0x533   : > { %8266 = vmatprep.subr.bf16.mxu1 %v9047_v63  ;;  %v5490_v29 = vpack.c.bf16 %v5474_v16, %v5473_v41 }
 0x536   : > { %8267 = vmatpush3.bf16.msra.mxu1 %v9047_v63  ;;  %v5791_v63 = vpack.c.bf16 %v5770_v14, %v5769_v10 }
 0x537   : > { %8268 = vmatprep.subr.bf16.mxu1 %v9048_v38 }
 0x539   : > { %8237 = vmatmul.mubr.bf16.gmra.mrb[8].mxu1 %v10023_v42  ;;  %v5750_v42 = vld [vmem:[#allocation3 + $0x3a] sm:$0xff] }
 0x53a   : > { %8240 = vmatprep.mubr.bf16.mxu1 %v10027_v60  ;;  %8269 = vmatpush3.bf16.msra.mxu1 %v9048_v38  ;;  %v5781_v52 = vpack.c.bf16 %v5750_v42, %v5749_v31  ;;  %v5753_v60 = vld [vmem:[#allocation3 + $0x62] sm:$0xff]  ;;  %v5771_v38 = vld [vmem:[#allocation3 + $0x13a] sm:$0xff] }
 0x53b   : > { %8270 = vmatprep.subr.bf16.mxu1 %v9049_v48  ;;  %v5783_v28 = vpack.c.bf16 %v5754_v61, %v5753_v60  ;;  %v6983_v60 = vld [vmem:[%s9454_s13 + $0x10] sm:$0xff]  }
 0x53c   : > { %v6833_v0 = vunpack.c.l.bf16 %v6983_v60 }
 0x53e   : > { %8271 = vmatpush3.bf16.msra.mxu1 %v9049_v48  ;;  %v5772_v48 = vld [vmem:[#allocation3 + $0x142] sm:$0xff] }
 0x53f   : > { %8272 = vmatprep.subr.bf16.mxu1 %v9050_v5  ;;  %v5792_v39 = vpack.c.bf16 %v5772_v48, %v5771_v38  ;;  %v6985_v38 = vld [vmem:[%s9454_s13 + $0x20] sm:$0xff]  }
 0x540   : > { %v6841_v3 = vunpack.c.l.bf16 %v6985_v38 }
 0x541   : > { %8241 = vmatmul.mubr.bf16.gmra.mrb[12].mxu1 %v5482_v20  ;;  %v5775_v20 = vld [vmem:[#allocation3 + $0x16a] sm:$0xff] }
 0x542   : > { %8244 = vmatprep.mubr.bf16.mxu1 %v5483_v45  ;;  %8273 = vmatpush3.bf16.msra.mxu1 %v9050_v5  ;;  %v5773_v5 = vld [vmem:[#allocation3 + $0x152] sm:$0xff] }
 0x543   : > { %8274 = vmatprep.subr.bf16.mxu1 %v9051_v9  ;;  %v5793_v32 = vpack.c.bf16 %v5774_v4, %v5773_v5 }
 0x546   : > { %8275 = vmatpush3.bf16.msra.mxu1 %v9051_v9  ;;  %v5776_v9 = vld [vmem:[#allocation3 + $0x172] sm:$0xff] }
 0x547   : > { %v5794_v45 = vpack.c.bf16 %v5776_v9, %v5775_v20 }
 0x549   : > { %8245 = vmatmul.mubr.bf16.gmra.mrb[16].mxu1 %v5484_v26  ;;  %v6982_v26 = vld [vmem:[%s9454_s13 + $0x8] sm:$0xff]  }
 0x54a   : > { %8248 = vmatprep.mubr.bf16.mxu1 %v5485_v21  ;;  %v6824_v21 = vld [vmem:[%s9454_s13] sm:$0xff]   ;;  %v6829_v57 = vunpack.c.l.bf16 %v6982_v26  ;;  %v6830_v35 = vunpack.c.h.bf16 %v6982_v26 }
 0x54b   : > { %v6825_v54 = vunpack.c.l.bf16 %v6824_v21  ;;  %v6826_v41 = vunpack.c.h.bf16 %v6824_v21 }
 0x551   : > { %8249 = vmatmul.mubr.bf16.gmra.mrb[20].mxu1 %v5486_v59 }
 0x552   : > { %8252 = vmatprep.mubr.bf16.mxu1 %v5487_v49 }
 0x559   : > { %8253 = vmatmul.mubr.bf16.gmra.mrb[24].mxu1 %v5488_v36 }
 0x55a   : > { %8256 = vmatprep.mubr.bf16.mxu1 %v5489_v53 }
 0x561   : > { %8257 = vmatmul.mubr.bf16.gmra.mrb[28].mxu1 %v5490_v29 }
 0x562   : > { %8276 = vmatprep.mubr.bf16.mxu1 %v5781_v52 }
 0x569   : > { %8277 = vmatmul.mubr.bf16.vlgmr.msra.gmra.mrb[0].mxu1 %v5782_v19 }
 0x56a   : > { %8280 = vmatprep.mubr.bf16.mxu1 %v5783_v28 }
 0x571   : > { %8281 = vmatmul.mubr.bf16.gmra.mrb[4].mxu1 %v5784_v11 }
 0x572   : > { %8284 = vmatprep.mubr.bf16.mxu1 %v5785_v46 }
 0x579   : > { %8285 = vmatmul.mubr.bf16.gmra.mrb[8].mxu1 %v5786_v58 }
 0x57a   : > { %8288 = vmatprep.mubr.bf16.mxu1 %v5787_v23  ;;  %v6838_v23 = vunpack.c.h.bf16 %v6984_v40 }
 0x581   : > { %8289 = vmatmul.mubr.bf16.gmra.mrb[12].mxu1 %v5788_v62  ;;  %v6834_v62 = vunpack.c.h.bf16 %v6983_v60 }
 0x582   : > { %8292 = vmatprep.mubr.bf16.mxu1 %v5789_v8 }
 0x589   : > { %8293 = vmatmul.mubr.bf16.gmra.mrb[16].mxu1 %v5790_v51  ;;  %v6986_v51 = vld [vmem:[%s9454_s13 + $0x28] sm:$0xff]  }
 0x58a   : > { %8296 = vmatprep.mubr.bf16.mxu1 %v5791_v63 }
 0x591   : > { %8297 = vmatmul.mubr.bf16.gmra.mrb[20].mxu1 %v5792_v39 }
 0x592   : > { %8300 = vmatprep.mubr.bf16.mxu1 %v5793_v32  ;;  %v6845_v32 = vunpack.c.l.bf16 %v6986_v51 }
 0x599   : > { %8301 = vmatmul.mubr.bf16.gmra.mrb[24].mxu1 %v5794_v45 }
 0x59a   : > { %8304 = vmatprep.mubr.bf16.mxu1 %v10056_v17 }
 0x5a1   : > { %8305 = vmatmul.mubr.bf16.gmra.mrb[28].mxu1 %v5796_v6 }
 0x63c   : > { %v8278_v13 = vpop.f32.mrb[0].mxu1 }
 0x63d   : > { %v6128_v17 = vmul.f32 %v8278_v13, %v10087_v30  ;;  %v5896_v59 = vpop.f32.mrb[1].mxu1 }
 0x63e   : > { %v6126_v49 = vmul.f32 %v10087_v30, %v5896_v59  ;;  %v8279_v18 = vpop.f32.mrb[2].mxu1 }
 0x63f   : > { %v6167_v27 = vadd.f32 %v10093_v15, %v6128_v17  ;;  %v6129_v36 = vmul.f32 %v8279_v18, %v10087_v30  ;;  %v5899_v37 = vpop.f32.mrb[3].mxu1  ;;  %v6842_v18 = vunpack.c.h.bf16 %v6985_v38 }
 0x640   : > { %v6165_v53 = vadd.f32 %v10093_v15, %v6126_v49  ;;  %v6127_v16 = vmul.f32 %v10087_v30, %v5899_v37 }
 0x641   : > { %v6199_v29 = vadd.f32 %v6829_v57, %v6167_v27  ;;  %v6168_v31 = vadd.f32 %v10093_v15, %v6129_v36  ;;  %v6846_v57 = vunpack.c.h.bf16 %v6986_v51 }
 0x642   : > { %v6197_v42 = vadd.f32 %v6825_v54, %v6165_v53  ;;  %v6166_v52 = vadd.f32 %v10093_v15, %v6127_v16 }
 0x643   : > { %v6200_v55 = vadd.f32 %v6830_v35, %v6168_v31  ;;  %v6231_v28 = vmax.f32 %v6199_v29, 0.0  ;;  %v6987_v29 = vld [vmem:[%s9454_s13 + $0x30] sm:$0xff]  }
 0x644   : > { %v6198_v61 = vadd.f32 %v6826_v41, %v6166_v52  ;;  %v8282_v19 = vpop.f32.mrb[4].mxu1  ;;  %v6229_v11 = vmax.f32 %v6197_v42, 0.0  ;;  %v6988_v41 = vld [vmem:[%s9454_s13 + $0x38] sm:$0xff]  }
 0x645   : > { %v6232_v33 = vmax.f32 %v6200_v55, 0.0  ;;  %v6132_v50 = vmul.f32 %v8282_v19, %v10087_v30  ;;  %v5912_v7 = vpop.f32.mrb[5].mxu1  ;;  %v6853_v55 = vunpack.c.l.bf16 %v6988_v41 }
 0x646   : > { %v6230_v46 = vmax.f32 %v6198_v61, 0.0  ;;  %v6130_v43 = vmul.f32 %v10087_v30, %v5912_v7  ;;  %v8283_v44 = vpop.f32.mrb[6].mxu1 }
 0x647   : > { %v6895_v56 = vpack.c.bf16 %v6232_v33, %v6231_v28  ;;  %v6171_v58 = vadd.f32 %v10093_v15, %v6132_v50  ;;  %v6133_v2 = vmul.f32 %v8283_v44, %v10087_v30  ;;  %v5915_v12 = vpop.f32.mrb[7].mxu1  ;;  %v6849_v33 = vunpack.c.l.bf16 %v6987_v29 }
 0x648   : > { %v6890_v24 = vpack.c.bf16 %v6230_v46, %v6229_v11  ;;  %v6169_v22 = vadd.f32 %v10093_v15, %v6130_v43  ;;  %v6131_v8 = vmul.f32 %v10087_v30, %v5915_v12  ;;  %v6854_v46 = vunpack.c.h.bf16 %v6988_v41 }
 0x649   : > { %6997 = vst [vmem:[%s10113_s21 + $0x8] sm:$0xff] %v6895_v56   ;;  %v6203_v25 = vadd.f32 %v6837_v1, %v6171_v58  ;;  %v6172_v34 = vadd.f32 %v10093_v15, %v6133_v2  ;;  %v6850_v58 = vunpack.c.h.bf16 %v6987_v29 }
 0x64a   : > { %6891 = vst [vmem:[%s10113_s21] sm:$0xff] %v6890_v24   ;;  %v6201_v10 = vadd.f32 %v6833_v0, %v6169_v22  ;;  %v6170_v14 = vadd.f32 %v10093_v15, %v6131_v8 }
 0x64b   : > { %v6204_v63 = vadd.f32 %v6838_v23, %v6172_v34  ;;  %v6235_v4 = vmax.f32 %v6203_v25, 0.0  ;;  %v6989_v25 = vld [vmem:[%s9454_s13 + $0x40] sm:$0xff]  }
 0x64c   : > { %v6202_v48 = vadd.f32 %v6834_v62, %v6170_v14  ;;  %v8286_v5 = vpop.f32.mrb[8].mxu1  ;;  %v6233_v45 = vmax.f32 %v6201_v10, 0.0  ;;  %v6990_v62 = vld [vmem:[%s9454_s13 + $0x48] sm:$0xff]  }
 0x64d   : > { %v6236_v39 = vmax.f32 %v6204_v63, 0.0  ;;  %v6136_v20 = vmul.f32 %v8286_v5, %v10087_v30  ;;  %v5928_v9 = vpop.f32.mrb[9].mxu1  ;;  %v6861_v63 = vunpack.c.l.bf16 %v6990_v62 }
 0x64e   : > { %v6234_v47 = vmax.f32 %v6202_v48, 0.0  ;;  %v6134_v6 = vmul.f32 %v10087_v30, %v5928_v9  ;;  %v8287_v26 = vpop.f32.mrb[10].mxu1 }
 0x64f   : > { %v6905_v21 = vpack.c.bf16 %v6236_v39, %v6235_v4  ;;  %v6175_v13 = vadd.f32 %v10093_v15, %v6136_v20  ;;  %v6137_v17 = vmul.f32 %v8287_v26, %v10087_v30  ;;  %v5931_v59 = vpop.f32.mrb[11].mxu1  ;;  %v6857_v39 = vunpack.c.l.bf16 %v6989_v25 }
 0x650   : > { %v6900_v54 = vpack.c.bf16 %v6234_v47, %v6233_v45  ;;  %v6173_v49 = vadd.f32 %v10093_v15, %v6134_v6  ;;  %v6135_v27 = vmul.f32 %v10087_v30, %v5931_v59  ;;  %v6862_v47 = vunpack.c.h.bf16 %v6990_v62 }
 0x651   : > { %6999 = vst [vmem:[%s10113_s21 + $0x18] sm:$0xff] %v6905_v21   ;;  %v6207_v35 = vadd.f32 %v6845_v32, %v6175_v13  ;;  %v6176_v36 = vadd.f32 %v10093_v15, %v6137_v17  ;;  %v6858_v13 = vunpack.c.h.bf16 %v6989_v25 }
 0x652   : > { %6998 = vst [vmem:[%s10113_s21 + $0x10] sm:$0xff] %v6900_v54   ;;  %v6205_v37 = vadd.f32 %v6841_v3, %v6173_v49  ;;  %v6174_v53 = vadd.f32 %v10093_v15, %v6135_v27 }
 0x653   : > { %v6208_v16 = vadd.f32 %v6846_v57, %v6176_v36  ;;  %v6239_v52 = vmax.f32 %v6207_v35, 0.0  ;;  %v6991_v35 = vld [vmem:[%s9454_s13 + $0x50] sm:$0xff]  }
 0x654   : > { %v6206_v31 = vadd.f32 %v6842_v18, %v6174_v53  ;;  %v8290_v42 = vpop.f32.mrb[12].mxu1  ;;  %v6237_v19 = vmax.f32 %v6205_v37, 0.0  ;;  %v6992_v18 = vld [vmem:[%s9454_s13 + $0x58] sm:$0xff]  }
 0x655   : > { %v6240_v40 = vmax.f32 %v6208_v16, 0.0  ;;  %v6140_v60 = vmul.f32 %v8290_v42, %v10087_v30  ;;  %v5944_v61 = vpop.f32.mrb[13].mxu1  ;;  %v6869_v16 = vunpack.c.l.bf16 %v6992_v18 }
 0x656   : > { %v6238_v28 = vmax.f32 %v6206_v31, 0.0  ;;  %v6138_v1 = vmul.f32 %v10087_v30, %v5944_v61  ;;  %v8291_v50 = vpop.f32.mrb[14].mxu1 }
 0x657   : > { %v6915_v7 = vpack.c.bf16 %v6240_v40, %v6239_v52  ;;  %v6179_v11 = vadd.f32 %v10093_v15, %v6140_v60  ;;  %v6141_v0 = vmul.f32 %v8291_v50, %v10087_v30  ;;  %v5947_v43 = vpop.f32.mrb[15].mxu1  ;;  %v6865_v40 = vunpack.c.l.bf16 %v6991_v35 }
 0x658   : > { %v6910_v44 = vpack.c.bf16 %v6238_v28, %v6237_v19  ;;  %v6177_v56 = vadd.f32 %v10093_v15, %v6138_v1  ;;  %v6139_v23 = vmul.f32 %v10087_v30, %v5947_v43  ;;  %v6870_v28 = vunpack.c.h.bf16 %v6992_v18 }
 0x659   : > { %7001 = vst [vmem:[%s10113_s21 + $0x28] sm:$0xff] %v6915_v7   ;;  %v6211_v2 = vadd.f32 %v6853_v55, %v6179_v11  ;;  %v6180_v12 = vadd.f32 %v10093_v15, %v6141_v0  ;;  %v6866_v11 = vunpack.c.h.bf16 %v6991_v35 }
 0x65a   : > { %7000 = vst [vmem:[%s10113_s21 + $0x20] sm:$0xff] %v6910_v44   ;;  %v6209_v24 = vadd.f32 %v6849_v33, %v6177_v56  ;;  %v6178_v22 = vadd.f32 %v10093_v15, %v6139_v23 }
 0x65b   : > { %v6212_v8 = vadd.f32 %v6854_v46, %v6180_v12  ;;  %v6243_v14 = vmax.f32 %v6211_v2, 0.0  ;;  %v6993_v2 = vld [vmem:[%s9454_s13 + $0x60] sm:$0xff]  }
 0x65c   : > { %v6210_v34 = vadd.f32 %v6850_v58, %v6178_v22  ;;  %v8294_v10 = vpop.f32.mrb[16].mxu1  ;;  %v6241_v5 = vmax.f32 %v6209_v24, 0.0  ;;  %v6994_v58 = vld [vmem:[%s9454_s13 + $0x68] sm:$0xff]  }
 0x65d   : > { %v6244_v51 = vmax.f32 %v6212_v8, 0.0  ;;  %v6144_v38 = vmul.f32 %v8294_v10, %v10087_v30  ;;  %v5960_v48 = vpop.f32.mrb[17].mxu1  ;;  %v6877_v8 = vunpack.c.l.bf16 %v6994_v58 }
 0x65e   : > { %v6242_v4 = vmax.f32 %v6210_v34, 0.0  ;;  %v6142_v32 = vmul.f32 %v10087_v30, %v5960_v48  ;;  %v8295_v20 = vpop.f32.mrb[18].mxu1 }
 0x65f   : > { %v6925_v9 = vpack.c.bf16 %v6244_v51, %v6243_v14  ;;  %v6183_v45 = vadd.f32 %v10093_v15, %v6144_v38  ;;  %v6145_v3 = vmul.f32 %v8295_v20, %v10087_v30  ;;  %v5963_v6 = vpop.f32.mrb[19].mxu1  ;;  %v6873_v51 = vunpack.c.l.bf16 %v6993_v2 }
 0x660   : > { %v6920_v26 = vpack.c.bf16 %v6242_v4, %v6241_v5  ;;  %v6181_v21 = vadd.f32 %v10093_v15, %v6142_v32  ;;  %v6143_v57 = vmul.f32 %v10087_v30, %v5963_v6  ;;  %v6878_v4 = vunpack.c.h.bf16 %v6994_v58 }
 0x661   : > { %7003 = vst [vmem:[%s10113_s21 + $0x38] sm:$0xff] %v6925_v9   ;;  %v6215_v17 = vadd.f32 %v6861_v63, %v6183_v45  ;;  %v6184_v59 = vadd.f32 %v10093_v15, %v6145_v3  ;;  %v6874_v45 = vunpack.c.h.bf16 %v6993_v2 }
 0x662   : > { %7002 = vst [vmem:[%s10113_s21 + $0x30] sm:$0xff] %v6920_v26   ;;  %v6213_v54 = vadd.f32 %v6857_v39, %v6181_v21  ;;  %v6182_v49 = vadd.f32 %v10093_v15, %v6143_v57 }
 0x663   : > { %v6216_v27 = vadd.f32 %v6862_v47, %v6184_v59  ;;  %v6247_v53 = vmax.f32 %v6215_v17, 0.0  ;;  %v6995_v17 = vld [vmem:[%s9454_s13 + $0x70] sm:$0xff]  }
 0x664   : > { %v6214_v36 = vadd.f32 %v6858_v13, %v6182_v49  ;;  %v8298_v37 = vpop.f32.mrb[20].mxu1  ;;  %v6245_v42 = vmax.f32 %v6213_v54, 0.0  ;;  %v6996_v13 = vld [vmem:[%s9454_s13 + $0x78] sm:$0xff]  }
 0x665   : > { %v6248_v41 = vmax.f32 %v6216_v27, 0.0  ;;  %v6148_v29 = vmul.f32 %v8298_v37, %v10087_v30  ;;  %v5976_v31 = vpop.f32.mrb[21].mxu1  ;;  %v6885_v27 = vunpack.c.l.bf16 %v6996_v13 }
 0x666   : > { %v6246_v52 = vmax.f32 %v6214_v36, 0.0  ;;  %v6146_v55 = vmul.f32 %v10087_v30, %v5976_v31  ;;  %v8299_v60 = vpop.f32.mrb[22].mxu1 }
 0x667   : > { %v6935_v61 = vpack.c.bf16 %v6248_v41, %v6247_v53  ;;  %v6187_v19 = vadd.f32 %v10093_v15, %v6148_v29  ;;  %v6149_v33 = vmul.f32 %v8299_v60, %v10087_v30  ;;  %v5979_v1 = vpop.f32.mrb[23].mxu1  ;;  %v6881_v41 = vunpack.c.l.bf16 %v6995_v17 }
 0x668   : > { %v6930_v50 = vpack.c.bf16 %v6246_v52, %v6245_v42  ;;  %v6185_v7 = vadd.f32 %v10093_v15, %v6146_v55  ;;  %v6147_v46 = vmul.f32 %v10087_v30, %v5979_v1  ;;  %v6886_v52 = vunpack.c.h.bf16 %v6996_v13 }
 0x669   : > { %7005 = vst [vmem:[%s10113_s21 + $0x48] sm:$0xff] %v6935_v61   ;;  %v6219_v0 = vadd.f32 %v6869_v16, %v6187_v19  ;;  %v6188_v43 = vadd.f32 %v10093_v15, %v6149_v33  ;;  %v6882_v19 = vunpack.c.h.bf16 %v6995_v17 }
 0x66a   : > { %7004 = vst [vmem:[%s10113_s21 + $0x40] sm:$0xff] %v6930_v50   ;;  %v6217_v44 = vadd.f32 %v6865_v40, %v6185_v7  ;;  %v6186_v56 = vadd.f32 %v10093_v15, %v6147_v46 }
 0x66b   : > { %v6220_v23 = vadd.f32 %v6870_v28, %v6188_v43  ;;  %v6251_v22 = vmax.f32 %v6219_v0, 0.0 }
 0x66c   : > { %v6218_v12 = vadd.f32 %v6866_v11, %v6186_v56  ;;  %v8302_v24 = vpop.f32.mrb[24].mxu1  ;;  %v6249_v10 = vmax.f32 %v6217_v44, 0.0 }
 0x66d   : > { %v6252_v62 = vmax.f32 %v6220_v23, 0.0  ;;  %v6152_v25 = vmul.f32 %v8302_v24, %v10087_v30  ;;  %v5992_v34 = vpop.f32.mrb[25].mxu1 }
 0x66e   : > { %v6250_v14 = vmax.f32 %v6218_v12, 0.0  ;;  %v6150_v63 = vmul.f32 %v10087_v30, %v5992_v34  ;;  %v8303_v38 = vpop.f32.mrb[26].mxu1 }
 0x66f   : > { %v6945_v48 = vpack.c.bf16 %v6252_v62, %v6251_v22  ;;  %v6191_v5 = vadd.f32 %v10093_v15, %v6152_v25  ;;  %v6153_v39 = vmul.f32 %v8303_v38, %v10087_v30  ;;  %v5995_v32 = vpop.f32.mrb[27].mxu1 }
 0x670   : > { %v6940_v20 = vpack.c.bf16 %v6250_v14, %v6249_v10  ;;  %v6189_v9 = vadd.f32 %v10093_v15, %v6150_v63  ;;  %v6151_v47 = vmul.f32 %v10087_v30, %v5995_v32 }
 0x671   : > { %7007 = vst [vmem:[%s10113_s21 + $0x58] sm:$0xff] %v6945_v48   ;;  %v6223_v3 = vadd.f32 %v6877_v8, %v6191_v5  ;;  %v6192_v6 = vadd.f32 %v10093_v15, %v6153_v39 }
 0x672   : > { %7006 = vst [vmem:[%s10113_s21 + $0x50] sm:$0xff] %v6940_v20   ;;  %v6221_v26 = vadd.f32 %v6873_v51, %v6189_v9  ;;  %v6190_v21 = vadd.f32 %v10093_v15, %v6151_v47 }
 0x673   : > { %v6224_v57 = vadd.f32 %v6878_v4, %v6192_v6  ;;  %v6255_v49 = vmax.f32 %v6223_v3, 0.0 }
 0x674   : > { %v6222_v59 = vadd.f32 %v6874_v45, %v6190_v21  ;;  %v8306_v54 = vpop.f32.mrb[28].mxu1  ;;  %v6253_v37 = vmax.f32 %v6221_v26, 0.0 }
 0x675   : > { %v6256_v18 = vmax.f32 %v6224_v57, 0.0  ;;  %v6156_v35 = vmul.f32 %v8306_v54, %v10087_v30  ;;  %v6008_v36 = vpop.f32.mrb[29].mxu1 }
 0x676   : > { %v6254_v53 = vmax.f32 %v6222_v59, 0.0  ;;  %v6154_v16 = vmul.f32 %v10087_v30, %v6008_v36  ;;  %v8307_v29 = vpop.f32.mrb[30].mxu1 }
 0x677   : > { %v6955_v31 = vpack.c.bf16 %v6256_v18, %v6255_v49  ;;  %v6195_v42 = vadd.f32 %v10093_v15, %v6156_v35  ;;  %v6157_v40 = vmul.f32 %v8307_v29, %v10087_v30  ;;  %v6011_v55 = vpop.f32.mrb[31].mxu1 }
 0x678   : > { %v6950_v60 = vpack.c.bf16 %v6254_v53, %v6253_v37  ;;  %v6193_v61 = vadd.f32 %v10093_v15, %v6154_v16  ;;  %v6155_v28 = vmul.f32 %v10087_v30, %v6011_v55 }
 0x679   : > { %7009 = vst [vmem:[%s10113_s21 + $0x68] sm:$0xff] %v6955_v31   ;;  %v6227_v33 = vadd.f32 %v6885_v27, %v6195_v42  ;;  %v6196_v1 = vadd.f32 %v10093_v15, %v6157_v40 }
 0x67a   : > { %7008 = vst [vmem:[%s10113_s21 + $0x60] sm:$0xff] %v6950_v60   ;;  %v6225_v50 = vadd.f32 %v6881_v41, %v6193_v61  ;;  %v6194_v7 = vadd.f32 %v10093_v15, %v6155_v28 }
 0x67b   : > { %v6228_v11 = vadd.f32 %v6886_v52, %v6196_v1  ;;  %v6259_v0 = vmax.f32 %v6227_v33, 0.0 }
 0x67c   : > { %v6226_v46 = vadd.f32 %v6882_v19, %v6194_v7  ;;  %v6257_v44 = vmax.f32 %v6225_v50, 0.0 }
 0x67d   : > { %v6260_v43 = vmax.f32 %v6228_v11, 0.0 }
 0x67e   : > { %v6258_v30 = vmax.f32 %v6226_v46, 0.0 }
 0x67f   : > { %v6965_v56 = vpack.c.bf16 %v6260_v43, %v6259_v0 }
 0x680   : > { %v6960_v15 = vpack.c.bf16 %v6258_v30, %v6257_v44 }
 0x681   : > { %7011 = vst [vmem:[%s10113_s21 + $0x78] sm:$0xff] %v6965_v56  }
 0x682   : > { %7010 = vst [vmem:[%s10113_s21 + $0x70] sm:$0xff] %v6960_v15  }
 0x683   : > { %9158 = shalt.err (!%p9155_p1)
}
 0x684   : > { %s9159_s15 = scalar_lea.hbm %s10196_s30, 2048  ;;  %s9163_s21 = scalar_lea.hbm %s10251_s7, 4096 }
 0x685   : > { %p9160_p13 = scmp.ne.s32.totalorder %s10196_s30, %s9159_s15  ;;  %p9164_p4 = scmp.lt.u32.totalorder %s10196_s30, %s10251_s7 }
 0x686   : > { %p9165_p5 = scmp.lt.u32.totalorder %s9163_s21, %s9159_s15  ;;  %p9167_p11 = scmp.lt.u32.totalorder %s9159_s15, %s10196_s30 }
 0x687   : > { %p9161_p6 = pnand %p9160_p13, %p10267_p0 }
 0x688   : > { %p9166_p8 = por %p9165_p5, %p9164_p4 }
 0x689   : > { %p9162_p10 = pneg %p9161_p6 }
 0x68a   : > { %p9168_p2 = por %p9167_p11, %p9166_p8 }
 0x68c   : > { %p9169_p3 = pnand %p9168_p2, %p9162_p10 }
 0x68e   : > { %9172 = shalt.err (!%p9169_p3)
}
 0x68f   : > { %s9225_s13 = smov 64   ;;  %s9226_s9 = smov 4  }
 0x690   : > { %8830 = dma.vmem_to_hbm [thread:$0]  (%p10267_p0), %s10198_s22, 2048, %s10196_s30, %s6422_s28, %s9225_s13, %s9225_s13, %s9226_s9  }
 0x691 PF: > { %s6450_s29 = sand.u32 1, %s9203_s24   ;;  %p10268_p7 = scmp.ne.s32.totalorder %s10257_s8, 0 }
 0x692   : > { %p10269_p9 = scmp.ge.s32.totalorder %s9215_s27, 2  ;;  %s6451_s11 = scalar_lea.sflag [#allocation6], %s6450_s29 }
 0x694   : > { %p8844_p12 = pnand %p10269_p9, %p10268_p7 }
 0x696   : > { %9198 = dma.done.wait (!%p8844_p12), %s6451_s11, 2048  }
 0x697   : > { %9200 = vsyncadd (!%p8844_p12), %s6451_s11, 4294965248  ;;  %p21_p1 = scmp.ge.s32.totalorder %s9383_s12, 4   ;;  %s10270_s24 = smov %s9207_s25 }
 0x698   : > { %s10271_s25 = smov %s9211_s26  ;;  %s10272_s26 = smov %s9399_s17 }
 0x699   : > { %s10273_s27 = smov %s9383_s12  ;;  %23 = sbr.rel (!%p21_p1) target bundleno = 6 (0x6), region = 121 }
 0x6a0   :  { %6456 = vsyncpa [#allocation5], 1 }
 0x6a1   :  { %6458 = vsyncpa [#allocation5 + $0x1], 1 }
 0x6a2   :  { %6459 = vsyncpa [#allocation8], 1 }
 0x6a3   :  { %6460 = vsyncpa [#allocation6], 1 }
 0x6a4   :  { %6462 = vsyncpa [#allocation6 + $0x1], 1 }

</bundles_post_ra>
